<compile_context>
chip_gen: v7x
topology: tpu7x:2x2x1
jax: 0.10.0
libtpu: 0.0.40
codegen_flags: <defaults>
</compile_context>

<pallas_src>
import functools

import jax
import jax.numpy as jnp
import numpy as np
from jax.experimental import pallas as pl
from jax.experimental.pallas import tpu as pltpu

EMB_DIMS = 256            # args.emb_dims
OUTPUT_CHANNELS = 5
PAD_OUT = 128             # classifier channels padded to a full sublane tile set
OUT_LANES = 128           # lanes reserved per grid step for the classifier output
BN_EPS = 1e-5


# ----------------------------- Pallas kernel -------------------------------

def pointnet_kernel(x_ref,
                    w1_ref, w2_ref, w3_ref, w4_ref, w5_ref, w6_ref, w7_ref,
                    bcol_ref,
                    o_ref,
                    pool_ref,
                    *, block_b, n_points):
    # x_ref: (3, block_b * n_points) f32 -- channels on sublanes, points on lanes.
    bcol = bcol_ref[...]                       # (512, 8) f32: one bias column per layer
    b1 = bcol[0:64, 0:1]
    b2 = bcol[0:64, 1:2]
    b3 = bcol[0:64, 2:3]
    b4 = bcol[0:128, 3:4]
    b5 = bcol[0:EMB_DIMS, 4:5]
    b6 = bcol[0:512, 5:6]
    b7 = bcol[0:PAD_OUT, 6:7]

    x = x_ref[...]                             # (3, m) f32

    # conv1 (Cin=3): VPU broadcast-FMA in f32; avoids a ~1%-utilized K=3 MXU dot.
    w1 = w1_ref[...]                           # (64, 3) f32, BN scale folded in
    h = (w1[:, 0:1] * x[0:1, :]
         + w1[:, 1:2] * x[1:2, :]
         + w1[:, 2:3] * x[2:3, :])
    h = jnp.maximum(h + b1, 0.0).astype(jnp.bfloat16)          # (64, m) bf16

    def fused(h_bf, w_ref, b, relu=True, out_dtype=jnp.bfloat16):
        # Channel-major matmul: (Cout, Cin) @ (Cin, M) so the point/batch axis M
        # fills the MXU's lane-wide output dimension.  bf16 operands, f32
        # accumulation; bias + ReLU on the VPU in f32; single cast on the way out.
        y = jnp.dot(w_ref[...], h_bf, preferred_element_type=jnp.float32)
        y = y + b
        if relu:
            y = jnp.maximum(y, 0.0)
        return y.astype(out_dtype)

    h = fused(h, w2_ref, b2)                                   # (64, m)  bf16
    h = fused(h, w3_ref, b3)                                   # (64, m)  bf16
    h = fused(h, w4_ref, b4)                                   # (128, m) bf16
    h = fused(h, w5_ref, b5, out_dtype=jnp.float32)            # (EMB, m) f32

    # adaptive_max_pool1d(x, 1).squeeze(): per-cloud max over its own lane slice
    # (an XLU reduce per cloud).  Results land in a small VMEM scratch whose
    # OUT_LANES columns feed the channel-major FC head directly (no transposes).
    pool_ref[...] = jnp.zeros((EMB_DIMS, OUT_LANES), jnp.float32)
    for b in range(block_b):                                   # static unroll, block_b <= 128
        sl = h[:, b * n_points:(b + 1) * n_points]             # lane-aligned static slice
        pool_ref[:, b:b + 1] = jnp.max(sl, axis=1, keepdims=True)

    pooled = pool_ref[...].astype(jnp.bfloat16)                # (EMB, OUT_LANES) bf16

    h6 = fused(pooled, w6_ref, b6)                             # (512, OUT_LANES) bf16
    # TODO(synk): dropout (self.dp1) is identity in eval mode.
    y7 = jnp.dot(w7_ref[...], h6, preferred_element_type=jnp.float32) + b7
    o_ref[...] = y7                                            # (PAD_OUT, OUT_LANES) f32


# ------------------------------- Wrapper ------------------------------------

def _round_up(v, m):
    return (v + m - 1) // m * m


def _vmem_capacity_bytes():
    """Generation-aware VMEM capacity (128 MiB on v5e/v6e, 64 MiB on v7x)."""
    try:
        return int(pltpu.get_tpu_info().vmem_capacity_bytes)
    except Exception:
        return 64 * 1024 * 1024        # conservative (v7x-sized) fallback


def _pick_block_b(B, n_pad, vmem_cap):
    """Pick clouds per grid step from the actual VMEM budget.

    Live working set per cloud is dominated by the conv5 boundary:
    h4 bf16 (128 ch) + conv5 f32 accumulator (256 ch) + h5 f32 (256 ch)
    ~= 2.3 KiB/point, plus the double-buffered input block and transients.
    """
    per_cloud = n_pad * 3072
    budget = int(vmem_cap * 0.35)      # ~22 MiB on v7x, ~45 MiB on v5e/v6e
    bt = max(1, min(B, OUT_LANES, budget // max(per_cloud, 1)))
    grid_b = pl.cdiv(B, bt)
    # Prefer an even number of grid steps so both v7x TensorCores stay busy;
    # one extra (smaller) step is harmless on single-TC v5e/v6e.
    if grid_b > 1 and grid_b % 2 == 1:
        grid_b += 1
        bt = pl.cdiv(B, grid_b)
    return int(bt), int(grid_b)


def pointnet_cls_forward(x_bcn, kparams, block_b=None):
    """x_bcn: (B, 3, N) float32 (native PyTorch Conv1d layout). Returns (B, 5) f32."""
    B, C, N = x_bcn.shape
    assert C == 3
    x = x_bcn.astype(jnp.float32)

    # Pad the point axis to a lane multiple with edge values: duplicated points
    # do not change the max-pool, and all earlier layers are pointwise.
    n_pad = _round_up(N, 128)
    if n_pad != N:
        x = jnp.pad(x, ((0, 0), (0, 0), (0, n_pad - N)), mode="edge")

    vmem_cap = _vmem_capacity_bytes()
    if block_b is None:
        block_b, grid_b = _pick_block_b(B, n_pad, vmem_cap)
    else:
        block_b = int(max(1, min(block_b, OUT_LANES, B)))
        grid_b = int(pl.cdiv(B, block_b))
    b_pad = grid_b * block_b
    if b_pad != B:
        x = jnp.pad(x, ((0, b_pad - B), (0, 0), (0, 0)))

    # (B, 3, N) -> (3, B*N): channels on sublanes (3->8 pad), points on lanes.
    x_flat = jnp.transpose(x, (1, 0, 2)).reshape(3, b_pad * n_pad)

    w1, w2, w3, w4, w5, w6, w7, bcol = kparams
    consts = (w1, w2, w3, w4, w5, w6, w7, bcol)

    tile_m = block_b * n_pad
    in_specs = [pl.BlockSpec((3, tile_m), lambda i: (0, i))]
    # Small weight / bias tensors stay fully resident across all grid steps.
    in_specs += [pl.BlockSpec(p.shape, lambda i: (0, 0)) for p in consts]
    out_spec = pl.BlockSpec((PAD_OUT, OUT_LANES), lambda i: (0, i))

    flops_pt = 2 * (3 * 64 + 64 * 64 + 64 * 64 + 64 * 128 + 128 * EMB_DIMS)
    flops_head = 2 * (EMB_DIMS * 512 + 512 * PAD_OUT)
    bytes_acc = int(x_flat.size * 4
                    + sum(int(p.size) * p.dtype.itemsize for p in consts)
                    + grid_b * PAD_OUT * OUT_LANES * 4)
    cost = pl.CostEstimate(flops=int(b_pad * n_pad * flops_pt + b_pad * flops_head),
                           transcendentals=0,
                           bytes_accessed=bytes_acc)

    kernel = functools.partial(pointnet_kernel, block_b=block_b, n_points=n_pad)

    out = pl.pallas_call(
        kernel,
        out_shape=jax.ShapeDtypeStruct((PAD_OUT, grid_b * OUT_LANES), jnp.float32),
        grid_spec=pltpu.PrefetchScalarGridSpec(
            num_scalar_prefetch=0,
            grid=(grid_b,),
            in_specs=in_specs,
            out_specs=out_spec,
            scratch_shapes=[pltpu.VMEM((EMB_DIMS, OUT_LANES), jnp.float32)],
        ),
        compiler_params=pltpu.CompilerParams(
            dimension_semantics=("parallel",),
            # ~75% of physical VMEM: 48 MiB on v7x, ~96 MiB on v5e/v6e.
            vmem_limit_bytes=int(min(vmem_cap * 3 // 4, 100 * 1024 * 1024)),
        ),
        cost_estimate=cost,
    )(x_flat, *consts)

    # out[c, i*OUT_LANES + j] holds channel c of cloud i*block_b + j.
    out = out.reshape(PAD_OUT, grid_b, OUT_LANES)[:, :, :block_b]
    out = jnp.transpose(out, (1, 2, 0)).reshape(grid_b * block_b, PAD_OUT)
    return out[:B, :OUTPUT_CHANNELS]


# --------------------------- Parameter creation ------------------------------

def make_params(key):
    """Inference-mode fused parameters, channel-major.

    Conv1d(k=1, bias=False)/Linear(bias=False) + BatchNorm1d fold into
    (s[:, None] * W) @ h + b with s = gamma/sqrt(var+eps), b = beta - mean*s.
    Matmul weights stored bf16; conv1 weight and all biases stay f32.
    """
    keys = iter(jax.random.split(key, 64))

    def rnd(shape, scale=0.1):
        return (scale * jax.random.normal(next(keys), shape)).astype(jnp.float32)

    def bn(c):
        gamma = 1.0 + 0.1 * jax.random.normal(next(keys), (c,))
        beta = 0.1 * jax.random.normal(next(keys), (c,))
        mean = 0.1 * jax.random.normal(next(keys), (c,))
        var = 0.5 + 0.1 * jnp.abs(jax.random.normal(next(keys), (c,)))
        s = (gamma / jnp.sqrt(var + BN_EPS)).astype(jnp.float32)
        b = (beta - mean * s).astype(jnp.float32)
        return s, b

    # (Cout, Cin) for conv1..conv5 and linear1 (all channel-major).
    dims = [(64, 3), (64, 64), (64, 64), (128, 64), (EMB_DIMS, 128), (512, EMB_DIMS)]
    fused_w, fused_b = [], []
    for cout, cin in dims:
        wi = rnd((cout, cin))
        s, b = bn(cout)
        fused_w.append(wi * s[:, None])        # fold BN scale into weight rows
        fused_b.append(b)

    w7 = rnd((OUTPUT_CHANNELS, 512))           # linear2 (with bias, no BN)
    b7 = rnd((OUTPUT_CHANNELS,))

    # All biases packed as columns of a single (512, 8) f32 constant.
    bcol = jnp.zeros((512, 8), jnp.float32)
    for col, b in enumerate(fused_b):
        bcol = bcol.at[: b.shape[0], col].set(b)
    bcol = bcol.at[:OUTPUT_CHANNELS, 6].set(b7)

    w1 = fused_w[0]                                            # (64, 3) f32, VPU conv1
    w2, w3, w4, w5, w6 = [w.astype(jnp.bfloat16) for w in fused_w[1:]]
    w7_pad = (jnp.zeros((PAD_OUT, 512), jnp.float32)
              .at[:OUTPUT_CHANNELS, :].set(w7)).astype(jnp.bfloat16)

    return (w1, w2, w3, w4, w5, w6, w7_pad, bcol)


# ------------------------------ Reference ------------------------------------

def reference_forward(x_bcn, kparams):
    """Pure-JAX reference using the same fused/bf16 precision scheme."""
    w1, w2, w3, w4, w5, w6, w7, bcol = kparams
    x = x_bcn.astype(jnp.float32)                              # (B, 3, N)

    def col(c, j):
        return bcol[:c, j][None, :, None]                      # (1, C, 1)

    # conv1: same f32 broadcast-FMA as the kernel.
    h = (w1[None, :, 0:1] * x[:, 0:1, :]
         + w1[None, :, 1:2] * x[:, 1:2, :]
         + w1[None, :, 2:3] * x[:, 2:3, :])
    h = jnp.maximum(h + col(64, 0), 0.0).astype(jnp.bfloat16)  # (B, 64, N)

    def layer(h_bf, w, b, relu=True, out_dtype=jnp.bfloat16):
        y = jnp.einsum("oc,bcn->bon", w, h_bf,
                       preferred_element_type=jnp.float32) + b
        if relu:
            y = jnp.maximum(y, 0.0)
        return y.astype(out_dtype)

    h = layer(h, w2, col(64, 1))
    h = layer(h, w3, col(64, 2))
    h = layer(h, w4, col(128, 3))
    h = layer(h, w5, col(EMB_DIMS, 4), out_dtype=jnp.float32)  # (B, EMB, N) f32
    pooled = jnp.max(h, axis=2).astype(jnp.bfloat16)           # (B, EMB)

    b6 = bcol[:512, 5][None, :]
    b7 = bcol[:PAD_OUT, 6][None, :]
    h6 = jnp.maximum(
        jnp.dot(pooled, w6.T, preferred_element_type=jnp.float32) + b6, 0.0
    ).astype(jnp.bfloat16)                                     # (B, 512)
    logits = jnp.dot(h6, w7.T, preferred_element_type=jnp.float32) + b7
    return logits[:, :OUTPUT_CHANNELS]


# --------------------------------- Main --------------------------------------

if __name__ == "__main__":
    key = jax.random.PRNGKey(0)
    k_x, k_p = jax.random.split(key)

    B, N = 3, 200                       # small; N not a lane multiple -> exercises edge-pad
    x = jax.random.normal(k_x, (B, 3, N), dtype=jnp.float32)   # PyTorch (B, C, N)
    params = make_params(k_p)

    ref = jax.block_until_ready(reference_forward(x, params))

    # Default picker: single grid step (block_b == B).
    out1 = jax.block_until_ready(pointnet_cls_forward(x, params))
    # Forced block_b=2: two grid steps + batch padding path.
    out2 = jax.block_until_ready(pointnet_cls_forward(x, params, block_b=2))

    assert out1.shape == (B, OUTPUT_CHANNELS), out1.shape
    assert out2.shape == (B, OUTPUT_CHANNELS), out2.shape
    np.testing.assert_allclose(np.asarray(out1), np.asarray(ref), rtol=5e-3, atol=5e-3)
    np.testing.assert_allclose(np.asarray(out2), np.asarray(ref), rtol=5e-3, atol=5e-3)

    print("KERNEL_OK")
</pallas_src>

<mosaic_0001>
module attributes {stable_mosaic.version = 11 : i64} {
  func.func @pointnet_kernel(%arg0: i32, %arg1: memref<3x768xf32, #tpu.memory_space<vmem>>, %arg2: memref<64x3xf32, #tpu.memory_space<vmem>>, %arg3: memref<64x64xbf16, #tpu.memory_space<vmem>>, %arg4: memref<64x64xbf16, #tpu.memory_space<vmem>>, %arg5: memref<128x64xbf16, #tpu.memory_space<vmem>>, %arg6: memref<256x128xbf16, #tpu.memory_space<vmem>>, %arg7: memref<512x256xbf16, #tpu.memory_space<vmem>>, %arg8: memref<128x512xbf16, #tpu.memory_space<vmem>>, %arg9: memref<512x8xf32, #tpu.memory_space<vmem>>, %arg10: memref<128x128xf32, #tpu.memory_space<vmem>>, %arg11: memref<256x128xf32, #tpu.memory_space<vmem>>) attributes {dimension_semantics = [#tpu.dimension_semantics<parallel>], iteration_bounds = array<i64: 1>, scalar_prefetch = 0 : i64, scratch_operands = 1 : i64, tpu.core_type = #tpu.core_type<tc>, window_params = [{transform_indices = @transform_0, window_bounds = array<i64: 3, 768>}, {pipeline_mode = #tpu.pipeline_mode<synchronous>, transform_indices = @transform_1, window_bounds = array<i64: 64, 3>}, {pipeline_mode = #tpu.pipeline_mode<synchronous>, transform_indices = @transform_2, window_bounds = array<i64: 64, 64>}, {pipeline_mode = #tpu.pipeline_mode<synchronous>, transform_indices = @transform_3, window_bounds = array<i64: 64, 64>}, {pipeline_mode = #tpu.pipeline_mode<synchronous>, transform_indices = @transform_4, window_bounds = array<i64: 128, 64>}, {pipeline_mode = #tpu.pipeline_mode<synchronous>, transform_indices = @transform_5, window_bounds = array<i64: 256, 128>}, {pipeline_mode = #tpu.pipeline_mode<synchronous>, transform_indices = @transform_6, window_bounds = array<i64: 512, 256>}, {pipeline_mode = #tpu.pipeline_mode<synchronous>, transform_indices = @transform_7, window_bounds = array<i64: 128, 512>}, {pipeline_mode = #tpu.pipeline_mode<synchronous>, transform_indices = @transform_8, window_bounds = array<i64: 512, 8>}, {transform_indices = @transform_9, window_bounds = array<i64: 128, 128>}]} {
    %c0 = arith.constant 0 : index
    %c0_0 = arith.constant 0 : index
    %0 = vector.load %arg9[%c0, %c0_0] : memref<512x8xf32, #tpu.memory_space<vmem>>, vector<512x8xf32>
    %1 = vector.extract_strided_slice %0 {offsets = [0, 0], sizes = [64, 1], strides = [1, 1]} : vector<512x8xf32> to vector<64x1xf32>
    %2 = vector.extract_strided_slice %0 {offsets = [0, 1], sizes = [64, 1], strides = [1, 1]} : vector<512x8xf32> to vector<64x1xf32>
    %3 = vector.extract_strided_slice %0 {offsets = [0, 2], sizes = [64, 1], strides = [1, 1]} : vector<512x8xf32> to vector<64x1xf32>
    %4 = vector.extract_strided_slice %0 {offsets = [0, 3], sizes = [128, 1], strides = [1, 1]} : vector<512x8xf32> to vector<128x1xf32>
    %5 = vector.extract_strided_slice %0 {offsets = [0, 4], sizes = [256, 1], strides = [1, 1]} : vector<512x8xf32> to vector<256x1xf32>
    %6 = vector.extract_strided_slice %0 {offsets = [0, 5], sizes = [512, 1], strides = [1, 1]} : vector<512x8xf32> to vector<512x1xf32>
    %7 = vector.extract_strided_slice %0 {offsets = [0, 6], sizes = [128, 1], strides = [1, 1]} : vector<512x8xf32> to vector<128x1xf32>
    %c0_1 = arith.constant 0 : index
    %c0_2 = arith.constant 0 : index
    %8 = vector.load %arg1[%c0_1, %c0_2] : memref<3x768xf32, #tpu.memory_space<vmem>>, vector<3x768xf32>
    %c0_3 = arith.constant 0 : index
    %c0_4 = arith.constant 0 : index
    %9 = vector.load %arg2[%c0_3, %c0_4] : memref<64x3xf32, #tpu.memory_space<vmem>>, vector<64x3xf32>
    %10 = vector.extract_strided_slice %9 {offsets = [0, 0], sizes = [64, 1], strides = [1, 1]} : vector<64x3xf32> to vector<64x1xf32>
    %11 = vector.extract_strided_slice %8 {offsets = [0, 0], sizes = [1, 768], strides = [1, 1]} : vector<3x768xf32> to vector<1x768xf32>
    %12 = vector.broadcast %10 : vector<64x1xf32> to vector<64x768xf32>
    %13 = vector.broadcast %11 : vector<1x768xf32> to vector<64x768xf32>
    %14 = arith.mulf %12, %13 : vector<64x768xf32>
    %15 = vector.extract_strided_slice %9 {offsets = [0, 1], sizes = [64, 1], strides = [1, 1]} : vector<64x3xf32> to vector<64x1xf32>
    %16 = vector.extract_strided_slice %8 {offsets = [1, 0], sizes = [1, 768], strides = [1, 1]} : vector<3x768xf32> to vector<1x768xf32>
    %17 = vector.broadcast %15 : vector<64x1xf32> to vector<64x768xf32>
    %18 = vector.broadcast %16 : vector<1x768xf32> to vector<64x768xf32>
    %19 = arith.mulf %17, %18 : vector<64x768xf32>
    %20 = arith.addf %14, %19 : vector<64x768xf32>
    %21 = vector.extract_strided_slice %9 {offsets = [0, 2], sizes = [64, 1], strides = [1, 1]} : vector<64x3xf32> to vector<64x1xf32>
    %22 = vector.extract_strided_slice %8 {offsets = [2, 0], sizes = [1, 768], strides = [1, 1]} : vector<3x768xf32> to vector<1x768xf32>
    %23 = vector.broadcast %21 : vector<64x1xf32> to vector<64x768xf32>
    %24 = vector.broadcast %22 : vector<1x768xf32> to vector<64x768xf32>
    %25 = arith.mulf %23, %24 : vector<64x768xf32>
    %26 = arith.addf %20, %25 : vector<64x768xf32>
    %27 = vector.broadcast %1 : vector<64x1xf32> to vector<64x768xf32>
    %28 = arith.addf %26, %27 : vector<64x768xf32>
    %cst = arith.constant 0.000000e+00 : f32
    %29 = vector.broadcast %cst : f32 to vector<64x768xf32>
    %30 = arith.maximumf %28, %29 : vector<64x768xf32>
    %31 = arith.truncf %30 : vector<64x768xf32> to vector<64x768xbf16>
    %c0_5 = arith.constant 0 : index
    %c0_6 = arith.constant 0 : index
    %32 = vector.load %arg3[%c0_5, %c0_6] : memref<64x64xbf16, #tpu.memory_space<vmem>>, vector<64x64xbf16>
    %cst_7 = arith.constant dense<0.000000e+00> : vector<64x768xf32>
    %33 = tpu.matmul %32, %31, %cst_7 {dimension_numbers = #tpu.dot_dimension_numbers<[1], [0], [0], [1], [0, 0, 1, 1], [], []>} : vector<64x64xbf16>, vector<64x768xbf16>, vector<64x768xf32> -> vector<64x768xf32>
    %34 = vector.broadcast %2 : vector<64x1xf32> to vector<64x768xf32>
    %35 = arith.addf %33, %34 : vector<64x768xf32>
    %cst_8 = arith.constant 0.000000e+00 : f32
    %36 = vector.broadcast %cst_8 : f32 to vector<64x768xf32>
    %37 = arith.maximumf %35, %36 : vector<64x768xf32>
    %38 = arith.truncf %37 : vector<64x768xf32> to vector<64x768xbf16>
    %c0_9 = arith.constant 0 : index
    %c0_10 = arith.constant 0 : index
    %39 = vector.load %arg4[%c0_9, %c0_10] : memref<64x64xbf16, #tpu.memory_space<vmem>>, vector<64x64xbf16>
    %cst_11 = arith.constant dense<0.000000e+00> : vector<64x768xf32>
    %40 = tpu.matmul %39, %38, %cst_11 {dimension_numbers = #tpu.dot_dimension_numbers<[1], [0], [0], [1], [0, 0, 1, 1], [], []>} : vector<64x64xbf16>, vector<64x768xbf16>, vector<64x768xf32> -> vector<64x768xf32>
    %41 = vector.broadcast %3 : vector<64x1xf32> to vector<64x768xf32>
    %42 = arith.addf %40, %41 : vector<64x768xf32>
    %cst_12 = arith.constant 0.000000e+00 : f32
    %43 = vector.broadcast %cst_12 : f32 to vector<64x768xf32>
    %44 = arith.maximumf %42, %43 : vector<64x768xf32>
    %45 = arith.truncf %44 : vector<64x768xf32> to vector<64x768xbf16>
    %c0_13 = arith.constant 0 : index
    %c0_14 = arith.constant 0 : index
    %46 = vector.load %arg5[%c0_13, %c0_14] : memref<128x64xbf16, #tpu.memory_space<vmem>>, vector<128x64xbf16>
    %cst_15 = arith.constant dense<0.000000e+00> : vector<128x768xf32>
    %47 = tpu.matmul %46, %45, %cst_15 {dimension_numbers = #tpu.dot_dimension_numbers<[1], [0], [0], [1], [0, 0, 1, 1], [], []>} : vector<128x64xbf16>, vector<64x768xbf16>, vector<128x768xf32> -> vector<128x768xf32>
    %48 = vector.broadcast %4 : vector<128x1xf32> to vector<128x768xf32>
    %49 = arith.addf %47, %48 : vector<128x768xf32>
    %cst_16 = arith.constant 0.000000e+00 : f32
    %50 = vector.broadcast %cst_16 : f32 to vector<128x768xf32>
    %51 = arith.maximumf %49, %50 : vector<128x768xf32>
    %52 = arith.truncf %51 : vector<128x768xf32> to vector<128x768xbf16>
    %c0_17 = arith.constant 0 : index
    %c0_18 = arith.constant 0 : index
    %53 = vector.load %arg6[%c0_17, %c0_18] : memref<256x128xbf16, #tpu.memory_space<vmem>>, vector<256x128xbf16>
    %cst_19 = arith.constant dense<0.000000e+00> : vector<256x768xf32>
    %54 = tpu.matmul %53, %52, %cst_19 {dimension_numbers = #tpu.dot_dimension_numbers<[1], [0], [0], [1], [0, 0, 1, 1], [], []>} : vector<256x128xbf16>, vector<128x768xbf16>, vector<256x768xf32> -> vector<256x768xf32>
    %55 = vector.broadcast %5 : vector<256x1xf32> to vector<256x768xf32>
    %56 = arith.addf %54, %55 : vector<256x768xf32>
    %cst_20 = arith.constant 0.000000e+00 : f32
    %57 = vector.broadcast %cst_20 : f32 to vector<256x768xf32>
    %58 = arith.maximumf %56, %57 : vector<256x768xf32>
    %cst_21 = arith.constant 0.000000e+00 : f32
    %59 = vector.broadcast %cst_21 : f32 to vector<256x128xf32>
    %c0_22 = arith.constant 0 : index
    %c0_23 = arith.constant 0 : index
    %60 = vector.load %arg11[%c0_22, %c0_23] : memref<256x128xf32, #tpu.memory_space<vmem>>, vector<256x128xf32>
    tpu.vector_store %arg11[%c0_22, %c0_23], %59 {strides = array<i32>} : memref<256x128xf32, #tpu.memory_space<vmem>>, vector<256x128xf32>,
    %61 = vector.extract_strided_slice %58 {offsets = [0, 0], sizes = [256, 256], strides = [1, 1]} : vector<256x768xf32> to vector<256x256xf32>
    %cst_24 = arith.constant dense<0xFF800000> : vector<256xf32>
    %62 = vector.multi_reduction <maximumf>, %61, %cst_24 [1] : vector<256x256xf32> to vector<256xf32>
    %63 = vector.shape_cast %62 : vector<256xf32> to vector<256x1xf32>
    %c0_25 = arith.constant 0 : index
    %c0_26 = arith.constant 0 : index
    %64 = vector.load %arg11[%c0_25, %c0_26] : memref<256x128xf32, #tpu.memory_space<vmem>>, vector<256x1xf32>
    tpu.vector_store %arg11[%c0_25, %c0_26], %63 {strides = array<i32>} : memref<256x128xf32, #tpu.memory_space<vmem>>, vector<256x1xf32>,
    %65 = vector.extract_strided_slice %58 {offsets = [0, 256], sizes = [256, 256], strides = [1, 1]} : vector<256x768xf32> to vector<256x256xf32>
    %cst_27 = arith.constant dense<0xFF800000> : vector<256xf32>
    %66 = vector.multi_reduction <maximumf>, %65, %cst_27 [1] : vector<256x256xf32> to vector<256xf32>
    %67 = vector.shape_cast %66 : vector<256xf32> to vector<256x1xf32>
    %c0_28 = arith.constant 0 : index
    %c1 = arith.constant 1 : index
    %68 = vector.load %arg11[%c0_28, %c1] : memref<256x128xf32, #tpu.memory_space<vmem>>, vector<256x1xf32>
    tpu.vector_store %arg11[%c0_28, %c1], %67 {strides = array<i32>} : memref<256x128xf32, #tpu.memory_space<vmem>>, vector<256x1xf32>,
    %69 = vector.extract_strided_slice %58 {offsets = [0, 512], sizes = [256, 256], strides = [1, 1]} : vector<256x768xf32> to vector<256x256xf32>
    %cst_29 = arith.constant dense<0xFF800000> : vector<256xf32>
    %70 = vector.multi_reduction <maximumf>, %69, %cst_29 [1] : vector<256x256xf32> to vector<256xf32>
    %71 = vector.shape_cast %70 : vector<256xf32> to vector<256x1xf32>
    %c0_30 = arith.constant 0 : index
    %c2 = arith.constant 2 : index
    %72 = vector.load %arg11[%c0_30, %c2] : memref<256x128xf32, #tpu.memory_space<vmem>>, vector<256x1xf32>
    tpu.vector_store %arg11[%c0_30, %c2], %71 {strides = array<i32>} : memref<256x128xf32, #tpu.memory_space<vmem>>, vector<256x1xf32>,
    %c0_31 = arith.constant 0 : index
    %c0_32 = arith.constant 0 : index
    %73 = vector.load %arg11[%c0_31, %c0_32] : memref<256x128xf32, #tpu.memory_space<vmem>>, vector<256x128xf32>
    %74 = arith.truncf %73 : vector<256x128xf32> to vector<256x128xbf16>
    %c0_33 = arith.constant 0 : index
    %c0_34 = arith.constant 0 : index
    %75 = vector.load %arg7[%c0_33, %c0_34] : memref<512x256xbf16, #tpu.memory_space<vmem>>, vector<512x256xbf16>
    %cst_35 = arith.constant dense<0.000000e+00> : vector<512x128xf32>
    %76 = tpu.matmul %75, %74, %cst_35 {dimension_numbers = #tpu.dot_dimension_numbers<[1], [0], [0], [1], [0, 0, 1, 1], [], []>} : vector<512x256xbf16>, vector<256x128xbf16>, vector<512x128xf32> -> vector<512x128xf32>
    %77 = vector.broadcast %6 : vector<512x1xf32> to vector<512x128xf32>
    %78 = arith.addf %76, %77 : vector<512x128xf32>
    %cst_36 = arith.constant 0.000000e+00 : f32
    %79 = vector.broadcast %cst_36 : f32 to vector<512x128xf32>
    %80 = arith.maximumf %78, %79 : vector<512x128xf32>
    %81 = arith.truncf %80 : vector<512x128xf32> to vector<512x128xbf16>
    %c0_37 = arith.constant 0 : index
    %c0_38 = arith.constant 0 : index
    %82 = vector.load %arg8[%c0_37, %c0_38] : memref<128x512xbf16, #tpu.memory_space<vmem>>, vector<128x512xbf16>
    %cst_39 = arith.constant dense<0.000000e+00> : vector<128x128xf32>
    %83 = tpu.matmul %82, %81, %cst_39 {dimension_numbers = #tpu.dot_dimension_numbers<[1], [0], [0], [1], [0, 0, 1, 1], [], []>} : vector<128x512xbf16>, vector<512x128xbf16>, vector<128x128xf32> -> vector<128x128xf32>
    %84 = vector.broadcast %7 : vector<128x1xf32> to vector<128x128xf32>
    %85 = arith.addf %83, %84 : vector<128x128xf32>
    %c0_40 = arith.constant 0 : index
    %c0_41 = arith.constant 0 : index
    %86 = vector.load %arg10[%c0_40, %c0_41] : memref<128x128xf32, #tpu.memory_space<vmem>>, vector<128x128xf32>
    tpu.vector_store %arg10[%c0_40, %c0_41], %85 {strides = array<i32>} : memref<128x128xf32, #tpu.memory_space<vmem>>, vector<128x128xf32>,
    return
  }
  func.func @transform_0(%arg0: i32) -> (i32, i32) {
    %c0_i32 = arith.constant 0 : i32
    %c0_i32_0 = arith.constant 0 : i32
    return %c0_i32, %arg0 : i32, i32
  }
  func.func @transform_1(%arg0: i32) -> (i32, i32) {
    %c0_i32 = arith.constant 0 : i32
    %c0_i32_0 = arith.constant 0 : i32
    %c0_i32_1 = arith.constant 0 : i32
    return %c0_i32, %c0_i32_0 : i32, i32
  }
  func.func @transform_2(%arg0: i32) -> (i32, i32) {
    %c0_i32 = arith.constant 0 : i32
    %c0_i32_0 = arith.constant 0 : i32
    %c0_i32_1 = arith.constant 0 : i32
    return %c0_i32, %c0_i32_0 : i32, i32
  }
  func.func @transform_3(%arg0: i32) -> (i32, i32) {
    %c0_i32 = arith.constant 0 : i32
    %c0_i32_0 = arith.constant 0 : i32
    %c0_i32_1 = arith.constant 0 : i32
    return %c0_i32, %c0_i32_0 : i32, i32
  }
  func.func @transform_4(%arg0: i32) -> (i32, i32) {
    %c0_i32 = arith.constant 0 : i32
    %c0_i32_0 = arith.constant 0 : i32
    %c0_i32_1 = arith.constant 0 : i32
    return %c0_i32, %c0_i32_0 : i32, i32
  }
  func.func @transform_5(%arg0: i32) -> (i32, i32) {
    %c0_i32 = arith.constant 0 : i32
    %c0_i32_0 = arith.constant 0 : i32
    %c0_i32_1 = arith.constant 0 : i32
    return %c0_i32, %c0_i32_0 : i32, i32
  }
  func.func @transform_6(%arg0: i32) -> (i32, i32) {
    %c0_i32 = arith.constant 0 : i32
    %c0_i32_0 = arith.constant 0 : i32
    %c0_i32_1 = arith.constant 0 : i32
    return %c0_i32, %c0_i32_0 : i32, i32
  }
  func.func @transform_7(%arg0: i32) -> (i32, i32) {
    %c0_i32 = arith.constant 0 : i32
    %c0_i32_0 = arith.constant 0 : i32
    %c0_i32_1 = arith.constant 0 : i32
    return %c0_i32, %c0_i32_0 : i32, i32
  }
  func.func @transform_8(%arg0: i32) -> (i32, i32) {
    %c0_i32 = arith.constant 0 : i32
    %c0_i32_0 = arith.constant 0 : i32
    %c0_i32_1 = arith.constant 0 : i32
    return %c0_i32, %c0_i32_0 : i32, i32
  }
  func.func @transform_9(%arg0: i32) -> (i32, i32) {
    %c0_i32 = arith.constant 0 : i32
    %c0_i32_0 = arith.constant 0 : i32
    return %c0_i32, %arg0 : i32, i32
  }
}

</mosaic_0001>

<bundles_post_ra>
// kernel: tpu_custom_call.1
= control target key start
LH: loop header
LB: loop body
LE: loop exit
PB: predicated region body
PF: predicated region fallthrough
CT: control target
= control target key end

     0   :  { %14 = vsyncpa [#allocation4], 0  ;;  %s8407_s0 = inlined_call_operand.hbm [shape: f32[3,768], index: 0, kind: input, shape index: {}]   ;;  %s8408_s1 = inlined_call_operand.vmem [shape: f32[64,3], index: 1, kind: input, shape index: {}]   ;;  %s8409_s2 = inlined_call_operand.vmem [shape: bf16[64,64], index: 2, kind: input, shape index: {}]   ;;  %s8410_s3 = inlined_call_operand.vmem [shape: bf16[64,64], index: 3, kind: input, shape index: {}]   ;;  %s8411_s4 = inlined_call_operand.vmem [shape: bf16[128,64], index: 4, kind: input, shape index: {}]   ;;  %s8412_s5 = inlined_call_operand.vmem [shape: bf16[256,128], index: 5, kind: input, shape index: {}]   ;;  %s8413_s6 = inlined_call_operand.vmem [shape: bf16[512,256], index: 6, kind: input, shape index: {}]   ;;  %s8414_s7 = inlined_call_operand.hbm [shape: bf16[128,512], index: 7, kind: input, shape index: {}]   ;;  %s8415_s8 = inlined_call_operand.vmem [shape: f32[512,8], index: 8, kind: input, shape index: {}]   ;;  %s8416_s9 = inlined_call_operand.hbm [shape: f32[128,128], index: 9, kind: output, shape index: {}]  }
   0x1   :  { %15 = vsyncpa [#allocation7], 0 }
   0x2   :  { %16 = vsyncpa [#allocation5], 0  ;;  %s5867_s30 = smov [#allocation3]   ;;  %s5868_s11 = smov [#allocation6]  }
   0x3   :  { %s23_s10 = sshll.u32 %s5867_s30, 4  ;;  %s44_s12 = sshll.u32 %s5868_s11, 4  ;;  %s24_s10 = int_to_ptr.vmem [resolvable:$true] %s23_s10  ;;  %s5932_s12 = int_to_ptr.vmem [resolvable:$true] %s44_s12 }
   0x4   :  { %s5795_s15 = scalar_lea.hbm %s8407_s0, 384 }
   0x5   :  { %p5796_p0 = scmp.ne.s32.totalorder %s8407_s0, %s5795_s15  ;;  %p5799_p1 = scmp.lt.u32.totalorder %s5795_s15, %s8407_s0 }
   0x7   :  { %p5801_p2 = pnand %p5799_p1, %p5796_p0 }
   0x9   :  { %5804 = shalt.err (!%p5801_p2)
}
   0xa   :  { %s5805_s20 = scalar_lea.vmem %s24_s10, 384  ;;  %p5810_p4 = scmp.lt.s32.totalorder %s24_s10, %s24_s10 }
   0xb   :  { %p5806_p3 = scmp.ne.s32.totalorder %s24_s10, %s5805_s20  ;;  %p5811_p5 = scmp.lt.s32.totalorder %s5805_s20, %s5805_s20 }
   0xd   :  { %p5812_p6 = por %p5811_p5, %p5810_p4 }
   0xf   :  { %p5813_p7 = pnand %p5812_p6, %p5806_p3 }
  0x11   :  { %5816 = shalt.err (!%p5813_p7)
}
  0x12   :  { %26 = dma.hbm_to_vmem [thread:$0]  %s8407_s0, 384, %s24_s10, [#allocation4]  }
  0x13   :  { %s5817_s25 = scalar_lea.hbm %s8414_s7, 4096 }
  0x14   :  { %p5818_p8 = scmp.ne.s32.totalorder %s8414_s7, %s5817_s25  ;;  %p5821_p9 = scmp.lt.u32.totalorder %s5817_s25, %s8414_s7 }
  0x16   :  { %p5823_p10 = pnand %p5821_p9, %p5818_p8 }
  0x18   :  { %5826 = shalt.err (!%p5823_p10)
}
  0x19   :  { %s5827_s30 = scalar_lea.vmem %s5932_s12, 4096  ;;  %p5832_p12 = scmp.lt.s32.totalorder %s5932_s12, %s5932_s12 }
  0x1a   :  { %p5828_p11 = scmp.ne.s32.totalorder %s5932_s12, %s5827_s30  ;;  %p5833_p13 = scmp.lt.s32.totalorder %s5827_s30, %s5827_s30 }
  0x1c   :  { %p5834_p0 = por %p5833_p13, %p5832_p12 }
  0x1e   :  { %p5835_p1 = pnand %p5834_p0, %p5828_p11 }
  0x20   :  { %5838 = shalt.err (!%p5835_p1)
}
  0x21   :  { %s5869_s0 = smov 256   ;;  %s5870_s10 = smov 16  }
  0x22   :  { %50 = dma.hbm_to_vmem [thread:$0]  %s8414_s7, 4096, %s5932_s12, [#allocation7], %s5869_s0, %s5869_s0, %s5870_s10  }
  0x23   :  { %5861 = dma.done.wait [#allocation4], 384  }
  0x24   :  { %5862 = vsyncadd [#allocation4], 4294966912 }
  0x25   :  { %5863 = dma.done.wait [#allocation7], 4096  }
  0x26   :  { %5864 = vsyncadd [#allocation7], 4294963200  ;;  %v5871_v0 = vmov 2   ;;  %v5872_v1 = vmov 1   ;;  %v8417_v2 = vmov 0   ;;  %v127_v3 = vld [vmem:[%s8408_s1] sm:$0xff]  ;;  %v178_v19 = vlaneseq }
  0x27   :  { %5537 = vset.pattern.permute.xlu0 %v5871_v0  ;;  %5536 = vset.pattern.permute.xlu1 %v5872_v1  ;;  %v129_v4 = vld [vmem:[%s8408_s1 + $0x10] sm:$0xff]  ;;  %v128_v5 = vld [vmem:[%s8408_s1 + $0x8] sm:$0xff]  ;;  %v131_v7 = vld [vmem:[%s8408_s1 + $0x20] sm:$0xff]  ;;  %vm864_vm0 = vcmask 523264   ;;  %vm3337_vm1 = vcmask 7168   ;;  %vm3466_vm2 = vcmask 15368  }
  0x28   :  { %909 = vmatprep.mubr.bf16.mxu1 %v8417_v2  ;;  %1055 = vmatprep.mubr.bf16.mxu0 %v8417_v2  ;;  %v132_v6 = vld [vmem:[%s8408_s1 + $0x28] sm:$0xff]  ;;  %v134_v8 = vld [vmem:[%s8408_s1 + $0x38] sm:$0xff]  ;;  %v60_v10 = vld [vmem:[%s8415_s8] sm:$0xff]  ;;  %v179_v20 = vshrl.u32 %v178_v19, 7  ;;  %vm3595_vm3 = vcmask 23568  }
  0x29   :  { %463 = vperm.xlu0 %5537, %v127_v3   ;;  %281 = vperm.xlu1 %5536, %v127_v3   ;;  %v130_v9 = vld [vmem:[%s8408_s1 + $0x18] sm:$0xff]  ;;  %v61_v11 = vld [vmem:[%s8415_s8 + $0x8] sm:$0xff]  ;;  %v133_v12 = vld [vmem:[%s8408_s1 + $0x30] sm:$0xff] }
  0x2a   :  { %v64_v13 = vld [vmem:[%s8415_s8 + $0x20] sm:$0xff]  ;;  %v67_v14 = vld [vmem:[%s8415_s8 + $0x38] sm:$0xff]  ;;  %v62_v15 = vld [vmem:[%s8415_s8 + $0x10] sm:$0xff]  ;;  %v314_v21 = vsub.s32 1, %v179_v20  ;;  %v318_v23 = vsub.s32 5, %v179_v20  ;;  %v500_v27 = vsub.s32 6, %v179_v20 }
  0x2b   :  { %v63_v16 = vld [vmem:[%s8415_s8 + $0x18] sm:$0xff]  ;;  %v66_v17 = vld [vmem:[%s8415_s8 + $0x30] sm:$0xff]  ;;  %v65_v18 = vld [vmem:[%s8415_s8 + $0x28] sm:$0xff]  ;;  %v496_v29 = vsub.s32 2, %v179_v20  ;;  %v180_v31 = vsub.s32 0, %v179_v20  ;;  %v184_v32 = vsub.s32 4, %v179_v20 }
  0x2c   :  { %v125_v22 = vld [vmem:[#allocation3 + $0x8] sm:$0x77]  ;;  %v124_v26 = vld [vmem:[#allocation3] sm:$0x77]  ;;  %v126_v30 = vld [vmem:[#allocation3 + $0x10] sm:$0x77] }
  0x2d   :  { %471 = vperm.xlu0 %5537, %v129_v4   ;;  %285 = vperm.xlu1 %5536, %v128_v5   ;;  %v323_v28 = vrot.slane %v125_v22, %v314_v21  ;;  %v319_v33 = vrot.slane %v124_v26, %v318_v23  ;;  %v501_v36 = vrot.slane %v124_v26, %v500_v27 }
  0x2e   :  { %v335_v37 = vrot.slane %v126_v30, %v318_v23  ;;  %v315_v38 = vrot.slane %v124_v26, %v314_v21  ;;  %v517_v40 = vrot.slane %v126_v30, %v500_v27  ;;  %v497_v41 = vrot.slane %v124_v26, %v496_v29 }
  0x2f   :  { %v6036_v39 = vrot.slane %v323_v28, %v314_v21  ;;  %v331_v42 = vrot.slane %v126_v30, %v314_v21  ;;  %v189_v43 = vrot.slane %v125_v22, %v180_v31  ;;  %v185_v44 = vrot.slane %v124_v26, %v184_v32 }
  0x30   :  { %v6038_v45 = vrot.slane %v319_v33, %v314_v21  ;;  %v513_v46 = vrot.slane %v126_v30, %v496_v29  ;;  %v201_v48 = vrot.slane %v126_v30, %v184_v32  ;;  %v181_v49 = vrot.slane %v124_v26, %v180_v31 }
  0x31   :  { %483 = vperm.xlu0 %5537, %v132_v6   ;;  %5538 = vset.pattern.permute.xlu1 %v5871_v0  ;;  %v197_v50 = vrot.slane %v126_v30, %v180_v31  ;;  %v327_v51 = vrot.slane %v125_v22, %v318_v23  ;;  %v6042_v53 = vrot.slane %v501_v36, %v496_v29 }
  0x32   :  { %467 = vperm.xlu1 %5538, %v128_v5   ;;  %v193_v54 = vrot.slane %v125_v22, %v184_v32  ;;  %v509_v55 = vrot.slane %v125_v22, %v500_v27  ;;  %v505_v56 = vrot.slane %v125_v22, %v496_v29  ;;  %v6044_v57 = vrot.slane %v335_v37, %v314_v21 }
  0x33   :  { %v6046_v58 = vrot.slane %v517_v40, %v496_v29  ;;  %v6048_v59 = vrot.slane %v315_v38, %v314_v21  ;;  %v6050_v60 = vrot.slane %v497_v41, %v496_v29  ;;  %v6052_v61 = vrot.slane %v189_v43, %v180_v31 }
  0x34   :  { %v6054_v62 = vrot.slane %v185_v44, %v180_v31  ;;  %v6056_v63 = vrot.slane %v331_v42, %v314_v21 }
  0x35   :  { %5545 = vset.pattern.permute.xlu0 %v5872_v1 }
  0x36   :  { %297 = vperm.xlu0 %5545, %v131_v7   ;;  %5539 = vset.pattern.permute.xlu1 %v8417_v2 }
  0x37   :  { %147 = vperm.xlu1 %5539, %v129_v4  }
  0x3a   :  { %309 = vperm.xlu0 %5545, %v134_v8  }
  0x3b   :  { %5540 = vset.pattern.permute.xlu1 %v5872_v1 }
  0x3c   :  { %289 = vperm.xlu1 %5540, %v129_v4   ;;  %v6064_v4 = vrot.slane %v197_v50, %v180_v31 }
  0x3e   :  { %5548 = vset.pattern.permute.xlu0 %v8417_v2 }
  0x3f   :  { %137 = vperm.xlu0 %5548, %v127_v3   ;;  %v6062_v3 = vrot.slane %v181_v49, %v180_v31 }
  0x40   :  { %293 = vperm.xlu1 %5540, %v130_v9  }
  0x43   :  { %142 = vperm.xlu0 %5548, %v128_v5   ;;  %v6066_v5 = vrot.slane %v327_v51, %v314_v21 }
  0x44   :  { %5541 = vset.pattern.permute.xlu1 %v5871_v0 }
  0x45   :  { %475 = vperm.xlu1 %5541, %v130_v9  }
  0x47   :  { %152 = vperm.xlu0 %5548, %v130_v9   ;;  %v6073_v9 = vrot.slane %v509_v55, %v496_v29 }
  0x49   :  { %5542 = vset.pattern.permute.xlu1 %v8417_v2  ;;  %8432 = vst [vmem:[#allocation14_spill] sm:$0xff] %v6073_v9 }
  0x4a   :  { %646 = vperm.xlu1 %5542, %v60_v10  }
  0x4b   :  { %651 = vperm.xlu0 %5548, %v61_v11  }
  0x4e   :  { %157 = vperm.xlu1 %5542, %v131_v7  }
  0x4f   :  { %167 = vperm.xlu0 %5548, %v133_v12  }
  0x52   :  { %162 = vperm.xlu1 %5542, %v132_v6  }
  0x53   :  { %666 = vperm.xlu0 %5548, %v64_v13  }
  0x56   :  { %5543 = vset.pattern.permute.xlu1 %v5872_v1 }
  0x57   :  { %301 = vperm.xlu1 %5543, %v132_v6   ;;  %681 = vperm.xlu0 %5548, %v67_v14  }
  0x5b   :  { %5544 = vset.pattern.permute.xlu1 %v5871_v0  ;;  %5552 = vset.pattern.permute.xlu0 %v5872_v1 }
  0x5c   :  { %479 = vperm.xlu1 %5544, %v131_v7   ;;  %817 = vperm.xlu0 %5552, %v61_v11  }
  0x60   :  { %5546 = vset.pattern.permute.xlu1 %v8417_v2  ;;  %829 = vperm.xlu0 %5552, %v64_v13  }
  0x61   :  { %656 = vperm.xlu1 %5546, %v62_v15  }
  0x64   :  { %837 = vperm.xlu0 %5552, %v66_v17  }
  0x65   :  { %661 = vperm.xlu1 %5546, %v63_v16  }
  0x68   :  { %5553 = vset.pattern.permute.xlu0 %v5871_v0 }
  0x69   :  { %172 = vperm.xlu1 %5546, %v134_v8   ;;  %1177 = vperm.xlu0 %5553, %v60_v10  }
  0x6d   :  { %5547 = vset.pattern.permute.xlu1 %v5872_v1  ;;  %1189 = vperm.xlu0 %5553, %v63_v16  }
  0x6e   :  { %305 = vperm.xlu1 %5547, %v133_v12  }
  0x71   :  { %1197 = vperm.xlu0 %5553, %v65_v18  }
  0x72   :  { %5549 = vset.pattern.permute.xlu1 %v5871_v0 }
  0x73   :  { %487 = vperm.xlu1 %5549, %v133_v12  }
  0x75   :  { %1205 = vperm.xlu0 %5553, %v67_v14  }
  0x77   :  { %491 = vperm.xlu1 %5549, %v134_v8   ;;  %v6071_v8 = vrot.slane %v193_v54, %v180_v31 }
  0x7b   :  { %5550 = vset.pattern.permute.xlu1 %v8417_v2 }
  0x7c   :  { %671 = vperm.xlu1 %5550, %v65_v18  }
  0x80   :  { %676 = vperm.xlu1 %5550, %v66_v17  }
  0x84   :  { %5551 = vset.pattern.permute.xlu1 %v5872_v1  ;;  %v6060_v1 = vrot.slane %v201_v48, %v180_v31 }
  0x85   :  { %813 = vperm.xlu1 %5551, %v60_v10   ;;  %v6075_v10 = vrot.slane %v505_v56, %v496_v29 }
  0x87   :  { %8433 = vst [vmem:[#allocation15_spill] sm:$0xff] %v6075_v10 }
  0x89   :  { %821 = vperm.xlu1 %5551, %v62_v15  }
  0x8d   :  { %825 = vperm.xlu1 %5551, %v63_v16  }
  0x91   :  { %833 = vperm.xlu1 %5551, %v65_v18  }
  0x95   :  { %841 = vperm.xlu1 %5551, %v67_v14  }
  0x99   :  { %5554 = vset.pattern.permute.xlu1 %v5871_v0  ;;  %v6058_v0 = vrot.slane %v513_v46, %v496_v29 }
  0x9a   :  { %1181 = vperm.xlu1 %5554, %v61_v11  }
  0x9b   :  { %8430 = vst [vmem:[#allocation12_spill] sm:$0xff] %v6058_v0 }
  0x9e   :  { %1185 = vperm.xlu1 %5554, %v62_v15  }
  0xa2   :  { %1193 = vperm.xlu1 %5554, %v64_v13  }
  0xa6   :  { %1201 = vperm.xlu1 %5554, %v66_v17  }
  0xa8   :  { %v282_v24 = vpop.permute.xlu1 %281  ;;  %v464_v25 = vpop.permute.xlu0 %463 }
  0xa9   :  { %v6069_v6 = vmul.f32 %v6036_v39, %v282_v24  ;;  %v367_v12 = vmul.f32 %v6038_v45, %v282_v24  ;;  %v6079_v13 = vmul.f32 %v6042_v53, %v464_v25  ;;  %v371_v14 = vmul.f32 %v6044_v57, %v282_v24 }
  0xaa   :  { %v6083_v15 = vmul.f32 %v6046_v58, %v464_v25  ;;  %v366_v16 = vmul.f32 %v6048_v59, %v282_v24  ;;  %v6087_v17 = vmul.f32 %v6050_v60, %v464_v25  ;;  %v370_v18 = vmul.f32 %v6056_v63, %v282_v24 }
  0xab   :  { %8431 = vst [vmem:[#allocation13_spill] sm:$0xff] %v6069_v6  ;;  %v6091_v19 = vmul.f32 %v6058_v0, %v464_v25  ;;  %v6098_v21 = vmul.f32 %v6066_v5, %v282_v24  ;;  %v6101_v22 = vmul.f32 %v6073_v9, %v464_v25  ;;  %v6104_v23 = vmul.f32 %v6075_v10, %v464_v25 }
  0xac   :  { %v6032_v34 = vpop.permute.xlu1 %285  ;;  %v6034_v35 = vpop.permute.xlu0 %471 }
  0xad   :  { %v6095_v20 = vmul.f32 %v6036_v39, %v6032_v34  ;;  %8435 = vst [vmem:[#allocation17_spill] sm:$0xff] %v6098_v21  ;;  %8436 = vst [vmem:[#allocation18_spill] sm:$0xff] %v6101_v22  ;;  %v373_v27 = vmul.f32 %v6038_v45, %v6032_v34  ;;  %v377_v28 = vmul.f32 %v6044_v57, %v6032_v34 }
  0xae   :  { %8437 = vst [vmem:[#allocation19_spill] sm:$0xff] %v6104_v23  ;;  %v372_v29 = vmul.f32 %v6048_v59, %v6032_v34  ;;  %v376_v24 = vmul.f32 %v6056_v63, %v6032_v34  ;;  %v6118_v30 = vmul.f32 %v6042_v53, %v6034_v35  ;;  %v6122_v25 = vmul.f32 %v6046_v58, %v6034_v35 }
  0xaf   :  { %8434 = vst [vmem:[#allocation16_spill] sm:$0xff] %v6095_v20  ;;  %v6126_v31 = vmul.f32 %v6050_v60, %v6034_v35  ;;  %v6130_v32 = vmul.f32 %v6058_v0, %v6034_v35  ;;  %v6140_v37 = vmul.f32 %v6066_v5, %v6032_v34  ;;  %v6144_v38 = vmul.f32 %v6073_v9, %v6034_v35 }
  0xb0   :  { %v6040_v47 = vpop.permute.xlu0 %483  ;;  %v6148_v40 = vmul.f32 %v6075_v10, %v6034_v35 }
  0xb1   :  { %v468_v52 = vpop.permute.xlu1 %467  ;;  %v6136_v36 = vmul.f32 %v6042_v53, %v6040_v47  ;;  %8439 = vst [vmem:[#allocation21_spill] sm:$0xff] %v6140_v37  ;;  %8440 = vst [vmem:[#allocation22_spill] sm:$0xff] %v6144_v38  ;;  %v6153_v42 = vmul.f32 %v6046_v58, %v6040_v47  ;;  %v6157_v43 = vmul.f32 %v6050_v60, %v6040_v47 }
  0xb2   :  { %8441 = vst [vmem:[#allocation23_spill] sm:$0xff] %v6148_v40  ;;  %v555_v41 = vmul.f32 %v6042_v53, %v468_v52  ;;  %v6161_v34 = vmul.f32 %v6058_v0, %v6040_v47  ;;  %v559_v44 = vmul.f32 %v6046_v58, %v468_v52  ;;  %v554_v46 = vmul.f32 %v6050_v60, %v468_v52 }
  0xb3   :  { %8438 = vst [vmem:[#allocation20_spill] sm:$0xff] %v6136_v36  ;;  %8442 = vst [vmem:[#allocation24_spill] sm:$0xff] %v6153_v42  ;;  %v558_v35 = vmul.f32 %v6058_v0, %v468_v52  ;;  %v6167_v48 = vmul.f32 %v6073_v9, %v468_v52  ;;  %v6175_v51 = vmul.f32 %v6075_v10, %v468_v52 }
  0xb4   :  { %8443 = vst [vmem:[#allocation25_spill] sm:$0xff] %v6157_v43  ;;  %8444 = vst [vmem:[#allocation26_spill] sm:$0xff] %v6161_v34  ;;  %v6179_v54 = vmul.f32 %v6073_v9, %v6040_v47  ;;  %v6183_v55 = vmul.f32 %v6075_v10, %v6040_v47 }
  0xb5   :  { %v298_v7 = vpop.permute.xlu0 %297  ;;  %8445 = vst [vmem:[#allocation27_spill] sm:$0xff] %v6167_v48  ;;  %8447 = vst [vmem:[#allocation29_spill] sm:$0xff] %v6175_v51 }
  0xb6   :  { %v148_v11 = vpop.permute.xlu1 %147  ;;  %v6170_v49 = vmul.f32 %v6036_v39, %v298_v7  ;;  %8448 = vst [vmem:[#allocation30_spill] sm:$0xff] %v6179_v54  ;;  %8449 = vst [vmem:[#allocation31_spill] sm:$0xff] %v6183_v55  ;;  %v6192_v40 = vmul.f32 %v6038_v45, %v298_v7  ;;  %v6195_v52 = vmul.f32 %v6044_v57, %v298_v7 }
  0xb7   :  { %v6198_v54 = vmul.f32 %v6052_v61, %v148_v11  ;;  %v6205_v10 = vmul.f32 %v6048_v59, %v298_v7  ;;  %v245_v38 = vmul.f32 %v6054_v62, %v148_v11  ;;  %v6209_v9 = vmul.f32 %v6060_v1, %v148_v11 }
  0xb8   :  { %8446 = vst [vmem:[#allocation28_spill] sm:$0xff] %v6170_v49  ;;  %8450 = vst [vmem:[#allocation32_spill] sm:$0xff] %v6192_v40  ;;  %v6212_v34 = vmul.f32 %v6062_v3, %v148_v11  ;;  %v6215_v43 = vmul.f32 %v6064_v4, %v148_v11  ;;  %v6224_v51 = vmul.f32 %v6056_v63, %v298_v7 }
  0xb9   :  { %v6106_v26 = vpop.permute.xlu0 %309  ;;  %8451 = vst [vmem:[#allocation33_spill] sm:$0xff] %v6195_v52  ;;  %8452 = vst [vmem:[#allocation34_spill] sm:$0xff] %v6205_v10  ;;  %v6227_v23 = vmul.f32 %v6071_v8, %v148_v11  ;;  %v6230_v48 = vmul.f32 %v6066_v5, %v298_v7 }
  0xba   :  { %v6219_v42 = vmul.f32 %v6036_v39, %v6106_v26  ;;  %8454 = vst [vmem:[#allocation36_spill] sm:$0xff] %v6224_v51  ;;  %v6244_v21 = vmul.f32 %v6038_v45, %v6106_v26 }
  0xbb   :  { %v6132_v33 = vpop.permute.xlu1 %289  ;;  %8455 = vst [vmem:[#allocation37_spill] sm:$0xff] %v6227_v23  ;;  %8456 = vst [vmem:[#allocation38_spill] sm:$0xff] %v6230_v48 }
  0xbc   :  { %8453 = vst [vmem:[#allocation35_spill] sm:$0xff] %v6219_v42  ;;  %8457 = vst [vmem:[#allocation39_spill] sm:$0xff] %v6244_v21 }
  0xbe   :  { %v6172_v50 = vpop.permute.xlu0 %137 }
  0xbf   :  { %v6185_v56 = vpop.permute.xlu1 %293  ;;  %v233_v2 = vmul.f32 %v6054_v62, %v6172_v50  ;;  %v237_v49 = vmul.f32 %v6060_v1, %v6172_v50  ;;  %v232_v47 = vmul.f32 %v6062_v3, %v6172_v50  ;;  %v236_v55 = vmul.f32 %v6064_v4, %v6172_v50 }
  0xc1   :  { %v415_v20 = vadd.f32 %v367_v12, %v233_v2  ;;  %v419_v6 = vadd.f32 %v371_v14, %v237_v49  ;;  %v414_v51 = vadd.f32 %v366_v16, %v232_v47  ;;  %v418_v23 = vadd.f32 %v370_v18, %v236_v55 }
  0xc2   :  { %v6221_v36 = vpop.permute.xlu0 %142  ;;  %v6248_v2 = vmul.f32 %v6044_v57, %v6106_v26  ;;  %v6254_v16 = vmul.f32 %v6048_v59, %v6106_v26  ;;  %v6258_v18 = vmul.f32 %v6056_v63, %v6106_v26 }
  0xc3   :  { %v239_v22 = vmul.f32 %v6054_v62, %v6221_v36  ;;  %v243_v10 = vmul.f32 %v6060_v1, %v6221_v36  ;;  %v238_v37 = vmul.f32 %v6062_v3, %v6221_v36  ;;  %v242_v11 = vmul.f32 %v6064_v4, %v6221_v36 }
  0xc4   :  { %v6236_v42 = vpop.permute.xlu1 %475  ;;  %8458 = vst [vmem:[#allocation40_spill] sm:$0xff] %v6248_v2  ;;  %8459 = vst [vmem:[#allocation41_spill] sm:$0xff] %v6254_v16  ;;  %v600_v55 = vadd.f32 %v6091_v19, %v418_v23 }
  0xc5   :  { %v421_v7 = vadd.f32 %v373_v27, %v239_v22  ;;  %v425_v48 = vadd.f32 %v377_v28, %v243_v10  ;;  %v420_v14 = vadd.f32 %v372_v29, %v238_v37  ;;  %v424_v49 = vadd.f32 %v376_v24, %v242_v11  ;;  %8460 = vst [vmem:[#allocation42_spill] sm:$0xff] %v6258_v18 }
  0xc6   :  { %v6250_v12 = vpop.permute.xlu0 %152  ;;  %v380_v10 = vmul.f32 %v6036_v39, %v6132_v33  ;;  %v379_v22 = vmul.f32 %v6038_v45, %v6132_v33  ;;  %v383_v27 = vmul.f32 %v6044_v57, %v6132_v33  ;;  %v378_v28 = vmul.f32 %v6048_v59, %v6132_v33 }
  0xc7   :  { %v597_v29 = vadd.f32 %v6079_v13, %v415_v20  ;;  %v601_v24 = vadd.f32 %v6083_v15, %v419_v6  ;;  %v596_v37 = vadd.f32 %v6087_v17, %v414_v51  ;;  %v603_v11 = vadd.f32 %v555_v41, %v421_v7 }
  0xc8   :  { %v607_v18 = vadd.f32 %v559_v44, %v425_v48  ;;  %v602_v16 = vadd.f32 %v554_v46, %v420_v14  ;;  %v606_v2 = vadd.f32 %v558_v35, %v424_v49  ;;  %v251_v49 = vmul.f32 %v6054_v62, %v6250_v12 }
  0xc9   :  { %v6272_v47 = vpop.permute.xlu1 %646 }
  0xca   :  { %v6274_v21 = vpop.permute.xlu0 %651  ;;  %v685_v52 = vadd.f32 %v6272_v47, %v597_v29  ;;  %v689_v40 = vadd.f32 %v6272_v47, %v601_v24  ;;  %v684_v13 = vadd.f32 %v6272_v47, %v596_v37  ;;  %v688_v6 = vadd.f32 %v6272_v47, %v600_v55 }
  0xcb   :  { %v691_v15 = vadd.f32 %v6274_v21, %v603_v11  ;;  %v695_v17 = vadd.f32 %v6274_v21, %v607_v18  ;;  %v690_v19 = vadd.f32 %v6274_v21, %v602_v16  ;;  %v694_v20 = vadd.f32 %v6274_v21, %v606_v2 }
  0xcc   :  { %v733_v23 = vmax.f32 %v685_v52, 0.0  ;;  %v737_v41 = vmax.f32 %v689_v40, 0.0  ;;  %v732_v44 = vmax.f32 %v684_v13, 0.0  ;;  %v736_v46 = vmax.f32 %v688_v6, 0.0 }
  0xcd   :  { %v6284_v35 = vpop.permute.xlu1 %157  ;;  %v739_v48 = vmax.f32 %v691_v15, 0.0  ;;  %v743_v51 = vmax.f32 %v695_v17, 0.0  ;;  %v738_v7 = vmax.f32 %v690_v19, 0.0  ;;  %v742_v14 = vmax.f32 %v694_v20, 0.0 }
  0xce   :  { %8461 = vst [vmem:[#allocation43_spill] sm:$0xff] %v6284_v35  ;;  %v427_v29 = vadd.f32 %v379_v22, %v245_v38  ;;  %v382_v18 = vmul.f32 %v6056_v63, %v6132_v33  ;;  %v6292_v2 = vmul.f32 %v6066_v5, %v6106_v26  ;;  %v255_v37 = vmul.f32 %v6060_v1, %v6250_v12 }
  0xcf   :  { %v781_v40 = vpack.c.bf16 %v739_v48, %v733_v23  ;;  %v785_v52 = vpack.c.bf16 %v743_v51, %v737_v41  ;;  %v780_v16 = vpack.c.bf16 %v738_v7, %v732_v44  ;;  %v784_v24 = vpack.c.bf16 %v742_v14, %v736_v46 }
  0xd0   :  { %8462 = vst [vmem:[#allocation44_spill] sm:$0xff] %v6292_v2  ;;  %v431_v55 = vadd.f32 %v383_v27, %v6209_v9  ;;  %v250_v11 = vmul.f32 %v6062_v3, %v6250_v12  ;;  %v6301_v38 = vmul.f32 %v6066_v5, %v6132_v33  ;;  %v385_v22 = vmul.f32 %v6038_v45, %v6185_v56 }
  0xd1   :  { %877 = vmatprep.subr.bf16.mxu1 %v781_v40  ;;  %1023 = vmatprep.subr.bf16.mxu0 %v785_v52  ;;  %v6303_v26 = vpop.permute.xlu1 %162  ;;  %v426_v13 = vadd.f32 %v378_v28, %v6212_v34  ;;  %v6309_v6 = vadd.f32 %v380_v10, %v6198_v54  ;;  %v389_v9 = vmul.f32 %v6044_v57, %v6185_v56 }
  0xd2   :  { %8463 = vst [vmem:[#allocation45_spill] sm:$0xff] %v6303_v26  ;;  %878 = vmatpush1.bf16.msra.mxu1 %v780_v16  ;;  %1024 = vmatpush1.bf16.msra.mxu0 %v784_v24  ;;  %v384_v33 = vmul.f32 %v6048_v59, %v6185_v56  ;;  %v254_v27 = vmul.f32 %v6064_v4, %v6250_v12 }
  0xd3   :  { %8464 = vst [vmem:[#allocation46_spill] sm:$0xff] %v6309_v6  ;;  %v234_v15 = vmul.f32 %v6052_v61, %v6172_v50  ;;  %v6321_v34 = vmul.f32 %v6036_v39, %v6185_v56  ;;  %v433_v54 = vadd.f32 %v385_v22, %v251_v49  ;;  %v609_v10 = vadd.f32 %v6118_v30, %v427_v29  ;;  %v8484_v6 = vld [vmem:[#allocation19_spill] sm:$0xff] }
  0xd4   :  { %v437_v28 = vadd.f32 %v389_v9, %v255_v37  ;;  %v613_v17 = vadd.f32 %v6122_v25, %v431_v55  ;;  %v432_v19 = vadd.f32 %v384_v33, %v250_v11  ;;  %v388_v20 = vmul.f32 %v6056_v63, %v6185_v56  ;;  %v8469_v9 = vld [vmem:[#allocation32_spill] sm:$0xff] }
  0xd5   :  { %v240_v23 = vmul.f32 %v6052_v61, %v6221_v36  ;;  %v567_v41 = vmul.f32 %v6042_v53, %v6236_v42  ;;  %v608_v44 = vadd.f32 %v6126_v31, %v426_v13  ;;  %v430_v46 = vadd.f32 %v382_v18, %v6215_v43  ;;  %v6349_v43 = vpop.permute.xlu0 %167 }
  0xd6   :  { %v6333_v48 = vpop.permute.xlu1 %301  ;;  %v571_v30 = vmul.f32 %v6046_v58, %v6236_v42  ;;  %v566_v25 = vmul.f32 %v6050_v60, %v6236_v42  ;;  %v436_v51 = vadd.f32 %v388_v20, %v254_v27  ;;  %v257_v7 = vmul.f32 %v6054_v62, %v6284_v35  ;;  %8466 = vst [vmem:[#allocation48_spill] sm:$0xff] %v6349_v43 }
  0xd7   :  { %v6343_v14 = vmul.f32 %v6052_v61, %v6250_v12  ;;  %v6347_v31 = vmul.f32 %v6052_v61, %v6284_v35  ;;  %v615_v49 = vadd.f32 %v567_v41, %v433_v54  ;;  %v261_v29 = vmul.f32 %v6060_v1, %v6284_v35 }
  0xd8   :  { %v6355_v18 = vmul.f32 %v6052_v61, %v6349_v43  ;;  %v619_v40 = vadd.f32 %v571_v30, %v437_v28  ;;  %v614_v52 = vadd.f32 %v566_v25, %v432_v19  ;;  %v570_v16 = vmul.f32 %v6058_v0, %v6236_v42  ;;  %v8471_v28 = vld [vmem:[#allocation33_spill] sm:$0xff] }
  0xd9   :  { %8465 = vst [vmem:[#allocation47_spill] sm:$0xff] %v6347_v31  ;;  %v6361_v24 = vmul.f32 %v6052_v61, %v6303_v26  ;;  %v612_v37 = vadd.f32 %v6130_v32, %v430_v46  ;;  %v235_v55 = vmul.f32 %v6071_v8, %v6172_v50  ;;  %v241_v11 = vmul.f32 %v6071_v8, %v6221_v36 }
  0xda   :  { %8467 = vst [vmem:[#allocation49_spill] sm:$0xff] %v6355_v18  ;;  %v618_v22 = vadd.f32 %v570_v16, %v436_v51  ;;  %v263_v13 = vmul.f32 %v6054_v62, %v6303_v26  ;;  %v439_v33 = vadd.f32 %v8469_v9, %v257_v7  ;;  %v256_v27 = vmul.f32 %v6062_v3, %v6284_v35  ;;  %v8472_v51 = vld [vmem:[#allocation17_spill] sm:$0xff]  ;;  %v8475_v18 = vld [vmem:[#allocation34_spill] sm:$0xff] }
  0xdb   :  { %8468 = vst [vmem:[#allocation50_spill] sm:$0xff] %v6361_v24  ;;  %v6373_v54 = vpop.permute.xlu1 %479  ;;  %v397_v32 = vmul.f32 %v6038_v45, %v6333_v48  ;;  %v267_v50 = vmul.f32 %v6060_v1, %v6303_v26  ;;  %v443_v19 = vadd.f32 %v8471_v28, %v261_v29  ;;  %v260_v36 = vmul.f32 %v6064_v4, %v6284_v35  ;;  %v8473_v29 = vld [vmem:[#allocation21_spill] sm:$0xff] }
  0xdc   :  { %8470 = vst [vmem:[#allocation32_spill] sm:$0xff] %v6373_v54  ;;  %v401_v20 = vmul.f32 %v6044_v57, %v6333_v48  ;;  %v262_v41 = vmul.f32 %v6062_v3, %v6303_v26  ;;  %v396_v46 = vmul.f32 %v6048_v59, %v6333_v48  ;;  %v266_v30 = vmul.f32 %v6064_v4, %v6303_v26  ;;  %v8474_v9 = vld [vmem:[#allocation13_spill] sm:$0xff] }
  0xdd   :  { %v400_v25 = vmul.f32 %v6056_v63, %v6333_v48  ;;  %v417_v7 = vadd.f32 %v8472_v51, %v235_v55  ;;  %v423_v16 = vadd.f32 %v8473_v29, %v241_v11  ;;  %v416_v28 = vadd.f32 %v8474_v9, %v234_v15  ;;  %v8479_v55 = vld [vmem:[#allocation36_spill] sm:$0xff] }
  0xde   :  { %v438_v2 = vadd.f32 %v8475_v18, %v256_v27  ;;  %v6398_v24 = vmul.f32 %v6054_v62, %v6349_v43  ;;  %v6402_v31 = vmul.f32 %v6060_v1, %v6349_v43  ;;  %v6406_v26 = vmul.f32 %v6062_v3, %v6349_v43  ;;  %v8481_v18 = vld [vmem:[#allocation16_spill] sm:$0xff] }
  0xdf   :  { %v445_v35 = vadd.f32 %v397_v32, %v263_v13  ;;  %v442_v51 = vadd.f32 %v8479_v55, %v260_v36  ;;  %v6411_v15 = vmul.f32 %v6064_v4, %v6349_v43  ;;  %v422_v11 = vadd.f32 %v8481_v18, %v240_v23  ;;  %v8482_v13 = vld [vmem:[#allocation18_spill] sm:$0xff]  ;;  %v8483_v36 = vld [vmem:[#allocation27_spill] sm:$0xff] }
  0xe0   :  { %8476 = vst [vmem:[#allocation33_spill] sm:$0xff] %v6398_v24  ;;  %8477 = vst [vmem:[#allocation17_spill] sm:$0xff] %v6402_v31  ;;  %v6414_v27 = vpop.permute.xlu1 %656  ;;  %v573_v29 = vmul.f32 %v6042_v53, %v6373_v54  ;;  %v449_v9 = vadd.f32 %v401_v20, %v267_v50  ;;  %v577_v31 = vmul.f32 %v6046_v58, %v6373_v54 }
  0xe1   :  { %8478 = vst [vmem:[#allocation21_spill] sm:$0xff] %v6406_v26  ;;  %8480 = vst [vmem:[#allocation13_spill] sm:$0xff] %v6411_v15  ;;  %v444_v24 = vadd.f32 %v396_v46, %v262_v41  ;;  %v448_v26 = vadd.f32 %v400_v25, %v266_v30  ;;  %v599_v32 = vadd.f32 %v8482_v13, %v417_v7  ;;  %v8485_v30 = vld [vmem:[#allocation29_spill] sm:$0xff] }
  0xe2   :  { %v605_v55 = vadd.f32 %v8483_v36, %v423_v16  ;;  %v598_v43 = vadd.f32 %v8484_v6, %v416_v28  ;;  %v697_v15 = vadd.f32 %v6414_v27, %v609_v10  ;;  %v701_v23 = vadd.f32 %v6414_v27, %v613_v17  ;;  %v6441_v36 = vpop.permute.xlu0 %666 }
  0xe3   :  { %v696_v18 = vadd.f32 %v6414_v27, %v608_v44  ;;  %v572_v50 = vmul.f32 %v6050_v60, %v6373_v54  ;;  %v576_v20 = vmul.f32 %v6058_v0, %v6373_v54  ;;  %v687_v41 = vadd.f32 %v6272_v47, %v599_v32 }
  0xe4   :  { %v693_v46 = vadd.f32 %v6274_v21, %v605_v55  ;;  %v604_v25 = vadd.f32 %v8485_v30, %v422_v11  ;;  %v6433_v7 = vpop.permute.xlu1 %661  ;;  %v700_v6 = vadd.f32 %v6414_v27, %v612_v37  ;;  %v621_v10 = vadd.f32 %v573_v29, %v439_v33 }
  0xe5   :  { %v625_v17 = vadd.f32 %v577_v31, %v443_v19  ;;  %v686_v44 = vadd.f32 %v6272_v47, %v598_v43  ;;  %v703_v16 = vadd.f32 %v6433_v7, %v615_v49  ;;  %v707_v28 = vadd.f32 %v6433_v7, %v619_v40 }
  0xe6   :  { %v702_v13 = vadd.f32 %v6433_v7, %v614_v52  ;;  %v706_v32 = vadd.f32 %v6433_v7, %v618_v22  ;;  %v745_v55 = vmax.f32 %v697_v15, 0.0  ;;  %v749_v11 = vmax.f32 %v701_v23, 0.0 }
  0xe7   :  { %v744_v30 = vmax.f32 %v696_v18, 0.0  ;;  %v620_v0 = vadd.f32 %v572_v50, %v438_v2  ;;  %v751_v54 = vmax.f32 %v703_v16, 0.0  ;;  %v755_v37 = vmax.f32 %v707_v28, 0.0  ;;  %v8487_v50 = vld [vmem:[#allocation24_spill] sm:$0xff]  ;;  %v8489_v28 = vld [vmem:[#allocation25_spill] sm:$0xff] }
  0xe8   :  { %v750_v33 = vmax.f32 %v702_v13, 0.0  ;;  %v754_v31 = vmax.f32 %v706_v32, 0.0  ;;  %v6443_v19 = vpop.permute.xlu1 %172  ;;  %v748_v47 = vmax.f32 %v700_v6, 0.0  ;;  %v624_v43 = vadd.f32 %v576_v20, %v442_v51 }
  0xe9   :  { %v692_v49 = vadd.f32 %v6274_v21, %v604_v25  ;;  %v253_v40 = vmul.f32 %v6071_v8, %v6250_v12  ;;  %v787_v52 = vpack.c.bf16 %v751_v54, %v745_v55  ;;  %v791_v22 = vpack.c.bf16 %v755_v37, %v749_v11  ;;  %v8486_v12 = vld [vmem:[#allocation20_spill] sm:$0xff]  ;;  %v8511_v55 = vld [vmem:[#allocation47_spill] sm:$0xff] }
  0xea   :  { %v786_v29 = vpack.c.bf16 %v750_v33, %v744_v30  ;;  %v6449_v15 = vadd.f32 %v6441_v36, %v621_v10  ;;  %v790_v2 = vpack.c.bf16 %v754_v31, %v748_v47  ;;  %v6452_v23 = vadd.f32 %v6441_v36, %v625_v17  ;;  %v8491_v30 = vld [vmem:[#allocation14_spill] sm:$0xff] }
  0xeb   :  { %v6455_v18 = vadd.f32 %v6441_v36, %v620_v0  ;;  %v387_v51 = vmul.f32 %v6066_v5, %v6185_v56  ;;  %v6461_v21 = vmul.f32 %v6036_v39, %v6333_v48  ;;  %879 = vmatprep.subr.bf16.mxu1 %v787_v52  ;;  %1025 = vmatprep.subr.bf16.mxu0 %v791_v22  ;;  %v735_v25 = vmax.f32 %v687_v41, 0.0  ;;  %v8488_v56 = vld [vmem:[#allocation37_spill] sm:$0xff]  ;;  %v8492_v47 = vld [vmem:[#allocation22_spill] sm:$0xff] }
  0xec   :  { %v6464_v54 = vadd.f32 %v8486_v12, %v445_v35  ;;  %v6467_v20 = vadd.f32 %v8487_v50, %v449_v9  ;;  %880 = vmatpush1.bf16.msra.mxu1 %v786_v29  ;;  %1026 = vmatpush1.bf16.msra.mxu0 %v790_v2  ;;  %v6470_v0 = vadd.f32 %v6441_v36, %v624_v43  ;;  %v741_v6 = vmax.f32 %v693_v46, 0.0  ;;  %v8490_v35 = vld [vmem:[#allocation26_spill] sm:$0xff]  ;;  %v8496_v2 = vld [vmem:[#allocation39_spill] sm:$0xff]  ;;  %v8497_v12 = vld [vmem:[#allocation40_spill] sm:$0xff] }
  0xed   :  { %v429_v10 = vadd.f32 %v6301_v38, %v8488_v56  ;;  %v435_v17 = vadd.f32 %v387_v51, %v253_v40  ;;  %v6474_v16 = vpop.permute.xlu1 %305  ;;  %v6477_v13 = vadd.f32 %v8489_v28, %v444_v24  ;;  %v6480_v32 = vadd.f32 %v8490_v35, %v448_v26  ;;  %v8502_v35 = vld [vmem:[#allocation43_spill] sm:$0xff] }
  0xee   :  { %v734_v9 = vmax.f32 %v686_v44, 0.0  ;;  %v740_v41 = vmax.f32 %v692_v49, 0.0  ;;  %v569_v38 = vmul.f32 %v8491_v30, %v6236_v42  ;;  %v275_v37 = vmul.f32 %v6054_v62, %v6443_v19 }
  0xef   :  { %v279_v24 = vmul.f32 %v6060_v1, %v6443_v19  ;;  %v274_v26 = vmul.f32 %v6062_v3, %v6443_v19  ;;  %v278_v44 = vmul.f32 %v6064_v4, %v6443_v19  ;;  %v6496_v31 = vpack.c.bf16 %v741_v6, %v735_v25  ;;  %v8499_v25 = vld [vmem:[#allocation42_spill] sm:$0xff] }
  0xf0   :  { %v611_v43 = vadd.f32 %v8492_v47, %v429_v10  ;;  %v617_v49 = vadd.f32 %v569_v38, %v435_v17  ;;  %v403_v40 = vmul.f32 %v6038_v45, %v6474_v16  ;;  %v407_v62 = vmul.f32 %v6044_v57, %v6474_v16  ;;  %v8495_v45 = vld [vmem:[#allocation15_spill] sm:$0xff]  ;;  %v8500_v10 = vld [vmem:[#allocation46_spill] sm:$0xff]  ;;  %v8504_v38 = vld [vmem:[#allocation17_spill] sm:$0xff] }
  0xf1   :  { %v6503_v1 = vpack.c.bf16 %v740_v41, %v734_v9  ;;  %v434_v3 = vadd.f32 %v6321_v34, %v6343_v14  ;;  %v6509_v4 = vmul.f32 %v6052_v61, %v6443_v19  ;;  %v568_v57 = vmul.f32 %v8495_v45, %v6236_v42  ;;  %v8498_v34 = vld [vmem:[#allocation41_spill] sm:$0xff]  ;;  %v8501_v17 = vld [vmem:[#allocation23_spill] sm:$0xff] }
  0xf2   :  { %v6511_v52 = vpop.permute.xlu1 %487  ;;  %v6514_v22 = vadd.f32 %v6414_v27, %v611_v43  ;;  %v6517_v29 = vadd.f32 %v6433_v7, %v617_v49  ;;  %v457_v51 = vadd.f32 %v8496_v2, %v275_v37  ;;  %v461_v50 = vadd.f32 %v8497_v12, %v279_v24  ;;  %v8503_v9 = vld [vmem:[#allocation33_spill] sm:$0xff]  ;;  %v8505_v43 = vld [vmem:[#allocation32_spill] sm:$0xff] }
  0xf3   :  { %8493 = vst [vmem:[#allocation34_spill] sm:$0xff] %v6503_v1  ;;  %8494 = vst [vmem:[#allocation36_spill] sm:$0xff] %v6509_v4  ;;  %v456_v14 = vadd.f32 %v8498_v34, %v274_v26  ;;  %v460_v61 = vadd.f32 %v8499_v25, %v278_v44  ;;  %v402_v6 = vmul.f32 %v6048_v59, %v6474_v16  ;;  %v8507_v2 = vld [vmem:[#allocation21_spill] sm:$0xff]  ;;  %v8512_v1 = vld [vmem:[#allocation28_spill] sm:$0xff] }
  0xf4   :  { %v406_v56 = vmul.f32 %v6056_v63, %v6474_v16  ;;  %v6531_v28 = vadd.f32 %v8501_v17, %v8500_v10  ;;  %v259_v42 = vmul.f32 %v6071_v8, %v8502_v35  ;;  %v451_v41 = vadd.f32 %v403_v40, %v8503_v9  ;;  %v8508_v34 = vld [vmem:[#allocation13_spill] sm:$0xff]  ;;  %v8510_v35 = vld [vmem:[#allocation38_spill] sm:$0xff] }
  0xf5   :  { %v455_v37 = vadd.f32 %v407_v62, %v8504_v38  ;;  %v6537_v24 = vadd.f32 %v568_v57, %v434_v3  ;;  %v399_v26 = vmul.f32 %v6066_v5, %v6333_v48  ;;  %v585_v63 = vmul.f32 %v6042_v53, %v6511_v52  ;;  %v8506_v3 = vld [vmem:[#allocation12_spill] sm:$0xff]  ;;  %v8509_v10 = vld [vmem:[#allocation45_spill] sm:$0xff]  ;;  %v8513_v4 = vld [vmem:[#allocation50_spill] sm:$0xff] }
  0xf6   :  { %v6541_v59 = vpop.permute.xlu1 %491  ;;  %v589_v44 = vmul.f32 %v6046_v58, %v6511_v52  ;;  %v584_v47 = vmul.f32 %v6050_v60, %v6511_v52  ;;  %v575_v49 = vmul.f32 %v8491_v30, %v8505_v43  ;;  %v450_v12 = vadd.f32 %v402_v6, %v8507_v2 }
  0xf7   :  { %v591_v40 = vmul.f32 %v6042_v53, %v6541_v59  ;;  %v595_v48 = vmul.f32 %v6046_v58, %v6541_v59  ;;  %v590_v62 = vmul.f32 %v6050_v60, %v6541_v59  ;;  %v594_v57 = vmul.f32 %v8506_v3, %v6541_v59 }
  0xf8   :  { %v454_v25 = vadd.f32 %v406_v56, %v8508_v34  ;;  %v265_v17 = vmul.f32 %v6071_v8, %v8509_v10  ;;  %v441_v9 = vadd.f32 %v8510_v35, %v259_v42  ;;  %v588_v58 = vmul.f32 %v8506_v3, %v6511_v52 }
  0xf9   :  { %v639_v38 = vadd.f32 %v591_v40, %v457_v51  ;;  %v643_v53 = vadd.f32 %v595_v48, %v461_v50  ;;  %v638_v33 = vadd.f32 %v590_v62, %v456_v14  ;;  %v642_v46 = vadd.f32 %v594_v57, %v460_v61  ;;  %v6574_v50 = vpop.permute.xlu0 %681 }
  0xfa   :  { %v447_v60 = vadd.f32 %v399_v26, %v265_v17  ;;  %v6566_v11 = vadd.f32 %v575_v49, %v441_v9  ;;  %v440_v6 = vadd.f32 %v8512_v1, %v8511_v55  ;;  %v633_v56 = vadd.f32 %v585_v63, %v451_v41 }
  0xfb   :  { %v6570_v2 = vpop.permute.xlu1 %671  ;;  %v637_v34 = vadd.f32 %v589_v44, %v455_v37  ;;  %v632_v10 = vadd.f32 %v584_v47, %v450_v12  ;;  %v446_v51 = vadd.f32 %v6461_v21, %v8513_v4  ;;  %v727_v1 = vadd.f32 %v6574_v50, %v639_v38  ;;  %v8518_v38 = vld [vmem:[#allocation30_spill] sm:$0xff] }
  0xfc   :  { %v715_v14 = vadd.f32 %v6570_v2, %v6464_v54  ;;  %v719_v61 = vadd.f32 %v6570_v2, %v6467_v20  ;;  %v714_v42 = vadd.f32 %v6570_v2, %v6477_v13  ;;  %v718_v55 = vadd.f32 %v6570_v2, %v6480_v32 }
  0xfd   :  { %v731_v41 = vadd.f32 %v6574_v50, %v643_v53  ;;  %v726_v21 = vadd.f32 %v6574_v50, %v638_v33  ;;  %v730_v4 = vadd.f32 %v6574_v50, %v642_v46  ;;  %v636_v20 = vadd.f32 %v588_v58, %v454_v25  ;;  %v8519_v58 = vld [vmem:[#allocation48_spill] sm:$0xff] }
  0xfe   :  { %v763_v37 = vmax.f32 %v715_v14, 0.0  ;;  %v767_v26 = vmax.f32 %v719_v61, 0.0  ;;  %v762_v54 = vmax.f32 %v714_v42, 0.0  ;;  %v766_v63 = vmax.f32 %v718_v55, 0.0 }
  0xff   :  { %v6588_v44 = vpop.permute.xlu1 %676  ;;  %v574_v13 = vmul.f32 %v8495_v45, %v8505_v43  ;;  %v277_v32 = vmul.f32 %v6071_v8, %v6443_v19  ;;  %v405_v47 = vmul.f32 %v6066_v5, %v6474_v16  ;;  %v8514_v33 = vmax.f32 %v6449_v15, 0.0 }
 0x100   :  { %v8515_v46 = vmax.f32 %v6452_v23, 0.0  ;;  %v8516_v48 = vmax.f32 %v6455_v18, 0.0  ;;  %v8517_v3 = vmax.f32 %v6470_v0, 0.0  ;;  %v721_v43 = vadd.f32 %v6588_v44, %v633_v56 }
 0x101   :  { %v793_v49 = vpack.c.bf16 %v763_v37, %v8514_v33  ;;  %v725_v12 = vadd.f32 %v6588_v44, %v637_v34  ;;  %v720_v19 = vadd.f32 %v6588_v44, %v632_v10  ;;  %v724_v5 = vadd.f32 %v6588_v44, %v636_v20 }
 0x102   :  { %v797_v40 = vpack.c.bf16 %v767_v26, %v8515_v46  ;;  %v792_v62 = vpack.c.bf16 %v762_v54, %v8516_v48  ;;  %v796_v57 = vpack.c.bf16 %v766_v63, %v8517_v3  ;;  %v775_v15 = vmax.f32 %v727_v1, 0.0 }
 0x103   :  { %881 = vmatprep.subr.bf16.mxu1 %v793_v49  ;;  %v779_v25 = vmax.f32 %v731_v41, 0.0  ;;  %v774_v23 = vmax.f32 %v726_v21, 0.0  ;;  %v778_v17 = vmax.f32 %v730_v4, 0.0  ;;  %v769_v18 = vmax.f32 %v721_v43, 0.0 }
 0x104   :  { %1027 = vmatprep.subr.bf16.mxu0 %v797_v40  ;;  %882 = vmatpush1.bf16.msra.mxu1 %v792_v62  ;;  %v773_v35 = vmax.f32 %v725_v12, 0.0  ;;  %v768_v0 = vmax.f32 %v720_v19, 0.0  ;;  %v772_v9 = vmax.f32 %v724_v5, 0.0  ;;  %v629_v53 = vadd.f32 %v8518_v38, %v447_v60  ;;  %v5564_v12 = vld [vmem:[%s8409_s2 + $0x8] sm:$0xff]   ;;  %v6688_v38 = vpop.permute.xlu0 %817 }
 0x105   :  { %1028 = vmatpush1.bf16.msra.mxu0 %v796_v57  ;;  %v271_v56 = vmul.f32 %v6071_v8, %v8519_v58  ;;  %v587_v34 = vmul.f32 %v8491_v30, %v6511_v52  ;;  %v593_v10 = vmul.f32 %v8491_v30, %v6541_v59  ;;  %v799_v14 = vpack.c.bf16 %v775_v15, %v769_v18  ;;  %v6624_v30 = vld [vmem:[%s8409_s2] sm:$0xff]  }
 0x106   :  { %v803_v61 = vpack.c.bf16 %v779_v25, %v773_v35  ;;  %v798_v42 = vpack.c.bf16 %v774_v23, %v768_v0  ;;  %v802_v55 = vpack.c.bf16 %v778_v17, %v772_v9  ;;  %v404_v1 = vmul.f32 %v6036_v39, %v6474_v16  ;;  %v8520_v39 = vld [vmem:[#allocation44_spill] sm:$0xff]  ;;  %v6684_v0 = vpop.permute.xlu1 %813 }
 0x107   :  { %v698_v41 = vadd.f32 %v6414_v27, %v6531_v28  ;;  %v704_v60 = vadd.f32 %v6433_v7, %v6537_v24  ;;  %v622_v8 = vadd.f32 %v574_v13, %v440_v6  ;;  %883 = vmatprep.subr.bf16.mxu1 %v799_v14  ;;  %v753_v21 = vmax.f32 %v6517_v29, 0.0  ;;  %v8521_v27 = vld [vmem:[#allocation31_spill] sm:$0xff]  ;;  %v8522_v13 = vld [vmem:[#allocation49_spill] sm:$0xff]  ;;  %v5566_v35 = vld [vmem:[%s8409_s2 + $0x18] sm:$0xff]  }
 0x108   :  { %1029 = vmatprep.subr.bf16.mxu0 %v803_v61  ;;  %v717_v4 = vadd.f32 %v6570_v2, %v629_v53  ;;  %v453_v37 = vadd.f32 %v405_v47, %v271_v56  ;;  %v459_v16 = vadd.f32 %v8520_v39, %v277_v32  ;;  %884 = vmatpush1.bf16.msra.mxu1 %v798_v42  ;;  %v747_v29 = vmax.f32 %v6514_v22, 0.0  ;;  %v8523_v32 = vld [vmem:[#allocation36_spill] sm:$0xff]  ;;  %v8524_v47 = vld [vmem:[#allocation35_spill] sm:$0xff] }
 0x109   :  { %1030 = vmatpush1.bf16.msra.mxu0 %v802_v55  ;;  %v628_v7 = vadd.f32 %v8521_v27, %v446_v51  ;;  %v586_v28 = vmul.f32 %v8495_v45, %v6511_v52  ;;  %v592_v24 = vmul.f32 %v8495_v45, %v6541_v59  ;;  %950 = vmatprep.subr.bf16.mxu1 %v6496_v31  ;;  %v752_v63 = vmax.f32 %v704_v60, 0.0  ;;  %v8525_v45 = vld [vmem:[#allocation34_spill] sm:$0xff] }
 0x10a   :  { %v711_v6 = vadd.f32 %v6441_v36, %v6566_v11  ;;  %v635_v26 = vadd.f32 %v587_v34, %v453_v37  ;;  %v641_v54 = vadd.f32 %v593_v10, %v459_v16  ;;  %v452_v51 = vadd.f32 %v404_v1, %v8522_v13  ;;  %v6686_v9 = vpop.permute.xlu1 %821 }
 0x10b   :  { %v716_v20 = vadd.f32 %v6570_v2, %v628_v7  ;;  %v458_v52 = vadd.f32 %v8524_v47, %v8523_v32  ;;  %5221 = vmatmul.mubr.msk.bf16.vlgmr.msra.gmra.mrb[0].mxu1 %vm864_vm0, %v6624_v30  ;;  %v789_v31 = vpack.c.bf16 %v753_v21, %v747_v29  ;;  %v765_v22 = vmax.f32 %v717_v4, 0.0 }
 0x10c   :  { %5229 = vmatmul.mubr.msk.bf16.vlgmr.msra.gmra.mrb[0].mxu0 %vm864_vm0, %v6624_v30  ;;  %v723_v11 = vadd.f32 %v6588_v44, %v635_v26  ;;  %951 = vmatpush1.bf16.msra.mxu1 %v8525_v45  ;;  %v746_v59 = vmax.f32 %v698_v41, 0.0  ;;  %v8526_v33 = vmov 0   ;;  %v710_v2 = vadd.f32 %v6441_v36, %v622_v8 }
 0x10d   :  { %919 = vmatprep.mubr.bf16.mxu1 %v8526_v33  ;;  %v634_v49 = vadd.f32 %v586_v28, %v452_v51  ;;  %v640_v46 = vadd.f32 %v592_v24, %v458_v52  ;;  %952 = vmatprep.subr.bf16.mxu1 %v789_v31  ;;  %v759_v40 = vmax.f32 %v711_v6, 0.0  ;;  %v729_v48 = vadd.f32 %v6574_v50, %v641_v54 }
 0x10e   :  { %1065 = vmatprep.mubr.bf16.mxu0 %v8526_v33  ;;  %v788_v62 = vpack.c.bf16 %v752_v63, %v746_v59  ;;  %v764_v3 = vmax.f32 %v716_v20, 0.0  ;;  %v771_v19 = vmax.f32 %v723_v11, 0.0  ;;  %v758_v36 = vmax.f32 %v710_v2, 0.0  ;;  %v6698_v6 = vpop.permute.xlu1 %825 }
 0x10f   :  { %v722_v57 = vadd.f32 %v6588_v44, %v634_v49  ;;  %v795_v43 = vpack.c.bf16 %v765_v22, %v759_v40  ;;  %v728_v5 = vadd.f32 %v6574_v50, %v640_v46  ;;  %v777_v15 = vmax.f32 %v729_v48, 0.0  ;;  %v5565_v50 = vld [vmem:[%s8409_s2 + $0x10] sm:$0xff]  }
 0x110   :  { %953 = vmatpush1.bf16.msra.mxu1 %v788_v62  ;;  %v794_v25 = vpack.c.bf16 %v764_v3, %v758_v36 }
 0x111   :  { %954 = vmatprep.subr.bf16.mxu1 %v795_v43  ;;  %v770_v23 = vmax.f32 %v722_v57, 0.0  ;;  %v801_v17 = vpack.c.bf16 %v777_v15, %v771_v19  ;;  %v776_v44 = vmax.f32 %v728_v5, 0.0 }
 0x113   :  { %5222 = vmatmul.mubr.msk.bf16.gmra.mrb[4].mxu1 %vm864_vm0, %v5564_v12  ;;  %v800_v18 = vpack.c.bf16 %v776_v44, %v770_v23  ;;  %v6714_v23 = vpop.permute.xlu1 %833 }
 0x114   :  { %5230 = vmatmul.mubr.msk.bf16.gmra.mrb[4].mxu0 %vm864_vm0, %v5564_v12  ;;  %955 = vmatpush1.bf16.msra.mxu1 %v794_v25  ;;  %v6712_v25 = vpop.permute.xlu0 %829 }
 0x115   :  { %929 = vmatprep.mubr.bf16.mxu1 %v8526_v33  ;;  %956 = vmatprep.subr.bf16.mxu1 %v801_v17 }
 0x116   :  { %1075 = vmatprep.mubr.bf16.mxu0 %v8526_v33 }
 0x118   :  { %957 = vmatpush1.bf16.msra.mxu1 %v800_v18 }
 0x11b   :  { %5223 = vmatmul.mubr.msk.bf16.gmra.mrb[8].mxu1 %vm864_vm0, %v5565_v50 }
 0x11c   :  { %5231 = vmatmul.mubr.msk.bf16.gmra.mrb[8].mxu0 %vm864_vm0, %v5565_v50  ;;  %939 = vmatprep.mubr.bf16.mxu1 %v8526_v33 }
 0x11d   :  { %1085 = vmatprep.mubr.bf16.mxu0 %v8526_v33 }
 0x123   :  { %5224 = vmatmul.mubr.msk.bf16.gmra.mrb[12].mxu1 %vm864_vm0, %v5566_v35 }
 0x124   :  { %5232 = vmatmul.mubr.msk.bf16.gmra.mrb[12].mxu0 %vm864_vm0, %v5566_v35  ;;  %982 = vmatprep.mubr.bf16.mxu1 %v8526_v33 }
 0x125   :  { %1345 = vmatprep.mubr.bf16.mxu0 %v8526_v33 }
 0x12b   :  { %5225 = vmatmul.mubr.msk.bf16.vlgmr.msra.gmra.mrb[16].mxu1 %vm864_vm0, %v6624_v30 }
 0x12c   :  { %992 = vmatprep.mubr.bf16.mxu1 %v8526_v33 }
 0x133   :  { %5226 = vmatmul.mubr.msk.bf16.gmra.mrb[20].mxu1 %vm864_vm0, %v5564_v12 }
 0x134   :  { %1002 = vmatprep.mubr.bf16.mxu1 %v8526_v33 }
 0x13b   :  { %5227 = vmatmul.mubr.msk.bf16.gmra.mrb[24].mxu1 %vm864_vm0, %v5565_v50 }
 0x13c   :  { %1012 = vmatprep.mubr.bf16.mxu1 %v8526_v33 }
 0x143   :  { %5228 = vmatmul.mubr.msk.bf16.gmra.mrb[28].mxu1 %vm864_vm0, %v5566_v35 }
 0x144   :  { %1272 = vmatprep.mubr.bf16.mxu1 %v8526_v33 }
 0x1de   :  { %v911_v53 = vpop.f32.mrb[0].mxu1 }
 0x1df   :  { %v1057_v58 = vpop.f32.mrb[0].mxu0  ;;  %v912_v56 = vadd.f32 %v911_v53, %v6684_v0  ;;  %v913_v10 = vpop.f32.mrb[1].mxu1 }
 0x1e0   :  { %v1058_v34 = vadd.f32 %v1057_v58, %v6684_v0  ;;  %v1059_v14 = vpop.f32.mrb[1].mxu0  ;;  %v914_v61 = vadd.f32 %v913_v10, %v6684_v0  ;;  %v915_v55 = vpop.f32.mrb[2].mxu1 }
 0x1e1   :  { %v1060_v42 = vadd.f32 %v1059_v14, %v6684_v0  ;;  %v1061_v1 = vpop.f32.mrb[2].mxu0  ;;  %v916_v60 = vadd.f32 %v915_v55, %v6688_v38  ;;  %v917_v30 = vpop.f32.mrb[3].mxu1  ;;  %v1096_v16 = vmax.f32 %v912_v56, 0.0 }
 0x1e2   :  { %v1100_v41 = vmax.f32 %v1058_v34, 0.0  ;;  %v1062_v8 = vadd.f32 %v1061_v1, %v6688_v38  ;;  %v1063_v21 = vpop.f32.mrb[3].mxu0  ;;  %v918_v37 = vadd.f32 %v917_v30, %v6688_v38  ;;  %v1097_v28 = vmax.f32 %v914_v61, 0.0 }
 0x1e3   :  { %v1101_v4 = vmax.f32 %v1060_v42, 0.0  ;;  %v1064_v39 = vadd.f32 %v1063_v21, %v6688_v38  ;;  %v1102_v27 = vmax.f32 %v916_v60, 0.0 }
 0x1e4   :  { %v1106_v7 = vmax.f32 %v1062_v8, 0.0  ;;  %v1103_v24 = vmax.f32 %v918_v37, 0.0 }
 0x1e5   :  { %v1107_v29 = vmax.f32 %v1064_v39, 0.0  ;;  %v1144_v26 = vpack.c.bf16 %v1102_v27, %v1096_v16 }
 0x1e6   :  { %v6700_v54 = vpack.c.bf16 %v1106_v7, %v1100_v41  ;;  %v921_v63 = vpop.f32.mrb[4].mxu1  ;;  %v1145_v13 = vpack.c.bf16 %v1103_v24, %v1097_v28 }
 0x1e7   :  { %v1067_v20 = vpop.f32.mrb[4].mxu0  ;;  %v6702_v51 = vpack.c.bf16 %v1107_v29, %v1101_v4  ;;  %v922_v32 = vadd.f32 %v921_v63, %v6686_v9  ;;  %v923_v52 = vpop.f32.mrb[5].mxu1 }
 0x1e8   :  { %v1068_v47 = vadd.f32 %v1067_v20, %v6686_v9  ;;  %v1069_v31 = vpop.f32.mrb[5].mxu0  ;;  %v924_v22 = vadd.f32 %v923_v52, %v6686_v9  ;;  %v925_v45 = vpop.f32.mrb[6].mxu1  ;;  %1240 = vmatprep.subr.bf16.mxu1 %v1145_v13 }
 0x1e9   :  { %v1070_v11 = vadd.f32 %v1069_v31, %v6686_v9  ;;  %v1071_v59 = vpop.f32.mrb[6].mxu0  ;;  %v926_v49 = vadd.f32 %v925_v45, %v6698_v6  ;;  %v927_v40 = vpop.f32.mrb[7].mxu1  ;;  %1241 = vmatpush1.bf16.msra.mxu1 %v1144_v26  ;;  %v1108_v43 = vmax.f32 %v922_v32, 0.0 }
 0x1ea   :  { %v1112_v2 = vmax.f32 %v1068_v47, 0.0  ;;  %v1072_v46 = vadd.f32 %v1071_v59, %v6698_v6  ;;  %v1073_v48 = vpop.f32.mrb[7].mxu0  ;;  %v928_v3 = vadd.f32 %v927_v40, %v6698_v6  ;;  %v1109_v36 = vmax.f32 %v924_v22, 0.0  ;;  %v6728_v29 = vpop.permute.xlu0 %837 }
 0x1eb   :  { %v1113_v62 = vmax.f32 %v1070_v11, 0.0  ;;  %v1074_v57 = vadd.f32 %v1073_v48, %v6698_v6  ;;  %v1114_v12 = vmax.f32 %v926_v49, 0.0  ;;  %v6730_v26 = vpop.permute.xlu1 %841 }
 0x1ec   :  { %v1118_v19 = vmax.f32 %v1072_v46, 0.0  ;;  %v1115_v5 = vmax.f32 %v928_v3, 0.0 }
 0x1ed   :  { %v1119_v15 = vmax.f32 %v1074_v57, 0.0  ;;  %v1150_v17 = vpack.c.bf16 %v1114_v12, %v1108_v43 }
 0x1ee   :  { %v6716_v44 = vpack.c.bf16 %v1118_v19, %v1112_v2  ;;  %v931_v18 = vpop.f32.mrb[8].mxu1  ;;  %v1151_v35 = vpack.c.bf16 %v1115_v5, %v1109_v36 }
 0x1ef   :  { %v1077_v50 = vpop.f32.mrb[8].mxu0  ;;  %v6718_v53 = vpack.c.bf16 %v1119_v15, %v1113_v62  ;;  %v932_v58 = vadd.f32 %v931_v18, %v6712_v25  ;;  %v933_v34 = vpop.f32.mrb[9].mxu1 }
 0x1f0   :  { %v1078_v56 = vadd.f32 %v1077_v50, %v6712_v25  ;;  %v1079_v10 = vpop.f32.mrb[9].mxu0  ;;  %v934_v14 = vadd.f32 %v933_v34, %v6712_v25  ;;  %v935_v42 = vpop.f32.mrb[10].mxu1  ;;  %1242 = vmatprep.subr.bf16.mxu1 %v1151_v35 }
 0x1f1   :  { %v1080_v61 = vadd.f32 %v1079_v10, %v6712_v25  ;;  %v1081_v55 = vpop.f32.mrb[10].mxu0  ;;  %v936_v1 = vadd.f32 %v935_v42, %v6714_v23  ;;  %v937_v60 = vpop.f32.mrb[11].mxu1  ;;  %1243 = vmatpush1.bf16.msra.mxu1 %v1150_v17  ;;  %v1120_v4 = vmax.f32 %v932_v58, 0.0 }
 0x1f2   :  { %v1082_v41 = vadd.f32 %v1081_v55, %v6714_v23  ;;  %v1083_v8 = vpop.f32.mrb[11].mxu0  ;;  %v938_v30 = vadd.f32 %v937_v60, %v6714_v23  ;;  %v1124_v37 = vmax.f32 %v1078_v56, 0.0  ;;  %v1121_v27 = vmax.f32 %v934_v14, 0.0 }
 0x1f3   :  { %v1084_v21 = vadd.f32 %v1083_v8, %v6714_v23  ;;  %v1126_v39 = vmax.f32 %v936_v1, 0.0  ;;  %v1125_v7 = vmax.f32 %v1080_v61, 0.0  ;;  %v6749_v1 = vld [vmem:[%s8410_s3] sm:$0xff]  }
 0x1f4   :  { %v1130_v16 = vmax.f32 %v1082_v41, 0.0  ;;  %v1127_v28 = vmax.f32 %v938_v30, 0.0 }
 0x1f5   :  { %v1131_v24 = vmax.f32 %v1084_v21, 0.0  ;;  %v1156_v63 = vpack.c.bf16 %v1126_v39, %v1120_v4 }
 0x1f6   :  { %v6732_v20 = vpack.c.bf16 %v1130_v16, %v1124_v37  ;;  %v941_v13 = vpop.f32.mrb[12].mxu1  ;;  %v1157_v47 = vpack.c.bf16 %v1127_v28, %v1121_v27  ;;  %v6764_v28 = vld [vmem:[%s8410_s3 + $0x8] sm:$0xff]  }
 0x1f7   :  { %v1087_v32 = vpop.f32.mrb[12].mxu0  ;;  %v6734_v52 = vpack.c.bf16 %v1131_v24, %v1125_v7  ;;  %v942_v31 = vadd.f32 %v941_v13, %v6728_v29  ;;  %v943_v11 = vpop.f32.mrb[13].mxu1 }
 0x1f8   :  { %v1088_v22 = vadd.f32 %v1087_v32, %v6728_v29  ;;  %v1089_v45 = vpop.f32.mrb[13].mxu0  ;;  %v944_v59 = vadd.f32 %v943_v11, %v6728_v29  ;;  %v945_v49 = vpop.f32.mrb[14].mxu1  ;;  %1244 = vmatprep.subr.bf16.mxu1 %v1157_v47 }
 0x1f9   :  { %v1090_v2 = vadd.f32 %v1089_v45, %v6728_v29  ;;  %v1091_v46 = vpop.f32.mrb[14].mxu0  ;;  %v946_v40 = vadd.f32 %v945_v49, %v6730_v26  ;;  %v947_v62 = vpop.f32.mrb[15].mxu1  ;;  %1245 = vmatpush1.bf16.msra.mxu1 %v1156_v63  ;;  %v1132_v12 = vmax.f32 %v942_v31, 0.0  ;;  %v5569_v45 = vld [vmem:[%s8410_s3 + $0x10] sm:$0xff]  }
 0x1fa   :  { %v1092_v48 = vadd.f32 %v1091_v46, %v6730_v26  ;;  %v1093_v3 = vpop.f32.mrb[15].mxu0  ;;  %v948_v57 = vadd.f32 %v947_v62, %v6730_v26  ;;  %v1136_v19 = vmax.f32 %v1088_v22, 0.0  ;;  %v1133_v15 = vmax.f32 %v944_v59, 0.0 }
 0x1fb   :  { %v1094_v43 = vadd.f32 %v1093_v3, %v6730_v26  ;;  %v1138_v36 = vmax.f32 %v946_v40, 0.0  ;;  %v1137_v17 = vmax.f32 %v1090_v2, 0.0 }
 0x1fc   :  { %v1142_v5 = vmax.f32 %v1092_v48, 0.0  ;;  %v1139_v18 = vmax.f32 %v948_v57, 0.0 }
 0x1fd   :  { %v1143_v50 = vmax.f32 %v1094_v43, 0.0  ;;  %v1162_v35 = vpack.c.bf16 %v1138_v36, %v1132_v12 }
 0x1fe   :  { %v1166_v58 = vpack.c.bf16 %v1142_v5, %v1136_v19  ;;  %v984_v56 = vpop.f32.mrb[16].mxu1  ;;  %v1163_v34 = vpack.c.bf16 %v1139_v18, %v1133_v15 }
 0x1ff   :  { %v1167_v10 = vpack.c.bf16 %v1143_v50, %v1137_v17  ;;  %v985_v14 = vadd.f32 %v984_v56, %v6684_v0  ;;  %v986_v61 = vpop.f32.mrb[17].mxu1  ;;  %v6815_v56 = vld [vmem:[%s8415_s8] sm:$0xff] }
 0x200   :  { %v987_v42 = vadd.f32 %v986_v61, %v6684_v0  ;;  %v988_v55 = vpop.f32.mrb[18].mxu1  ;;  %1246 = vmatprep.subr.bf16.mxu1 %v1163_v34  ;;  %v6821_v34 = vld [vmem:[%s8415_s8 + $0x8] sm:$0xff]  ;;  %v6839_v61 = vld [vmem:[%s8415_s8 + $0x18] sm:$0xff] }
 0x201   :  { %v989_v41 = vadd.f32 %v988_v55, %v6688_v38  ;;  %v990_v60 = vpop.f32.mrb[19].mxu1  ;;  %1247 = vmatpush1.bf16.msra.mxu1 %v1162_v35  ;;  %v1098_v30 = vmax.f32 %v985_v14, 0.0  ;;  %v6833_v14 = vld [vmem:[%s8415_s8 + $0x20] sm:$0xff]  ;;  %v6851_v55 = vld [vmem:[%s8415_s8 + $0x28] sm:$0xff] }
 0x202   :  { %v991_v8 = vadd.f32 %v990_v60, %v6688_v38  ;;  %1386 = vmatprep.subr.bf16.mxu1 %v6702_v51  ;;  %v1099_v4 = vmax.f32 %v987_v42, 0.0  ;;  %v6845_v42 = vld [vmem:[%s8415_s8 + $0x30] sm:$0xff]  ;;  %v6868_v60 = vld [vmem:[%s8415_s8 + $0x48] sm:$0xff] }
 0x203   :  { %v1104_v21 = vmax.f32 %v989_v41, 0.0  ;;  %v6863_v41 = vld [vmem:[%s8415_s8 + $0x40] sm:$0xff] }
 0x204   :  { %v1105_v37 = vmax.f32 %v991_v8, 0.0  ;;  %5237 = vmatmul.mubr.msk.bf16.vlgmr.msra.gmra.mrb[32].mxu1 %vm864_vm0, %v6749_v1  ;;  %v6875_v8 = vld [vmem:[%s8415_s8 + $0x50] sm:$0xff] }
 0x205   :  { %v1146_v0 = vpack.c.bf16 %v1104_v21, %v1098_v30  ;;  %1387 = vmatpush1.bf16.msra.mxu1 %v6700_v54  ;;  %1282 = vmatprep.mubr.bf16.mxu1 %v8526_v33  ;;  %v6880_v30 = vld [vmem:[%s8415_s8 + $0x58] sm:$0xff]  ;;  %v6887_v21 = vld [vmem:[%s8415_s8 + $0x60] sm:$0xff] }
 0x206   :  { %v994_v39 = vpop.f32.mrb[20].mxu1  ;;  %1388 = vmatprep.subr.bf16.mxu1 %v6718_v53  ;;  %v1147_v16 = vpack.c.bf16 %v1105_v37, %v1099_v4  ;;  %v6892_v4 = vld [vmem:[%s8415_s8 + $0x68] sm:$0xff]  ;;  %v6899_v37 = vld [vmem:[%s8415_s8 + $0x70] sm:$0xff] }
 0x207   :  { %v995_v38 = vadd.f32 %v994_v39, %v6686_v9  ;;  %v996_v27 = vpop.f32.mrb[21].mxu1  ;;  %v6908_v39 = vpop.permute.xlu0 %1177 }
 0x208   :  { %v997_v51 = vadd.f32 %v996_v27, %v6686_v9  ;;  %v998_v7 = vpop.f32.mrb[22].mxu1  ;;  %1313 = vmatprep.subr.bf16.mxu0 %v1147_v16  ;;  %v6910_v16 = vpop.permute.xlu1 %1181 }
 0x209   :  { %v999_v54 = vadd.f32 %v998_v7, %v6698_v6  ;;  %v1000_v24 = vpop.f32.mrb[23].mxu1  ;;  %1314 = vmatpush1.bf16.msra.mxu0 %v1146_v0  ;;  %1389 = vmatpush1.bf16.msra.mxu1 %v6716_v44  ;;  %v1110_v63 = vmax.f32 %v995_v38, 0.0  ;;  %v6904_v0 = vld [vmem:[%s8415_s8 + $0x78] sm:$0xff] }
 0x20a   :  { %v1001_v53 = vadd.f32 %v1000_v24, %v6698_v6  ;;  %1390 = vmatprep.subr.bf16.mxu1 %v6734_v52  ;;  %v1111_v9 = vmax.f32 %v997_v51, 0.0 }
 0x20b   :  { %v1116_v13 = vmax.f32 %v999_v54, 0.0 }
 0x20c   :  { %v1117_v32 = vmax.f32 %v1001_v53, 0.0  ;;  %5238 = vmatmul.mubr.msk.bf16.gmra.mrb[36].mxu1 %vm864_vm0, %v6764_v28 }
 0x20d   :  { %v1152_v47 = vpack.c.bf16 %v1116_v13, %v1110_v63  ;;  %1391 = vmatpush1.bf16.msra.mxu1 %v6732_v20  ;;  %1292 = vmatprep.mubr.bf16.mxu1 %v8526_v33 }
 0x20e   :  { %v1004_v31 = vpop.f32.mrb[24].mxu1  ;;  %1392 = vmatprep.subr.bf16.mxu1 %v1167_v10  ;;  %v1153_v22 = vpack.c.bf16 %v1117_v32, %v1111_v9  ;;  %v6827_v10 = vld [vmem:[%s8415_s8 + $0x10] sm:$0xff]  ;;  %v6916_v9 = vpop.permute.xlu1 %1185 }
 0x20f   :  { %v1005_v44 = vadd.f32 %v1004_v31, %v6712_v25  ;;  %v1006_v6 = vpop.f32.mrb[25].mxu1 }
 0x210   :  { %v1007_v52 = vadd.f32 %v1006_v6, %v6712_v25  ;;  %v1008_v11 = vpop.f32.mrb[26].mxu1  ;;  %1315 = vmatprep.subr.bf16.mxu0 %v1153_v22 }
 0x211   :  { %v1009_v59 = vadd.f32 %v1008_v11, %v6714_v23  ;;  %v1010_v2 = vpop.f32.mrb[27].mxu1  ;;  %1316 = vmatpush1.bf16.msra.mxu0 %v1152_v47  ;;  %1393 = vmatpush1.bf16.msra.mxu1 %v1166_v58  ;;  %v1122_v49 = vmax.f32 %v1005_v44, 0.0  ;;  %v6919_v11 = vpop.permute.xlu0 %1189 }
 0x212   :  { %v1011_v20 = vadd.f32 %v1010_v2, %v6714_v23  ;;  %v1123_v40 = vmax.f32 %v1007_v52, 0.0  ;;  %v5570_v23 = vld [vmem:[%s8410_s3 + $0x18] sm:$0xff]  }
 0x213   :  { %v1128_v46 = vmax.f32 %v1009_v59, 0.0 }
 0x214   :  { %v1129_v48 = vmax.f32 %v1011_v20, 0.0  ;;  %5239 = vmatmul.mubr.msk.bf16.gmra.mrb[40].mxu1 %vm864_vm0, %v5569_v45 }
 0x215   :  { %v1158_v25 = vpack.c.bf16 %v1128_v46, %v1122_v49  ;;  %1302 = vmatprep.mubr.bf16.mxu1 %v8526_v33 }
 0x216   :  { %v1014_v62 = vpop.f32.mrb[28].mxu1  ;;  %v1159_v3 = vpack.c.bf16 %v1129_v48, %v1123_v40 }
 0x217   :  { %v1015_v57 = vadd.f32 %v1014_v62, %v6728_v29  ;;  %v1016_v43 = vpop.f32.mrb[29].mxu1 }
 0x218   :  { %v1017_v12 = vadd.f32 %v1016_v43, %v6728_v29  ;;  %v1018_v19 = vpop.f32.mrb[30].mxu1  ;;  %1317 = vmatprep.subr.bf16.mxu0 %v1159_v3  ;;  %v6924_v3 = vpop.permute.xlu1 %1193 }
 0x219   :  { %v1019_v36 = vadd.f32 %v1018_v19, %v6730_v26  ;;  %v1020_v5 = vpop.f32.mrb[31].mxu1  ;;  %1318 = vmatpush1.bf16.msra.mxu0 %v1158_v25  ;;  %v1134_v17 = vmax.f32 %v1015_v57, 0.0 }
 0x21a   :  { %v1021_v15 = vadd.f32 %v1020_v5, %v6730_v26  ;;  %v1135_v50 = vmax.f32 %v1017_v12, 0.0  ;;  %v5874_v26 = vmov 3  }
 0x21b   :  { %v1140_v18 = vmax.f32 %v1019_v36, 0.0  ;;  %5555 = vset.pattern.permute.xlu1 %v5874_v26  ;;  %5556 = vset.pattern.permute.xlu0 %v5874_v26 }
 0x21c   :  { %v1141_v35 = vmax.f32 %v1021_v15, 0.0  ;;  %5240 = vmatmul.mubr.msk.bf16.gmra.mrb[44].mxu1 %vm864_vm0, %v5570_v23  ;;  %1548 = vperm.xlu1 %5555, %v6815_v56  }
 0x21d   :  { %v1164_v58 = vpack.c.bf16 %v1140_v18, %v1134_v17  ;;  %1418 = vmatprep.mubr.bf16.mxu1 %v8526_v33  ;;  %1552 = vperm.xlu0 %5556, %v6821_v34  }
 0x21e   :  { %v1165_v29 = vpack.c.bf16 %v1141_v35, %v1135_v50 }
 0x220   :  { %1319 = vmatprep.subr.bf16.mxu0 %v1165_v29  ;;  %1556 = vperm.xlu1 %5555, %v6827_v10  }
 0x221   :  { %1320 = vmatpush1.bf16.msra.mxu0 %v1164_v58  ;;  %1564 = vperm.xlu0 %5556, %v6833_v14  }
 0x224   :  { %5241 = vmatmul.mubr.msk.bf16.vlgmr.msra.gmra.mrb[16].mxu0 %vm864_vm0, %v6749_v1  ;;  %5245 = vmatmul.mubr.msk.bf16.vlgmr.msra.gmra.mrb[48].mxu1 %vm864_vm0, %v6749_v1  ;;  %v6857_v1 = vld [vmem:[%s8415_s8 + $0x38] sm:$0xff] }
 0x225   :  { %1355 = vmatprep.mubr.bf16.mxu0 %v8526_v33  ;;  %1428 = vmatprep.mubr.bf16.mxu1 %v8526_v33 }
 0x226   :  { %1560 = vperm.xlu1 %5555, %v6839_v61   ;;  %1572 = vperm.xlu0 %5556, %v6845_v42  }
 0x22a   :  { %1568 = vperm.xlu1 %5555, %v6851_v55   ;;  %1581 = vperm.xlu0 %5556, %v6863_v41  }
 0x22c   :  { %5242 = vmatmul.mubr.msk.bf16.gmra.mrb[20].mxu0 %vm864_vm0, %v6764_v28  ;;  %5246 = vmatmul.mubr.msk.bf16.gmra.mrb[52].mxu1 %vm864_vm0, %v6764_v28 }
 0x22d   :  { %1365 = vmatprep.mubr.bf16.mxu0 %v8526_v33  ;;  %1438 = vmatprep.mubr.bf16.mxu1 %v8526_v33 }
 0x22e   :  { %1576 = vperm.xlu1 %5555, %v6857_v1   ;;  %1591 = vperm.xlu0 %5556, %v6875_v8  }
 0x232   :  { %1586 = vperm.xlu1 %5555, %v6868_v60   ;;  %1601 = vperm.xlu0 %5556, %v6887_v21  }
 0x234   :  { %5243 = vmatmul.mubr.msk.bf16.gmra.mrb[24].mxu0 %vm864_vm0, %v5569_v45  ;;  %5247 = vmatmul.mubr.msk.bf16.gmra.mrb[56].mxu1 %vm864_vm0, %v5569_v45 }
 0x235   :  { %1375 = vmatprep.mubr.bf16.mxu0 %v8526_v33  ;;  %1448 = vmatprep.mubr.bf16.mxu1 %v8526_v33 }
 0x236   :  { %1596 = vperm.xlu1 %5555, %v6880_v30   ;;  %1611 = vperm.xlu0 %5556, %v6899_v37  }
 0x23a   :  { %1606 = vperm.xlu1 %5555, %v6892_v4  }
 0x23c   :  { %5244 = vmatmul.mubr.msk.bf16.gmra.mrb[28].mxu0 %vm864_vm0, %v5570_v23  ;;  %5248 = vmatmul.mubr.msk.bf16.gmra.mrb[60].mxu1 %vm864_vm0, %v5570_v23  ;;  %v6927_v23 = vpop.permute.xlu0 %1197 }
 0x23d   :  { %1715 = vmatprep.mubr.bf16.mxu0 %v8526_v33  ;;  %1828 = vmatprep.mubr.bf16.mxu1 %v8526_v33 }
 0x23e   :  { %1616 = vperm.xlu1 %5555, %v6904_v0  }
 0x2d7   :  { %v1274_v38 = vpop.f32.mrb[32].mxu1 }
 0x2d8   :  { %v1275_v27 = vadd.f32 %v1274_v38, %v6908_v39  ;;  %v1276_v51 = vpop.f32.mrb[33].mxu1  ;;  %v6932_v38 = vpop.permute.xlu1 %1201 }
 0x2d9   :  { %v1277_v7 = vadd.f32 %v1276_v51, %v6908_v39  ;;  %v1278_v28 = vpop.f32.mrb[34].mxu1 }
 0x2da   :  { %v1279_v54 = vadd.f32 %v1278_v28, %v6910_v16  ;;  %v1280_v24 = vpop.f32.mrb[35].mxu1  ;;  %v1459_v63 = vmax.f32 %v1275_v27, 0.0 }
 0x2db   :  { %v1281_v53 = vadd.f32 %v1280_v24, %v6910_v16  ;;  %v1460_v32 = vmax.f32 %v1277_v7, 0.0 }
 0x2dc   :  { %v1465_v13 = vmax.f32 %v1279_v54, 0.0  ;;  %v6935_v54 = vpop.permute.xlu0 %1205 }
 0x2dd   :  { %v1466_v47 = vmax.f32 %v1281_v53, 0.0 }
 0x2de   :  { %v1507_v31 = vpack.c.bf16 %v1465_v13, %v1459_v63 }
 0x2df   :  { %v1508_v22 = vpack.c.bf16 %v1466_v47, %v1460_v32  ;;  %v1284_v44 = vpop.f32.mrb[36].mxu1 }
 0x2e0   :  { %v1285_v6 = vadd.f32 %v1284_v44, %v6916_v9  ;;  %v1286_v52 = vpop.f32.mrb[37].mxu1 }
 0x2e1   :  { %v1287_v45 = vadd.f32 %v1286_v52, %v6916_v9  ;;  %v1288_v59 = vpop.f32.mrb[38].mxu1  ;;  %1683 = vmatprep.subr.bf16.mxu0 %v1508_v22 }
 0x2e2   :  { %v1289_v2 = vadd.f32 %v1288_v59, %v6919_v11  ;;  %v1290_v20 = vpop.f32.mrb[39].mxu1  ;;  %1684 = vmatpush1.bf16.msra.mxu0 %v1507_v31  ;;  %v1471_v46 = vmax.f32 %v1285_v6, 0.0 }
 0x2e3   :  { %v1291_v49 = vadd.f32 %v1290_v20, %v6919_v11  ;;  %v1472_v48 = vmax.f32 %v1287_v45, 0.0 }
 0x2e4   :  { %v1477_v40 = vmax.f32 %v1289_v2, 0.0 }
 0x2e5   :  { %v1478_v25 = vmax.f32 %v1291_v49, 0.0 }
 0x2e6   :  { %v1513_v62 = vpack.c.bf16 %v1477_v40, %v1471_v46 }
 0x2e7   :  { %v1514_v57 = vpack.c.bf16 %v1478_v25, %v1472_v48  ;;  %v1294_v43 = vpop.f32.mrb[40].mxu1 }
 0x2e8   :  { %v1295_v12 = vadd.f32 %v1294_v43, %v6924_v3  ;;  %v1296_v19 = vpop.f32.mrb[41].mxu1 }
 0x2e9   :  { %v1297_v36 = vadd.f32 %v1296_v19, %v6924_v3  ;;  %v1298_v5 = vpop.f32.mrb[42].mxu1  ;;  %1685 = vmatprep.subr.bf16.mxu0 %v1514_v57  ;;  %v6947_v57 = vld [vmem:[%s8411_s4] sm:$0xff]  }
 0x2ea   :  { %v1299_v15 = vadd.f32 %v1298_v5, %v6927_v23  ;;  %v1300_v17 = vpop.f32.mrb[43].mxu1  ;;  %1686 = vmatpush1.bf16.msra.mxu0 %v1513_v62  ;;  %v1483_v50 = vmax.f32 %v1295_v12, 0.0 }
 0x2eb   :  { %v1301_v18 = vadd.f32 %v1300_v17, %v6927_v23  ;;  %v1484_v58 = vmax.f32 %v1297_v36, 0.0 }
 0x2ec   :  { %v1489_v35 = vmax.f32 %v1299_v15, 0.0 }
 0x2ed   :  { %v1490_v29 = vmax.f32 %v1301_v18, 0.0 }
 0x2ee   :  { %v1519_v26 = vpack.c.bf16 %v1489_v35, %v1483_v50 }
 0x2ef   :  { %v1520_v27 = vpack.c.bf16 %v1490_v29, %v1484_v58  ;;  %v1304_v51 = vpop.f32.mrb[44].mxu1 }
 0x2f0   :  { %v1305_v7 = vadd.f32 %v1304_v51, %v6932_v38  ;;  %v1306_v28 = vpop.f32.mrb[45].mxu1 }
 0x2f1   :  { %v1307_v24 = vadd.f32 %v1306_v28, %v6932_v38  ;;  %v1308_v53 = vpop.f32.mrb[46].mxu1  ;;  %1687 = vmatprep.subr.bf16.mxu0 %v1520_v27 }
 0x2f2   :  { %v1309_v63 = vadd.f32 %v1308_v53, %v6935_v54  ;;  %v1310_v13 = vpop.f32.mrb[47].mxu1  ;;  %1688 = vmatpush1.bf16.msra.mxu0 %v1519_v26  ;;  %v1495_v47 = vmax.f32 %v1305_v7, 0.0 }
 0x2f3   :  { %v1311_v32 = vadd.f32 %v1310_v13, %v6935_v54  ;;  %v1496_v22 = vmax.f32 %v1307_v24, 0.0 }
 0x2f4   :  { %v1501_v31 = vmax.f32 %v1309_v63, 0.0 }
 0x2f5   :  { %v1502_v44 = vmax.f32 %v1311_v32, 0.0 }
 0x2f6   :  { %v1525_v6 = vpack.c.bf16 %v1501_v31, %v1495_v47 }
 0x2f7   :  { %v1526_v52 = vpack.c.bf16 %v1502_v44, %v1496_v22  ;;  %v1347_v45 = vpop.f32.mrb[16].mxu0  ;;  %v1420_v59 = vpop.f32.mrb[48].mxu1 }
 0x2f8   :  { %v1348_v2 = vadd.f32 %v1347_v45, %v6908_v39  ;;  %v1421_v20 = vadd.f32 %v1420_v59, %v6908_v39  ;;  %v1349_v49 = vpop.f32.mrb[17].mxu0  ;;  %v1422_v46 = vpop.f32.mrb[49].mxu1 }
 0x2f9   :  { %v1350_v40 = vadd.f32 %v1349_v49, %v6908_v39  ;;  %v1423_v48 = vadd.f32 %v1422_v46, %v6908_v39  ;;  %v1351_v25 = vpop.f32.mrb[18].mxu0  ;;  %v1424_v62 = vpop.f32.mrb[50].mxu1  ;;  %1689 = vmatprep.subr.bf16.mxu0 %v1526_v52 }
 0x2fa   :  { %v1352_v43 = vadd.f32 %v1351_v25, %v6910_v16  ;;  %v1425_v12 = vadd.f32 %v1424_v62, %v6910_v16  ;;  %v1353_v19 = vpop.f32.mrb[19].mxu0  ;;  %v1426_v36 = vpop.f32.mrb[51].mxu1  ;;  %1690 = vmatpush1.bf16.msra.mxu0 %v1525_v6  ;;  %v1461_v39 = vmax.f32 %v1348_v2, 0.0  ;;  %v1463_v17 = vmax.f32 %v1421_v20, 0.0  ;;  %v6963_v6 = vld [vmem:[%s8411_s4 + $0x8] sm:$0xff]  }
 0x2fb   :  { %v1354_v5 = vadd.f32 %v1353_v19, %v6910_v16  ;;  %v1427_v15 = vadd.f32 %v1426_v36, %v6910_v16  ;;  %v1462_v35 = vmax.f32 %v1350_v40, 0.0  ;;  %v1464_v58 = vmax.f32 %v1423_v48, 0.0 }
 0x2fc   :  { %v1467_v18 = vmax.f32 %v1352_v43, 0.0  ;;  %v1469_v50 = vmax.f32 %v1425_v12, 0.0 }
 0x2fd   :  { %v1468_v29 = vmax.f32 %v1354_v5, 0.0  ;;  %v1470_v26 = vmax.f32 %v1427_v15, 0.0  ;;  %5257 = vmatmul.mubr.msk.bf16.vlgmr.msra.gmra.mrb[32].mxu0 %vm864_vm0, %v6947_v57 }
 0x2fe   :  { %v1509_v27 = vpack.c.bf16 %v1467_v18, %v1461_v39  ;;  %v1511_v51 = vpack.c.bf16 %v1469_v50, %v1463_v17  ;;  %1725 = vmatprep.mubr.bf16.mxu0 %v8526_v33 }
 0x2ff   :  { %v1512_v7 = vpack.c.bf16 %v1470_v26, %v1464_v58  ;;  %v1357_v28 = vpop.f32.mrb[20].mxu0  ;;  %v1430_v24 = vpop.f32.mrb[52].mxu1  ;;  %v1510_v53 = vpack.c.bf16 %v1468_v29, %v1462_v35 }
 0x300   :  { %v1358_v16 = vadd.f32 %v1357_v28, %v6916_v9  ;;  %v1431_v63 = vadd.f32 %v1430_v24, %v6916_v9  ;;  %v1359_v13 = vpop.f32.mrb[21].mxu0  ;;  %v1432_v32 = vpop.f32.mrb[53].mxu1 }
 0x301   :  { %v1360_v47 = vadd.f32 %v1359_v13, %v6916_v9  ;;  %v1433_v31 = vadd.f32 %v1432_v32, %v6916_v9  ;;  %v1361_v22 = vpop.f32.mrb[22].mxu0  ;;  %v1434_v44 = vpop.f32.mrb[54].mxu1  ;;  %1796 = vmatprep.subr.bf16.mxu1 %v1510_v53  ;;  %1909 = vmatprep.subr.bf16.mxu0 %v1512_v7 }
 0x302   :  { %v1362_v52 = vadd.f32 %v1361_v22, %v6919_v11  ;;  %v1435_v45 = vadd.f32 %v1434_v44, %v6919_v11  ;;  %v1363_v59 = vpop.f32.mrb[23].mxu0  ;;  %v1436_v2 = vpop.f32.mrb[55].mxu1  ;;  %1797 = vmatpush1.bf16.msra.mxu1 %v1509_v27  ;;  %1910 = vmatpush1.bf16.msra.mxu0 %v1511_v51  ;;  %v1473_v49 = vmax.f32 %v1358_v16, 0.0  ;;  %v1475_v46 = vmax.f32 %v1431_v63, 0.0  ;;  %v6979_v51 = vld [vmem:[%s8411_s4 + $0x10] sm:$0xff]  }
 0x303   :  { %v1364_v20 = vadd.f32 %v1363_v59, %v6919_v11  ;;  %v1437_v9 = vadd.f32 %v1436_v2, %v6919_v11  ;;  %v1474_v25 = vmax.f32 %v1360_v47, 0.0  ;;  %v1476_v62 = vmax.f32 %v1433_v31, 0.0 }
 0x304   :  { %v1479_v40 = vmax.f32 %v1362_v52, 0.0  ;;  %v1481_v48 = vmax.f32 %v1435_v45, 0.0 }
 0x305   :  { %v1480_v43 = vmax.f32 %v1364_v20, 0.0  ;;  %v1482_v12 = vmax.f32 %v1437_v9, 0.0  ;;  %5258 = vmatmul.mubr.msk.bf16.gmra.mrb[36].mxu0 %vm864_vm0, %v6963_v6 }
 0x306   :  { %v1515_v19 = vpack.c.bf16 %v1479_v40, %v1473_v49  ;;  %v1517_v36 = vpack.c.bf16 %v1481_v48, %v1475_v46  ;;  %1735 = vmatprep.mubr.bf16.mxu0 %v8526_v33 }
 0x307   :  { %v1518_v5 = vpack.c.bf16 %v1482_v12, %v1476_v62  ;;  %v1367_v15 = vpop.f32.mrb[24].mxu0  ;;  %v1440_v39 = vpop.f32.mrb[56].mxu1  ;;  %v1516_v17 = vpack.c.bf16 %v1480_v43, %v1474_v25 }
 0x308   :  { %v1368_v11 = vadd.f32 %v1367_v15, %v6924_v3  ;;  %v1441_v18 = vadd.f32 %v1440_v39, %v6924_v3  ;;  %v1369_v50 = vpop.f32.mrb[25].mxu0  ;;  %v1442_v35 = vpop.f32.mrb[57].mxu1 }
 0x309   :  { %v1370_v58 = vadd.f32 %v1369_v50, %v6924_v3  ;;  %v1443_v29 = vadd.f32 %v1442_v35, %v6924_v3  ;;  %v1371_v26 = vpop.f32.mrb[26].mxu0  ;;  %v1444_v27 = vpop.f32.mrb[58].mxu1  ;;  %1798 = vmatprep.subr.bf16.mxu1 %v1516_v17  ;;  %1911 = vmatprep.subr.bf16.mxu0 %v1518_v5 }
 0x30a   :  { %v1372_v7 = vadd.f32 %v1371_v26, %v6927_v23  ;;  %v1445_v28 = vadd.f32 %v1444_v27, %v6927_v23  ;;  %v1373_v24 = vpop.f32.mrb[27].mxu0  ;;  %v1446_v53 = vpop.f32.mrb[59].mxu1  ;;  %1799 = vmatpush1.bf16.msra.mxu1 %v1515_v19  ;;  %1912 = vmatpush1.bf16.msra.mxu0 %v1517_v36  ;;  %v1485_v63 = vmax.f32 %v1368_v11, 0.0  ;;  %v1487_v13 = vmax.f32 %v1441_v18, 0.0  ;;  %v5574_v19 = vld [vmem:[%s8411_s4 + $0x18] sm:$0xff]  }
 0x30b   :  { %v1374_v16 = vadd.f32 %v1373_v24, %v6927_v23  ;;  %v1447_v3 = vadd.f32 %v1446_v53, %v6927_v23  ;;  %v1486_v31 = vmax.f32 %v1370_v58, 0.0  ;;  %v1488_v22 = vmax.f32 %v1443_v29, 0.0 }
 0x30c   :  { %v1491_v32 = vmax.f32 %v1372_v7, 0.0  ;;  %v1493_v47 = vmax.f32 %v1445_v28, 0.0 }
 0x30d   :  { %v1492_v44 = vmax.f32 %v1374_v16, 0.0  ;;  %v1494_v52 = vmax.f32 %v1447_v3, 0.0  ;;  %5259 = vmatmul.mubr.msk.bf16.gmra.mrb[40].mxu0 %vm864_vm0, %v6979_v51  ;;  %v5576_v16 = vld [vmem:[%s8411_s4 + $0x28] sm:$0xff]   ;;  %v5577_v3 = vld [vmem:[%s8411_s4 + $0x30] sm:$0xff]  }
 0x30e   :  { %v1521_v45 = vpack.c.bf16 %v1491_v32, %v1485_v63  ;;  %v1523_v59 = vpack.c.bf16 %v1493_v47, %v1487_v13  ;;  %1745 = vmatprep.mubr.bf16.mxu0 %v8526_v33  ;;  %v5578_v63 = vld [vmem:[%s8411_s4 + $0x38] sm:$0xff]  }
 0x30f   :  { %v1524_v2 = vpack.c.bf16 %v1494_v52, %v1488_v22  ;;  %v1377_v20 = vpop.f32.mrb[28].mxu0  ;;  %v1450_v9 = vpop.f32.mrb[60].mxu1  ;;  %v1522_v49 = vpack.c.bf16 %v1492_v44, %v1486_v31 }
 0x310   :  { %v1378_v23 = vadd.f32 %v1377_v20, %v6932_v38  ;;  %v1451_v46 = vadd.f32 %v1450_v9, %v6932_v38  ;;  %v1379_v40 = vpop.f32.mrb[29].mxu0  ;;  %v1452_v48 = vpop.f32.mrb[61].mxu1 }
 0x311   :  { %v1380_v25 = vadd.f32 %v1379_v40, %v6932_v38  ;;  %v1453_v62 = vadd.f32 %v1452_v48, %v6932_v38  ;;  %v1381_v43 = vpop.f32.mrb[30].mxu0  ;;  %v1454_v12 = vpop.f32.mrb[62].mxu1  ;;  %1800 = vmatprep.subr.bf16.mxu1 %v1522_v49  ;;  %1913 = vmatprep.subr.bf16.mxu0 %v1524_v2 }
 0x312   :  { %v1382_v36 = vadd.f32 %v1381_v43, %v6935_v54  ;;  %v1455_v5 = vadd.f32 %v1454_v12, %v6935_v54  ;;  %v1383_v15 = vpop.f32.mrb[31].mxu0  ;;  %v1456_v39 = vpop.f32.mrb[63].mxu1  ;;  %1801 = vmatpush1.bf16.msra.mxu1 %v1521_v45  ;;  %1914 = vmatpush1.bf16.msra.mxu0 %v1523_v59  ;;  %v1497_v11 = vmax.f32 %v1378_v23, 0.0  ;;  %v1499_v18 = vmax.f32 %v1451_v46, 0.0 }
 0x313   :  { %v1384_v17 = vadd.f32 %v1383_v15, %v6935_v54  ;;  %v1457_v38 = vadd.f32 %v1456_v39, %v6935_v54  ;;  %v1498_v58 = vmax.f32 %v1380_v25, 0.0  ;;  %v1500_v29 = vmax.f32 %v1453_v62, 0.0  ;;  %v5575_v54 = vld [vmem:[%s8411_s4 + $0x20] sm:$0xff]   ;;  %v79_v39 = vld [vmem:[%s8415_s8 + $0x98] sm:$0xff] }
 0x314   :  { %v1503_v50 = vmax.f32 %v1382_v36, 0.0  ;;  %v1505_v35 = vmax.f32 %v1455_v5, 0.0 }
 0x315   :  { %v1504_v26 = vmax.f32 %v1384_v17, 0.0  ;;  %v1506_v27 = vmax.f32 %v1457_v38, 0.0  ;;  %5260 = vmatmul.mubr.msk.bf16.gmra.mrb[44].mxu0 %vm864_vm0, %v5574_v19  ;;  %v78_v38 = vld [vmem:[%s8415_s8 + $0x90] sm:$0xff] }
 0x316   :  { %v1527_v7 = vpack.c.bf16 %v1503_v50, %v1497_v11  ;;  %v1529_v28 = vpack.c.bf16 %v1505_v35, %v1499_v18  ;;  %1755 = vmatprep.mubr.bf16.mxu0 %v8526_v33 }
 0x317   :  { %v1530_v24 = vpack.c.bf16 %v1506_v27, %v1500_v29  ;;  %v1528_v53 = vpack.c.bf16 %v1504_v26, %v1498_v58  ;;  %v81_v29 = vld [vmem:[%s8415_s8 + $0xa8] sm:$0xff] }
 0x319   :  { %1802 = vmatprep.subr.bf16.mxu1 %v1528_v53  ;;  %1915 = vmatprep.subr.bf16.mxu0 %v1530_v24 }
 0x31a   :  { %1803 = vmatpush1.bf16.msra.mxu1 %v1527_v7  ;;  %1916 = vmatpush1.bf16.msra.mxu0 %v1529_v28  ;;  %v80_v28 = vld [vmem:[%s8415_s8 + $0xa0] sm:$0xff] }
 0x31d   :  { %5261 = vmatmul.mubr.msk.bf16.gmra.mrb[48].mxu0 %vm864_vm0, %v5575_v54  ;;  %5265 = vmatmul.mubr.msk.bf16.vlgmr.msra.gmra.mrb[64].mxu1 %vm864_vm0, %v6947_v57 }
 0x31e   :  { %1765 = vmatprep.mubr.bf16.mxu0 %v8526_v33  ;;  %1838 = vmatprep.mubr.bf16.mxu1 %v8526_v33 }
 0x325   :  { %5262 = vmatmul.mubr.msk.bf16.gmra.mrb[52].mxu0 %vm864_vm0, %v5576_v16  ;;  %5266 = vmatmul.mubr.msk.bf16.gmra.mrb[68].mxu1 %vm864_vm0, %v6963_v6 }
 0x326   :  { %1775 = vmatprep.mubr.bf16.mxu0 %v8526_v33  ;;  %1848 = vmatprep.mubr.bf16.mxu1 %v8526_v33 }
 0x32d   :  { %5263 = vmatmul.mubr.msk.bf16.gmra.mrb[56].mxu0 %vm864_vm0, %v5577_v3  ;;  %5267 = vmatmul.mubr.msk.bf16.gmra.mrb[72].mxu1 %vm864_vm0, %v6979_v51 }
 0x32e   :  { %1785 = vmatprep.mubr.bf16.mxu0 %v8526_v33  ;;  %1858 = vmatprep.mubr.bf16.mxu1 %v8526_v33 }
 0x335   :  { %5264 = vmatmul.mubr.msk.bf16.gmra.mrb[60].mxu0 %vm864_vm0, %v5578_v63  ;;  %5268 = vmatmul.mubr.msk.bf16.gmra.mrb[76].mxu1 %vm864_vm0, %v5574_v19 }
 0x336   :  { %1868 = vmatprep.mubr.bf16.mxu1 %v8526_v33  ;;  %1941 = vmatprep.mubr.bf16.mxu0 %v8526_v33 }
 0x33d   :  { %5269 = vmatmul.mubr.msk.bf16.gmra.mrb[80].mxu1 %vm864_vm0, %v5575_v54  ;;  %5273 = vmatmul.mubr.msk.bf16.vlgmr.msra.gmra.mrb[64].mxu0 %vm864_vm0, %v6947_v57  ;;  %v5875_v57 = vmov 4  }
 0x33e   :  { %1878 = vmatprep.mubr.bf16.mxu1 %v8526_v33  ;;  %1951 = vmatprep.mubr.bf16.mxu0 %v8526_v33 }
 0x33f   :  { %5557 = vset.pattern.permute.xlu0 %v5875_v57  ;;  %5558 = vset.pattern.permute.xlu1 %v5875_v57 }
 0x340   :  { %2199 = vperm.xlu0 %5557, %v6815_v56   ;;  %2203 = vperm.xlu1 %5558, %v6821_v34  }
 0x344   :  { %2211 = vperm.xlu0 %5557, %v6839_v61   ;;  %2207 = vperm.xlu1 %5558, %v6827_v10  }
 0x345   :  { %5270 = vmatmul.mubr.msk.bf16.gmra.mrb[84].mxu1 %vm864_vm0, %v5576_v16  ;;  %5274 = vmatmul.mubr.msk.bf16.gmra.mrb[68].mxu0 %vm864_vm0, %v6963_v6  ;;  %v7065_v6 = vpop.permute.xlu1 %1548 }
 0x346   :  { %1888 = vmatprep.mubr.bf16.mxu1 %v8526_v33  ;;  %1961 = vmatprep.mubr.bf16.mxu0 %v8526_v33 }
 0x348   :  { %2219 = vperm.xlu0 %5557, %v6851_v55   ;;  %2215 = vperm.xlu1 %5558, %v6833_v14  }
 0x349   :  { %v7076_v55 = vpop.permute.xlu1 %1556 }
 0x34c   :  { %2227 = vperm.xlu0 %5557, %v6857_v1   ;;  %2223 = vperm.xlu1 %5558, %v6845_v42  }
 0x34d   :  { %5271 = vmatmul.mubr.msk.bf16.gmra.mrb[88].mxu1 %vm864_vm0, %v5577_v3  ;;  %5275 = vmatmul.mubr.msk.bf16.gmra.mrb[72].mxu0 %vm864_vm0, %v6979_v51  ;;  %v7069_v51 = vpop.permute.xlu0 %1552  ;;  %v7082_v59 = vpop.permute.xlu1 %1560 }
 0x34e   :  { %1898 = vmatprep.mubr.bf16.mxu1 %v8526_v33  ;;  %1971 = vmatprep.mubr.bf16.mxu0 %v8526_v33 }
 0x350   :  { %2235 = vperm.xlu0 %5557, %v6868_v60   ;;  %2231 = vperm.xlu1 %5558, %v6863_v41  }
 0x351   :  { %v7094_v25 = vpop.permute.xlu0 %1564  ;;  %v7100_v36 = vpop.permute.xlu1 %1568 }
 0x354   :  { %2243 = vperm.xlu0 %5557, %v6880_v30   ;;  %2239 = vperm.xlu1 %5558, %v6875_v8  }
 0x355   :  { %5272 = vmatmul.mubr.msk.bf16.gmra.mrb[92].mxu1 %vm864_vm0, %v5578_v63  ;;  %5276 = vmatmul.mubr.msk.bf16.gmra.mrb[76].mxu0 %vm864_vm0, %v5574_v19  ;;  %v7114_v26 = vpop.permute.xlu0 %1572  ;;  %v7119_v24 = vpop.permute.xlu1 %1576 }
 0x356   :  { %1981 = vmatprep.mubr.bf16.mxu0 %v8526_v33  ;;  %2470 = vmatprep.mubr.bf16.mxu1 %v8526_v33 }
 0x358   :  { %2251 = vperm.xlu0 %5557, %v6892_v4   ;;  %2247 = vperm.xlu1 %5558, %v6887_v21   ;;  %v77_v4 = vld [vmem:[%s8415_s8 + $0x88] sm:$0xff]  ;;  %v76_v21 = vld [vmem:[%s8415_s8 + $0x80] sm:$0xff] }
 0x35c   :  { %2259 = vperm.xlu0 %5557, %v6904_v0   ;;  %2255 = vperm.xlu1 %5558, %v6899_v37  }
 0x35d   :  { %5277 = vmatmul.mubr.msk.bf16.gmra.mrb[80].mxu0 %vm864_vm0, %v5575_v54 }
 0x35e   :  { %1991 = vmatprep.mubr.bf16.mxu0 %v8526_v33 }
 0x360   :  { %2269 = vperm.xlu0 %5557, %v77_v4   ;;  %2264 = vperm.xlu1 %5558, %v76_v21   ;;  %v87_v4 = vld [vmem:[%s8415_s8 + $0xd8] sm:$0xff]  ;;  %v86_v21 = vld [vmem:[%s8415_s8 + $0xd0] sm:$0xff] }
 0x364   :  { %2279 = vperm.xlu0 %5557, %v79_v39   ;;  %2274 = vperm.xlu1 %5558, %v78_v38  }
 0x365   :  { %5278 = vmatmul.mubr.msk.bf16.gmra.mrb[84].mxu0 %vm864_vm0, %v5576_v16 }
 0x366   :  { %2001 = vmatprep.mubr.bf16.mxu0 %v8526_v33 }
 0x368   :  { %2289 = vperm.xlu0 %5557, %v81_v29   ;;  %2284 = vperm.xlu1 %5558, %v80_v28  }
 0x36d   :  { %5279 = vmatmul.mubr.msk.bf16.gmra.mrb[88].mxu0 %vm864_vm0, %v5577_v3 }
 0x36e   :  { %2011 = vmatprep.mubr.bf16.mxu0 %v8526_v33 }
 0x375   :  { %5280 = vmatmul.mubr.msk.bf16.gmra.mrb[92].mxu0 %vm864_vm0, %v5578_v63 }
 0x376   :  { %2663 = vmatprep.mubr.bf16.mxu0 %v8526_v33 }
 0x3d0   :  { %v1717_v13 = vpop.f32.mrb[32].mxu0 }
 0x3d1   :  { %v1718_v56 = vadd.f32 %v1717_v13, %v7065_v6  ;;  %v1719_v34 = vpop.f32.mrb[33].mxu0  ;;  %v83_v13 = vld [vmem:[%s8415_s8 + $0xb8] sm:$0xff] }
 0x3d2   :  { %v1720_v61 = vadd.f32 %v1719_v34, %v7065_v6  ;;  %v1721_v32 = vpop.f32.mrb[34].mxu0  ;;  %v82_v34 = vld [vmem:[%s8415_s8 + $0xb0] sm:$0xff]  ;;  %2299 = vperm.xlu0 %5557, %v83_v13  }
 0x3d3   :  { %v1722_v10 = vadd.f32 %v1721_v32, %v7069_v51  ;;  %v1723_v14 = vpop.f32.mrb[35].mxu0  ;;  %v2022_v1 = vmax.f32 %v1718_v56, 0.0  ;;  %2294 = vperm.xlu1 %5558, %v82_v34  }
 0x3d4   :  { %v1724_v42 = vadd.f32 %v1723_v14, %v7069_v51  ;;  %v2023_v31 = vmax.f32 %v1720_v61, 0.0 }
 0x3d5   :  { %v2028_v47 = vmax.f32 %v1722_v10, 0.0 }
 0x3d6   :  { %v2029_v22 = vmax.f32 %v1724_v42, 0.0  ;;  %v7131_v42 = vpop.permute.xlu0 %1581 }
 0x3d7   :  { %v2118_v44 = vpack.c.bf16 %v2028_v47, %v2022_v1  ;;  %v7133_v1 = vpop.permute.xlu1 %1586 }
 0x3d8   :  { %v2119_v52 = vpack.c.bf16 %v2029_v22, %v2023_v31  ;;  %v1727_v60 = vpop.f32.mrb[36].mxu0  ;;  %v85_v31 = vld [vmem:[%s8415_s8 + $0xc8] sm:$0xff] }
 0x3d9   :  { %v1728_v41 = vadd.f32 %v1727_v60, %v7076_v55  ;;  %v1729_v45 = vpop.f32.mrb[37].mxu0  ;;  %v84_v60 = vld [vmem:[%s8415_s8 + $0xc0] sm:$0xff]  ;;  %2309 = vperm.xlu0 %5557, %v85_v31  }
 0x3da   :  { %v1730_v2 = vadd.f32 %v1729_v45, %v7076_v55  ;;  %v1731_v20 = vpop.f32.mrb[38].mxu0  ;;  %2438 = vmatprep.subr.bf16.mxu1 %v2119_v52  ;;  %2304 = vperm.xlu1 %5558, %v84_v60   ;;  %v7155_v38 = vpop.permute.xlu0 %1591  ;;  %v91_v60 = vld [vmem:[%s8415_s8 + $0xf8] sm:$0xff] }
 0x3db   :  { %v1732_v9 = vadd.f32 %v1731_v20, %v7082_v59  ;;  %v1733_v49 = vpop.f32.mrb[39].mxu0  ;;  %2439 = vmatpush1.bf16.msra.mxu1 %v2118_v44  ;;  %v2034_v30 = vmax.f32 %v1728_v41, 0.0 }
 0x3dc   :  { %v1734_v8 = vadd.f32 %v1733_v49, %v7082_v59  ;;  %v2035_v46 = vmax.f32 %v1730_v2, 0.0 }
 0x3dd   :  { %v2040_v23 = vmax.f32 %v1732_v9, 0.0  ;;  %2319 = vperm.xlu0 %5557, %v87_v4  }
 0x3de   :  { %v2041_v40 = vmax.f32 %v1734_v8, 0.0  ;;  %2314 = vperm.xlu1 %5558, %v86_v21  }
 0x3df   :  { %v2124_v48 = vpack.c.bf16 %v2040_v23, %v2034_v30 }
 0x3e0   :  { %v2125_v62 = vpack.c.bf16 %v2041_v40, %v2035_v46  ;;  %v1737_v43 = vpop.f32.mrb[40].mxu0 }
 0x3e1   :  { %v1738_v12 = vadd.f32 %v1737_v43, %v7094_v25  ;;  %v1739_v19 = vpop.f32.mrb[41].mxu0 }
 0x3e2   :  { %v1740_v0 = vadd.f32 %v1739_v19, %v7094_v25  ;;  %v1741_v37 = vpop.f32.mrb[42].mxu0  ;;  %2440 = vmatprep.subr.bf16.mxu1 %v2125_v62 }
 0x3e3   :  { %v1742_v5 = vadd.f32 %v1741_v37, %v7100_v36  ;;  %v1743_v15 = vpop.f32.mrb[43].mxu0  ;;  %2441 = vmatpush1.bf16.msra.mxu1 %v2124_v48  ;;  %v2046_v11 = vmax.f32 %v1738_v12, 0.0 }
 0x3e4   :  { %v1744_v17 = vadd.f32 %v1743_v15, %v7100_v36  ;;  %v2047_v50 = vmax.f32 %v1740_v0, 0.0 }
 0x3e5   :  { %v2052_v18 = vmax.f32 %v1742_v5, 0.0 }
 0x3e6   :  { %v2053_v35 = vmax.f32 %v1744_v17, 0.0 }
 0x3e7   :  { %v2130_v58 = vpack.c.bf16 %v2052_v18, %v2046_v11  ;;  %v7157_v11 = vpop.permute.xlu1 %1596 }
 0x3e8   :  { %v2131_v27 = vpack.c.bf16 %v2053_v35, %v2047_v50  ;;  %v1747_v7 = vpop.f32.mrb[44].mxu0 }
 0x3e9   :  { %v1748_v53 = vadd.f32 %v1747_v7, %v7114_v26  ;;  %v1749_v54 = vpop.f32.mrb[45].mxu0 }
 0x3ea   :  { %v1750_v16 = vadd.f32 %v1749_v54, %v7114_v26  ;;  %v1751_v3 = vpop.f32.mrb[46].mxu0  ;;  %2442 = vmatprep.subr.bf16.mxu1 %v2131_v27 }
 0x3eb   :  { %v1752_v63 = vadd.f32 %v1751_v3, %v7119_v24  ;;  %v1753_v57 = vpop.f32.mrb[47].mxu0  ;;  %2443 = vmatpush1.bf16.msra.mxu1 %v2130_v58  ;;  %v2058_v61 = vmax.f32 %v1748_v53, 0.0  ;;  %v88_v3 = vld [vmem:[%s8415_s8 + $0xe0] sm:$0xff] }
 0x3ec   :  { %v1754_v56 = vadd.f32 %v1753_v57, %v7119_v24  ;;  %v2059_v10 = vmax.f32 %v1750_v16, 0.0  ;;  %v89_v16 = vld [vmem:[%s8415_s8 + $0xe8] sm:$0xff]  ;;  %2324 = vperm.xlu1 %5558, %v88_v3  }
 0x3ed   :  { %v2064_v32 = vmax.f32 %v1752_v63, 0.0  ;;  %2329 = vperm.xlu0 %5557, %v89_v16  }
 0x3ee   :  { %v2065_v14 = vmax.f32 %v1754_v56, 0.0 }
 0x3ef   :  { %v2136_v47 = vpack.c.bf16 %v2064_v32, %v2058_v61 }
 0x3f0   :  { %v2137_v22 = vpack.c.bf16 %v2065_v14, %v2059_v10  ;;  %v1757_v44 = vpop.f32.mrb[48].mxu0  ;;  %v1830_v52 = vpop.f32.mrb[64].mxu1 }
 0x3f1   :  { %v1758_v41 = vadd.f32 %v1757_v44, %v7131_v42  ;;  %v1831_v45 = vadd.f32 %v1830_v52, %v7065_v6  ;;  %v1759_v2 = vpop.f32.mrb[49].mxu0  ;;  %v1832_v20 = vpop.f32.mrb[65].mxu1  ;;  %2339 = vperm.xlu0 %5557, %v91_v60  }
 0x3f2   :  { %v1760_v9 = vadd.f32 %v1759_v2, %v7131_v42  ;;  %v1833_v49 = vadd.f32 %v1832_v20, %v7065_v6  ;;  %v1761_v8 = vpop.f32.mrb[50].mxu0  ;;  %v1834_v30 = vpop.f32.mrb[66].mxu1  ;;  %2444 = vmatprep.subr.bf16.mxu1 %v2137_v22 }
 0x3f3   :  { %v1762_v23 = vadd.f32 %v1761_v8, %v7133_v1  ;;  %v1835_v46 = vadd.f32 %v1834_v30, %v7069_v51  ;;  %v1763_v40 = vpop.f32.mrb[51].mxu0  ;;  %v1836_v48 = vpop.f32.mrb[67].mxu1  ;;  %2445 = vmatpush1.bf16.msra.mxu1 %v2136_v47  ;;  %v2070_v12 = vmax.f32 %v1758_v41, 0.0  ;;  %v2024_v19 = vmax.f32 %v1831_v45, 0.0  ;;  %v90_v41 = vld [vmem:[%s8415_s8 + $0xf0] sm:$0xff] }
 0x3f4   :  { %v1764_v62 = vadd.f32 %v1763_v40, %v7133_v1  ;;  %v1837_v43 = vadd.f32 %v1836_v48, %v7069_v51  ;;  %v2071_v5 = vmax.f32 %v1760_v9, 0.0  ;;  %v2025_v15 = vmax.f32 %v1833_v49, 0.0  ;;  %v7179_v49 = vpop.permute.xlu0 %1601  ;;  %v7181_v8 = vpop.permute.xlu1 %1606  ;;  %2334 = vperm.xlu1 %5558, %v90_v41  }
 0x3f5   :  { %v2076_v0 = vmax.f32 %v1762_v23, 0.0  ;;  %v2030_v37 = vmax.f32 %v1835_v46, 0.0 }
 0x3f6   :  { %v2077_v39 = vmax.f32 %v1764_v62, 0.0  ;;  %v2031_v17 = vmax.f32 %v1837_v43, 0.0 }
 0x3f7   :  { %v2142_v18 = vpack.c.bf16 %v2076_v0, %v2070_v12  ;;  %v2120_v50 = vpack.c.bf16 %v2030_v37, %v2024_v19 }
 0x3f8   :  { %v2143_v35 = vpack.c.bf16 %v2077_v39, %v2071_v5  ;;  %v2121_v58 = vpack.c.bf16 %v2031_v17, %v2025_v15  ;;  %v1767_v29 = vpop.f32.mrb[52].mxu0  ;;  %v1840_v27 = vpop.f32.mrb[68].mxu1 }
 0x3f9   :  { %v1768_v7 = vadd.f32 %v1767_v29, %v7155_v38  ;;  %v1841_v28 = vadd.f32 %v1840_v27, %v7076_v55  ;;  %v1769_v53 = vpop.f32.mrb[53].mxu0  ;;  %v1842_v54 = vpop.f32.mrb[69].mxu1 }
 0x3fa   :  { %v1770_v63 = vadd.f32 %v1769_v53, %v7155_v38  ;;  %v1843_v57 = vadd.f32 %v1842_v54, %v7076_v55  ;;  %v1771_v13 = vpop.f32.mrb[54].mxu0  ;;  %v1844_v56 = vpop.f32.mrb[70].mxu1  ;;  %2446 = vmatprep.subr.bf16.mxu1 %v2143_v35  ;;  %2631 = vmatprep.subr.bf16.mxu0 %v2121_v58 }
 0x3fb   :  { %v1772_v34 = vadd.f32 %v1771_v13, %v7157_v11  ;;  %v1845_v61 = vadd.f32 %v1844_v56, %v7082_v59  ;;  %v1773_v32 = vpop.f32.mrb[55].mxu0  ;;  %v1846_v10 = vpop.f32.mrb[71].mxu1  ;;  %2447 = vmatpush1.bf16.msra.mxu1 %v2142_v18  ;;  %2632 = vmatpush1.bf16.msra.mxu0 %v2120_v50  ;;  %v2082_v31 = vmax.f32 %v1768_v7, 0.0  ;;  %v2036_v22 = vmax.f32 %v1841_v28, 0.0 }
 0x3fc   :  { %v1774_v14 = vadd.f32 %v1773_v32, %v7157_v11  ;;  %v1847_v47 = vadd.f32 %v1846_v10, %v7082_v59  ;;  %v2083_v45 = vmax.f32 %v1770_v63, 0.0  ;;  %v2037_v2 = vmax.f32 %v1843_v57, 0.0  ;;  %v7191_v3 = vpop.permute.xlu0 %1611  ;;  %v7193_v63 = vpop.permute.xlu1 %1616 }
 0x3fd   :  { %v2088_v44 = vmax.f32 %v1772_v34, 0.0  ;;  %v2042_v52 = vmax.f32 %v1845_v61, 0.0 }
 0x3fe   :  { %v2089_v20 = vmax.f32 %v1774_v14, 0.0  ;;  %v2043_v9 = vmax.f32 %v1847_v47, 0.0 }
 0x3ff   :  { %v2148_v30 = vpack.c.bf16 %v2088_v44, %v2082_v31  ;;  %v2126_v23 = vpack.c.bf16 %v2042_v52, %v2036_v22 }
 0x400   :  { %v2149_v46 = vpack.c.bf16 %v2089_v20, %v2083_v45  ;;  %v2127_v40 = vpack.c.bf16 %v2043_v9, %v2037_v2  ;;  %v1777_v48 = vpop.f32.mrb[56].mxu0  ;;  %v1850_v4 = vpop.f32.mrb[72].mxu1 }
 0x401   :  { %v1778_v62 = vadd.f32 %v1777_v48, %v7179_v49  ;;  %v1851_v43 = vadd.f32 %v1850_v4, %v7094_v25  ;;  %v1779_v21 = vpop.f32.mrb[57].mxu0  ;;  %v1852_v12 = vpop.f32.mrb[73].mxu1 }
 0x402   :  { %v1780_v19 = vadd.f32 %v1779_v21, %v7179_v49  ;;  %v1853_v0 = vadd.f32 %v1852_v12, %v7094_v25  ;;  %v1781_v37 = vpop.f32.mrb[58].mxu0  ;;  %v1854_v5 = vpop.f32.mrb[74].mxu1  ;;  %2448 = vmatprep.subr.bf16.mxu1 %v2149_v46  ;;  %2633 = vmatprep.subr.bf16.mxu0 %v2127_v40 }
 0x403   :  { %v1782_v15 = vadd.f32 %v1781_v37, %v7181_v8  ;;  %v1855_v39 = vadd.f32 %v1854_v5, %v7100_v36  ;;  %v1783_v17 = vpop.f32.mrb[59].mxu0  ;;  %v1856_v18 = vpop.f32.mrb[75].mxu1  ;;  %2449 = vmatpush1.bf16.msra.mxu1 %v2148_v30  ;;  %2634 = vmatpush1.bf16.msra.mxu0 %v2126_v23  ;;  %v2094_v58 = vmax.f32 %v1778_v62, 0.0  ;;  %v2048_v29 = vmax.f32 %v1851_v43, 0.0 }
 0x404   :  { %v1784_v50 = vadd.f32 %v1783_v17, %v7181_v8  ;;  %v1857_v35 = vadd.f32 %v1856_v18, %v7100_v36  ;;  %v2095_v28 = vmax.f32 %v1780_v19, 0.0  ;;  %v2049_v53 = vmax.f32 %v1853_v0, 0.0 }
 0x405   :  { %v2100_v27 = vmax.f32 %v1782_v15, 0.0  ;;  %v2054_v7 = vmax.f32 %v1855_v39, 0.0 }
 0x406   :  { %v2101_v54 = vmax.f32 %v1784_v50, 0.0  ;;  %v2055_v16 = vmax.f32 %v1857_v35, 0.0 }
 0x407   :  { %v2154_v57 = vpack.c.bf16 %v2100_v27, %v2094_v58  ;;  %v2132_v13 = vpack.c.bf16 %v2054_v7, %v2048_v29  ;;  %v7210_v7 = vld [vmem:[%s8412_s5] sm:$0xff]  }
 0x408   :  { %v2155_v56 = vpack.c.bf16 %v2101_v54, %v2095_v28  ;;  %v2133_v34 = vpack.c.bf16 %v2055_v16, %v2049_v53  ;;  %v1787_v61 = vpop.f32.mrb[60].mxu0  ;;  %v1860_v32 = vpop.f32.mrb[76].mxu1 }
 0x409   :  { %v1788_v10 = vadd.f32 %v1787_v61, %v7191_v3  ;;  %v1861_v14 = vadd.f32 %v1860_v32, %v7114_v26  ;;  %v1789_v47 = vpop.f32.mrb[61].mxu0  ;;  %v1862_v31 = vpop.f32.mrb[77].mxu1 }
 0x40a   :  { %v1790_v22 = vadd.f32 %v1789_v47, %v7191_v3  ;;  %v1863_v44 = vadd.f32 %v1862_v31, %v7114_v26  ;;  %v1791_v52 = vpop.f32.mrb[62].mxu0  ;;  %v1864_v60 = vpop.f32.mrb[78].mxu1  ;;  %2450 = vmatprep.subr.bf16.mxu1 %v2155_v56  ;;  %2635 = vmatprep.subr.bf16.mxu0 %v2133_v34 }
 0x40b   :  { %v1792_v41 = vadd.f32 %v1791_v52, %v7193_v63  ;;  %v1865_v45 = vadd.f32 %v1864_v60, %v7119_v24  ;;  %v1793_v2 = vpop.f32.mrb[63].mxu0  ;;  %v1866_v20 = vpop.f32.mrb[79].mxu1  ;;  %2451 = vmatpush1.bf16.msra.mxu1 %v2154_v57  ;;  %2636 = vmatpush1.bf16.msra.mxu0 %v2132_v13  ;;  %v2106_v23 = vmax.f32 %v1788_v10, 0.0  ;;  %v2060_v46 = vmax.f32 %v1861_v14, 0.0 }
 0x40c   :  { %v1794_v9 = vadd.f32 %v1793_v2, %v7193_v63  ;;  %v1867_v30 = vadd.f32 %v1866_v20, %v7119_v24  ;;  %v2107_v4 = vmax.f32 %v1790_v22, 0.0  ;;  %v2061_v62 = vmax.f32 %v1863_v44, 0.0 }
 0x40d   :  { %v2112_v40 = vmax.f32 %v1792_v41, 0.0  ;;  %v2066_v48 = vmax.f32 %v1865_v45, 0.0 }
 0x40e   :  { %v2113_v43 = vmax.f32 %v1794_v9, 0.0  ;;  %v2067_v21 = vmax.f32 %v1867_v30, 0.0 }
 0x40f   :  { %v2160_v12 = vpack.c.bf16 %v2112_v40, %v2106_v23  ;;  %v2138_v19 = vpack.c.bf16 %v2066_v48, %v2060_v46  ;;  %v7225_v40 = vld [vmem:[%s8412_s5 + $0x8] sm:$0xff]  }
 0x410   :  { %v2161_v0 = vpack.c.bf16 %v2113_v43, %v2107_v4  ;;  %v2139_v37 = vpack.c.bf16 %v2067_v21, %v2061_v62  ;;  %v1870_v5 = vpop.f32.mrb[80].mxu1  ;;  %v1943_v15 = vpop.f32.mrb[64].mxu0 }
 0x411   :  { %v1871_v39 = vadd.f32 %v1870_v5, %v7131_v42  ;;  %v1944_v17 = vadd.f32 %v1943_v15, %v7065_v6  ;;  %v1872_v18 = vpop.f32.mrb[81].mxu1  ;;  %v1945_v50 = vpop.f32.mrb[65].mxu0 }
 0x412   :  { %v1873_v35 = vadd.f32 %v1872_v18, %v7131_v42  ;;  %v1946_v58 = vadd.f32 %v1945_v50, %v7065_v6  ;;  %v1874_v29 = vpop.f32.mrb[82].mxu1  ;;  %v1947_v27 = vpop.f32.mrb[66].mxu0  ;;  %2452 = vmatprep.subr.bf16.mxu1 %v2161_v0  ;;  %2637 = vmatprep.subr.bf16.mxu0 %v2139_v37 }
 0x413   :  { %v1875_v28 = vadd.f32 %v1874_v29, %v7133_v1  ;;  %v1948_v53 = vadd.f32 %v1947_v27, %v7069_v51  ;;  %v1876_v54 = vpop.f32.mrb[83].mxu1  ;;  %v1949_v16 = vpop.f32.mrb[67].mxu0  ;;  %2453 = vmatpush1.bf16.msra.mxu1 %v2160_v12  ;;  %2638 = vmatpush1.bf16.msra.mxu0 %v2138_v19  ;;  %v2072_v13 = vmax.f32 %v1871_v39, 0.0  ;;  %v2026_v56 = vmax.f32 %v1944_v17, 0.0 }
 0x414   :  { %v1877_v57 = vadd.f32 %v1876_v54, %v7133_v1  ;;  %v1950_v6 = vadd.f32 %v1949_v16, %v7069_v51  ;;  %v2073_v32 = vmax.f32 %v1873_v35, 0.0  ;;  %v2027_v10 = vmax.f32 %v1946_v58, 0.0 }
 0x415   :  { %v2078_v34 = vmax.f32 %v1875_v28, 0.0  ;;  %v2032_v61 = vmax.f32 %v1948_v53, 0.0 }
 0x416   :  { %v2079_v14 = vmax.f32 %v1877_v57, 0.0  ;;  %v2033_v47 = vmax.f32 %v1950_v6, 0.0  ;;  %2471 = vmatmul.mubr.bf16.vlgmr.msra.gmra.mrb[96].mxu1 %v7210_v7 }
 0x417   :  { %v2144_v31 = vpack.c.bf16 %v2078_v34, %v2072_v13  ;;  %v2122_v22 = vpack.c.bf16 %v2032_v61, %v2026_v56  ;;  %2480 = vmatprep.mubr.bf16.mxu1 %v8526_v33  ;;  %v7240_v56 = vld [vmem:[%s8412_s5 + $0x10] sm:$0xff]  }
 0x418   :  { %v2145_v44 = vpack.c.bf16 %v2079_v14, %v2073_v32  ;;  %v2123_v52 = vpack.c.bf16 %v2033_v47, %v2027_v10  ;;  %v1880_v60 = vpop.f32.mrb[84].mxu1  ;;  %v1953_v41 = vpop.f32.mrb[68].mxu0 }
 0x419   :  { %v1881_v51 = vadd.f32 %v1880_v60, %v7155_v38  ;;  %v1954_v45 = vadd.f32 %v1953_v41, %v7076_v55  ;;  %v1882_v2 = vpop.f32.mrb[85].mxu1  ;;  %v1955_v20 = vpop.f32.mrb[69].mxu0 }
 0x41a   :  { %v1883_v9 = vadd.f32 %v1882_v2, %v7155_v38  ;;  %v1956_v30 = vadd.f32 %v1955_v20, %v7076_v55  ;;  %v1884_v23 = vpop.f32.mrb[86].mxu1  ;;  %v1957_v46 = vpop.f32.mrb[70].mxu0  ;;  %2639 = vmatprep.subr.bf16.mxu0 %v2145_v44  ;;  %2824 = vmatprep.subr.bf16.mxu1 %v2123_v52 }
 0x41b   :  { %v1885_v48 = vadd.f32 %v1884_v23, %v7157_v11  ;;  %v1958_v4 = vadd.f32 %v1957_v46, %v7082_v59  ;;  %v1886_v62 = vpop.f32.mrb[87].mxu1  ;;  %v1959_v43 = vpop.f32.mrb[71].mxu0  ;;  %2640 = vmatpush1.bf16.msra.mxu0 %v2144_v31  ;;  %2825 = vmatpush1.bf16.msra.mxu1 %v2122_v22  ;;  %v2084_v12 = vmax.f32 %v1881_v51, 0.0  ;;  %v2038_v19 = vmax.f32 %v1954_v45, 0.0 }
 0x41c   :  { %v1887_v21 = vadd.f32 %v1886_v62, %v7157_v11  ;;  %v1960_v55 = vadd.f32 %v1959_v43, %v7082_v59  ;;  %v2085_v5 = vmax.f32 %v1883_v9, 0.0  ;;  %v2039_v15 = vmax.f32 %v1956_v30, 0.0 }
 0x41d   :  { %v2090_v0 = vmax.f32 %v1885_v48, 0.0  ;;  %v2044_v37 = vmax.f32 %v1958_v4, 0.0 }
 0x41e   :  { %v2091_v39 = vmax.f32 %v1887_v21, 0.0  ;;  %v2045_v17 = vmax.f32 %v1960_v55, 0.0  ;;  %2481 = vmatmul.mubr.bf16.gmra.mrb[100].mxu1 %v7225_v40 }
 0x41f   :  { %v2150_v18 = vpack.c.bf16 %v2090_v0, %v2084_v12  ;;  %v2128_v50 = vpack.c.bf16 %v2044_v37, %v2038_v19  ;;  %2490 = vmatprep.mubr.bf16.mxu1 %v8526_v33  ;;  %v7255_v12 = vld [vmem:[%s8412_s5 + $0x18] sm:$0xff]  }
 0x420   :  { %v2151_v35 = vpack.c.bf16 %v2091_v39, %v2085_v5  ;;  %v2129_v58 = vpack.c.bf16 %v2045_v17, %v2039_v15  ;;  %v1890_v29 = vpop.f32.mrb[88].mxu1  ;;  %v1963_v27 = vpop.f32.mrb[72].mxu0 }
 0x421   :  { %v1891_v59 = vadd.f32 %v1890_v29, %v7179_v49  ;;  %v1964_v28 = vadd.f32 %v1963_v27, %v7094_v25  ;;  %v1892_v53 = vpop.f32.mrb[89].mxu1  ;;  %v1965_v54 = vpop.f32.mrb[73].mxu0 }
 0x422   :  { %v1893_v16 = vadd.f32 %v1892_v53, %v7179_v49  ;;  %v1966_v57 = vadd.f32 %v1965_v54, %v7094_v25  ;;  %v1894_v6 = vpop.f32.mrb[90].mxu1  ;;  %v1967_v13 = vpop.f32.mrb[74].mxu0  ;;  %2641 = vmatprep.subr.bf16.mxu0 %v2151_v35  ;;  %2826 = vmatprep.subr.bf16.mxu1 %v2129_v58 }
 0x423   :  { %v1895_v34 = vadd.f32 %v1894_v6, %v7181_v8  ;;  %v1968_v61 = vadd.f32 %v1967_v13, %v7100_v36  ;;  %v1896_v32 = vpop.f32.mrb[91].mxu1  ;;  %v1969_v10 = vpop.f32.mrb[75].mxu0  ;;  %2642 = vmatpush1.bf16.msra.mxu0 %v2150_v18  ;;  %2827 = vmatpush1.bf16.msra.mxu1 %v2128_v50  ;;  %v2096_v47 = vmax.f32 %v1891_v59, 0.0  ;;  %v2050_v31 = vmax.f32 %v1964_v28, 0.0 }
 0x424   :  { %v1897_v14 = vadd.f32 %v1896_v32, %v7181_v8  ;;  %v1970_v25 = vadd.f32 %v1969_v10, %v7100_v36  ;;  %v2097_v52 = vmax.f32 %v1893_v16, 0.0  ;;  %v2051_v60 = vmax.f32 %v1966_v57, 0.0 }
 0x425   :  { %v2102_v22 = vmax.f32 %v1895_v34, 0.0  ;;  %v2056_v44 = vmax.f32 %v1968_v61, 0.0  ;;  %v7268_v34 = vld [vmem:[%s8412_s5 + $0x20] sm:$0xff]  }
 0x426   :  { %v2103_v41 = vmax.f32 %v1897_v14, 0.0  ;;  %v2057_v51 = vmax.f32 %v1970_v25, 0.0  ;;  %2491 = vmatmul.mubr.bf16.gmra.mrb[104].mxu1 %v7240_v56 }
 0x427   :  { %v2156_v45 = vpack.c.bf16 %v2102_v22, %v2096_v47  ;;  %v2134_v2 = vpack.c.bf16 %v2056_v44, %v2050_v31  ;;  %2500 = vmatprep.mubr.bf16.mxu1 %v8526_v33 }
 0x428   :  { %v2157_v20 = vpack.c.bf16 %v2103_v41, %v2097_v52  ;;  %v2135_v9 = vpack.c.bf16 %v2057_v51, %v2051_v60  ;;  %v1900_v30 = vpop.f32.mrb[92].mxu1  ;;  %v1973_v23 = vpop.f32.mrb[76].mxu0  ;;  %v7282_v51 = vld [vmem:[%s8412_s5 + $0x28] sm:$0xff]  }
 0x429   :  { %v1901_v36 = vadd.f32 %v1900_v30, %v7191_v3  ;;  %v1974_v46 = vadd.f32 %v1973_v23, %v7114_v26  ;;  %v1902_v48 = vpop.f32.mrb[93].mxu1  ;;  %v1975_v4 = vpop.f32.mrb[77].mxu0 }
 0x42a   :  { %v1903_v62 = vadd.f32 %v1902_v48, %v7191_v3  ;;  %v1976_v43 = vadd.f32 %v1975_v4, %v7114_v26  ;;  %v1904_v21 = vpop.f32.mrb[94].mxu1  ;;  %v1977_v55 = vpop.f32.mrb[78].mxu0  ;;  %2643 = vmatprep.subr.bf16.mxu0 %v2157_v20  ;;  %2828 = vmatprep.subr.bf16.mxu1 %v2135_v9 }
 0x42b   :  { %v1905_v19 = vadd.f32 %v1904_v21, %v7193_v63  ;;  %v1978_v0 = vadd.f32 %v1977_v55, %v7119_v24  ;;  %v1906_v37 = vpop.f32.mrb[95].mxu1  ;;  %v1979_v5 = vpop.f32.mrb[79].mxu0  ;;  %2644 = vmatpush1.bf16.msra.mxu0 %v2156_v45  ;;  %2829 = vmatpush1.bf16.msra.mxu1 %v2134_v2  ;;  %v2108_v39 = vmax.f32 %v1901_v36, 0.0  ;;  %v2062_v17 = vmax.f32 %v1974_v46, 0.0  ;;  %v7295_v21 = vld [vmem:[%s8412_s5 + $0x30] sm:$0xff]  }
 0x42c   :  { %v1907_v15 = vadd.f32 %v1906_v37, %v7193_v63  ;;  %v1980_v26 = vadd.f32 %v1979_v5, %v7119_v24  ;;  %v2109_v35 = vmax.f32 %v1903_v62, 0.0  ;;  %v2063_v58 = vmax.f32 %v1976_v43, 0.0 }
 0x42d   :  { %v2114_v18 = vmax.f32 %v1905_v19, 0.0  ;;  %v2068_v50 = vmax.f32 %v1978_v0, 0.0 }
 0x42e   :  { %v2115_v29 = vmax.f32 %v1907_v15, 0.0  ;;  %v2069_v27 = vmax.f32 %v1980_v26, 0.0  ;;  %2501 = vmatmul.mubr.bf16.gmra.mrb[108].mxu1 %v7255_v12 }
 0x42f   :  { %v2162_v59 = vpack.c.bf16 %v2114_v18, %v2108_v39  ;;  %v2140_v28 = vpack.c.bf16 %v2068_v50, %v2062_v17  ;;  %2510 = vmatprep.mubr.bf16.mxu1 %v8526_v33 }
 0x430   :  { %v2163_v53 = vpack.c.bf16 %v2115_v29, %v2109_v35  ;;  %v2141_v54 = vpack.c.bf16 %v2069_v27, %v2063_v58  ;;  %v1983_v16 = vpop.f32.mrb[80].mxu0  ;;  %v7308_v58 = vld [vmem:[%s8412_s5 + $0x38] sm:$0xff]  }
 0x431   :  { %v1984_v57 = vadd.f32 %v1983_v16, %v7131_v42  ;;  %v1985_v24 = vpop.f32.mrb[81].mxu0 }
 0x432   :  { %v1986_v6 = vadd.f32 %v1985_v24, %v7131_v42  ;;  %v1987_v13 = vpop.f32.mrb[82].mxu0  ;;  %2645 = vmatprep.subr.bf16.mxu0 %v2163_v53  ;;  %2830 = vmatprep.subr.bf16.mxu1 %v2141_v54  ;;  %v7319_v24 = vld [vmem:[%s8412_s5 + $0x40] sm:$0xff]  }
 0x433   :  { %v1988_v61 = vadd.f32 %v1987_v13, %v7133_v1  ;;  %v1989_v32 = vpop.f32.mrb[83].mxu0  ;;  %2646 = vmatpush1.bf16.msra.mxu0 %v2162_v59  ;;  %2831 = vmatpush1.bf16.msra.mxu1 %v2140_v28  ;;  %v2074_v14 = vmax.f32 %v1984_v57, 0.0  ;;  %v7340_v13 = vld [vmem:[%s8412_s5 + $0x58] sm:$0xff]  }
 0x434   :  { %v1990_v10 = vadd.f32 %v1989_v32, %v7133_v1  ;;  %4348 = vmatprep.subr.bf16.mxu0 %v8526_v33  ;;  %v2075_v42 = vmax.f32 %v1986_v6, 0.0  ;;  %v5589_v6 = vld [vmem:[%s8412_s5 + $0x50] sm:$0xff]   ;;  %v7358_v32 = vld [vmem:[%s8412_s5 + $0x68] sm:$0xff]  }
 0x435   :  { %v2080_v25 = vmax.f32 %v1988_v61, 0.0  ;;  %v7349_v61 = vld [vmem:[%s8412_s5 + $0x60] sm:$0xff]  }
 0x436   :  { %v2081_v47 = vmax.f32 %v1990_v10, 0.0  ;;  %2511 = vmatmul.mubr.bf16.gmra.mrb[112].mxu1 %v7268_v34  ;;  %2664 = vmatmul.mubr.bf16.vlgmr.msra.gmra.mrb[96].mxu0 %v7210_v7  ;;  %v7366_v10 = vld [vmem:[%s8412_s5 + $0x70] sm:$0xff]  }
 0x437   :  { %v2146_v31 = vpack.c.bf16 %v2080_v25, %v2074_v14  ;;  %2520 = vmatprep.mubr.bf16.mxu1 %v8526_v33  ;;  %2673 = vmatprep.mubr.bf16.mxu0 %v8526_v33  ;;  %v7374_v14 = vld [vmem:[%s8412_s5 + $0x78] sm:$0xff]  }
 0x438   :  { %v2147_v22 = vpack.c.bf16 %v2081_v47, %v2075_v42  ;;  %v1993_v44 = vpop.f32.mrb[84].mxu0 }
 0x439   :  { %v1994_v52 = vadd.f32 %v1993_v44, %v7155_v38  ;;  %v1995_v1 = vpop.f32.mrb[85].mxu0 }
 0x43a   :  { %v1996_v60 = vadd.f32 %v1995_v1, %v7155_v38  ;;  %v1997_v41 = vpop.f32.mrb[86].mxu0  ;;  %2832 = vmatprep.subr.bf16.mxu1 %v2147_v22 }
 0x43b   :  { %v1998_v45 = vadd.f32 %v1997_v41, %v7157_v11  ;;  %v1999_v2 = vpop.f32.mrb[87].mxu0  ;;  %2833 = vmatpush1.bf16.msra.mxu1 %v2146_v31  ;;  %v2086_v9 = vmax.f32 %v1994_v52, 0.0 }
 0x43c   :  { %v2000_v20 = vadd.f32 %v1999_v2, %v7157_v11  ;;  %v2087_v23 = vmax.f32 %v1996_v60, 0.0 }
 0x43d   :  { %v2092_v30 = vmax.f32 %v1998_v45, 0.0 }
 0x43e   :  { %v2093_v36 = vmax.f32 %v2000_v20, 0.0  ;;  %2521 = vmatmul.mubr.bf16.gmra.mrb[116].mxu1 %v7282_v51  ;;  %2674 = vmatmul.mubr.bf16.gmra.mrb[100].mxu0 %v7225_v40 }
 0x43f   :  { %v2152_v38 = vpack.c.bf16 %v2092_v30, %v2086_v9  ;;  %2530 = vmatprep.mubr.bf16.mxu1 %v8526_v33  ;;  %2683 = vmatprep.mubr.bf16.mxu0 %v8526_v33 }
 0x440   :  { %v2153_v46 = vpack.c.bf16 %v2093_v36, %v2087_v23  ;;  %v2003_v48 = vpop.f32.mrb[88].mxu0 }
 0x441   :  { %v2004_v4 = vadd.f32 %v2003_v48, %v7179_v49  ;;  %v2005_v62 = vpop.f32.mrb[89].mxu0 }
 0x442   :  { %v2006_v11 = vadd.f32 %v2005_v62, %v7179_v49  ;;  %v2007_v43 = vpop.f32.mrb[90].mxu0  ;;  %2834 = vmatprep.subr.bf16.mxu1 %v2153_v46 }
 0x443   :  { %v2008_v55 = vadd.f32 %v2007_v43, %v7181_v8  ;;  %v2009_v19 = vpop.f32.mrb[91].mxu0  ;;  %2835 = vmatpush1.bf16.msra.mxu1 %v2152_v38  ;;  %v2098_v37 = vmax.f32 %v2004_v4, 0.0 }
 0x444   :  { %v2010_v0 = vadd.f32 %v2009_v19, %v7181_v8  ;;  %v2099_v15 = vmax.f32 %v2006_v11, 0.0 }
 0x445   :  { %v2104_v5 = vmax.f32 %v2008_v55, 0.0 }
 0x446   :  { %v2105_v26 = vmax.f32 %v2010_v0, 0.0  ;;  %2531 = vmatmul.mubr.bf16.gmra.mrb[120].mxu1 %v7295_v21  ;;  %2684 = vmatmul.mubr.bf16.gmra.mrb[104].mxu0 %v7240_v56 }
 0x447   :  { %v2158_v49 = vpack.c.bf16 %v2104_v5, %v2098_v37  ;;  %2540 = vmatprep.mubr.bf16.mxu1 %v8526_v33  ;;  %2693 = vmatprep.mubr.bf16.mxu0 %v8526_v33 }
 0x448   :  { %v2159_v39 = vpack.c.bf16 %v2105_v26, %v2099_v15  ;;  %v2013_v17 = vpop.f32.mrb[92].mxu0 }
 0x449   :  { %v2014_v18 = vadd.f32 %v2013_v17, %v7191_v3  ;;  %v2015_v50 = vpop.f32.mrb[93].mxu0 }
 0x44a   :  { %v2016_v8 = vadd.f32 %v2015_v50, %v7191_v3  ;;  %v2017_v35 = vpop.f32.mrb[94].mxu0  ;;  %2836 = vmatprep.subr.bf16.mxu1 %v2159_v39 }
 0x44b   :  { %v2018_v29 = vadd.f32 %v2017_v35, %v7193_v63  ;;  %v2019_v27 = vpop.f32.mrb[95].mxu0  ;;  %2837 = vmatpush1.bf16.msra.mxu1 %v2158_v49  ;;  %v2110_v28 = vmax.f32 %v2014_v18, 0.0 }
 0x44c   :  { %v2020_v59 = vadd.f32 %v2019_v27, %v7193_v63  ;;  %v2111_v54 = vmax.f32 %v2016_v8, 0.0  ;;  %v5588_v63 = vld [vmem:[%s8412_s5 + $0x48] sm:$0xff]  }
 0x44d   :  { %v2116_v53 = vmax.f32 %v2018_v29, 0.0 }
 0x44e   :  { %v2117_v16 = vmax.f32 %v2020_v59, 0.0  ;;  %2541 = vmatmul.mubr.bf16.gmra.mrb[124].mxu1 %v7308_v58  ;;  %2694 = vmatmul.mubr.bf16.gmra.mrb[108].mxu0 %v7255_v12 }
 0x44f   :  { %v2164_v3 = vpack.c.bf16 %v2116_v53, %v2110_v28  ;;  %2550 = vmatprep.mubr.bf16.mxu1 %v8526_v33  ;;  %2703 = vmatprep.mubr.bf16.mxu0 %v8526_v33 }
 0x450   :  { %v2165_v57 = vpack.c.bf16 %v2117_v16, %v2111_v54 }
 0x452   :  { %2838 = vmatprep.subr.bf16.mxu1 %v2165_v57 }
 0x453   :  { %2839 = vmatpush1.bf16.msra.mxu1 %v2164_v3  ;;  %v5876_v3 = vmov 0.0  }
 0x454   :  { %3209 = vst [vmem:[#allocation2] sm:$0xff] %v5876_v3  ;;  %3210 = vst [vmem:[#allocation2 + $0x8] sm:$0xff] %v5876_v3 }
 0x455   :  { %3211 = vst [vmem:[#allocation2 + $0x10] sm:$0xff] %v5876_v3  ;;  %3212 = vst [vmem:[#allocation2 + $0x18] sm:$0xff] %v5876_v3 }
 0x456   :  { %2551 = vmatmul.mubr.bf16.gmra.mrb[128].mxu1 %v7319_v24  ;;  %2704 = vmatmul.mubr.bf16.gmra.mrb[112].mxu0 %v7268_v34  ;;  %3213 = vst [vmem:[#allocation2 + $0x20] sm:$0xff] %v5876_v3  ;;  %3214 = vst [vmem:[#allocation2 + $0x28] sm:$0xff] %v5876_v3 }
 0x457   :  { %2560 = vmatprep.mubr.bf16.mxu1 %v8526_v33  ;;  %2713 = vmatprep.mubr.bf16.mxu0 %v8526_v33  ;;  %3215 = vst [vmem:[#allocation2 + $0x30] sm:$0xff] %v5876_v3  ;;  %3216 = vst [vmem:[#allocation2 + $0x38] sm:$0xff] %v5876_v3 }
 0x458   :  { %3217 = vst [vmem:[#allocation2 + $0x40] sm:$0xff] %v5876_v3  ;;  %3218 = vst [vmem:[#allocation2 + $0x48] sm:$0xff] %v5876_v3 }
 0x459   :  { %3219 = vst [vmem:[#allocation2 + $0x50] sm:$0xff] %v5876_v3  ;;  %3220 = vst [vmem:[#allocation2 + $0x58] sm:$0xff] %v5876_v3 }
 0x45a   :  { %3221 = vst [vmem:[#allocation2 + $0x60] sm:$0xff] %v5876_v3  ;;  %3222 = vst [vmem:[#allocation2 + $0x68] sm:$0xff] %v5876_v3 }
 0x45b   :  { %3223 = vst [vmem:[#allocation2 + $0x70] sm:$0xff] %v5876_v3  ;;  %3224 = vst [vmem:[#allocation2 + $0x78] sm:$0xff] %v5876_v3 }
 0x45c   :  { %3225 = vst [vmem:[#allocation2 + $0x80] sm:$0xff] %v5876_v3  ;;  %3226 = vst [vmem:[#allocation2 + $0x88] sm:$0xff] %v5876_v3 }
 0x45d   :  { %3227 = vst [vmem:[#allocation2 + $0x90] sm:$0xff] %v5876_v3  ;;  %3228 = vst [vmem:[#allocation2 + $0x98] sm:$0xff] %v5876_v3 }
 0x45e   :  { %2561 = vmatmul.mubr.bf16.gmra.mrb[132].mxu1 %v5588_v63  ;;  %2714 = vmatmul.mubr.bf16.gmra.mrb[116].mxu0 %v7282_v51  ;;  %3229 = vst [vmem:[#allocation2 + $0xa0] sm:$0xff] %v5876_v3  ;;  %3230 = vst [vmem:[#allocation2 + $0xa8] sm:$0xff] %v5876_v3 }
 0x45f   :  { %2570 = vmatprep.mubr.bf16.mxu1 %v8526_v33  ;;  %2723 = vmatprep.mubr.bf16.mxu0 %v8526_v33  ;;  %3231 = vst [vmem:[#allocation2 + $0xb0] sm:$0xff] %v5876_v3  ;;  %3232 = vst [vmem:[#allocation2 + $0xb8] sm:$0xff] %v5876_v3 }
 0x460   :  { %3233 = vst [vmem:[#allocation2 + $0xc0] sm:$0xff] %v5876_v3  ;;  %3234 = vst [vmem:[#allocation2 + $0xc8] sm:$0xff] %v5876_v3 }
 0x461   :  { %3235 = vst [vmem:[#allocation2 + $0xd0] sm:$0xff] %v5876_v3  ;;  %3236 = vst [vmem:[#allocation2 + $0xd8] sm:$0xff] %v5876_v3 }
 0x462   :  { %3237 = vst [vmem:[#allocation2 + $0xe0] sm:$0xff] %v5876_v3  ;;  %3238 = vst [vmem:[#allocation2 + $0xe8] sm:$0xff] %v5876_v3 }
 0x463   :  { %3239 = vst [vmem:[#allocation2 + $0xf0] sm:$0xff] %v5876_v3  ;;  %3240 = vst [vmem:[#allocation2 + $0xf8] sm:$0xff] %v5876_v3 }
 0x466   :  { %2571 = vmatmul.mubr.bf16.gmra.mrb[136].mxu1 %v5589_v6  ;;  %2724 = vmatmul.mubr.bf16.gmra.mrb[120].mxu0 %v7295_v21 }
 0x467   :  { %2580 = vmatprep.mubr.bf16.mxu1 %v8526_v33  ;;  %2733 = vmatprep.mubr.bf16.mxu0 %v8526_v33 }
 0x46e   :  { %2581 = vmatmul.mubr.bf16.gmra.mrb[140].mxu1 %v7340_v13  ;;  %2734 = vmatmul.mubr.bf16.gmra.mrb[124].mxu0 %v7308_v58 }
 0x46f   :  { %2590 = vmatprep.mubr.bf16.mxu1 %v8526_v33  ;;  %2743 = vmatprep.mubr.bf16.mxu0 %v8526_v33 }
 0x476   :  { %2591 = vmatmul.mubr.bf16.gmra.mrb[144].mxu1 %v7349_v61  ;;  %2744 = vmatmul.mubr.bf16.gmra.mrb[128].mxu0 %v7319_v24 }
 0x477   :  { %2600 = vmatprep.mubr.bf16.mxu1 %v8526_v33  ;;  %2753 = vmatprep.mubr.bf16.mxu0 %v8526_v33 }
 0x47e   :  { %2601 = vmatmul.mubr.bf16.gmra.mrb[148].mxu1 %v7358_v32  ;;  %2754 = vmatmul.mubr.bf16.gmra.mrb[132].mxu0 %v5588_v63 }
 0x47f   :  { %2610 = vmatprep.mubr.bf16.mxu1 %v8526_v33  ;;  %2763 = vmatprep.mubr.bf16.mxu0 %v8526_v33 }
 0x486   :  { %2611 = vmatmul.mubr.bf16.gmra.mrb[152].mxu1 %v7366_v10  ;;  %2764 = vmatmul.mubr.bf16.gmra.mrb[136].mxu0 %v5589_v6 }
 0x487   :  { %2620 = vmatprep.mubr.bf16.mxu1 %v8526_v33  ;;  %2773 = vmatprep.mubr.bf16.mxu0 %v8526_v33 }
 0x48e   :  { %2621 = vmatmul.mubr.bf16.gmra.mrb[156].mxu1 %v7374_v14  ;;  %2774 = vmatmul.mubr.bf16.gmra.mrb[140].mxu0 %v7340_v13 }
 0x48f   :  { %2783 = vmatprep.mubr.bf16.mxu0 %v8526_v33  ;;  %2856 = vmatprep.mubr.bf16.mxu1 %v8526_v33 }
 0x496   :  { %2784 = vmatmul.mubr.bf16.gmra.mrb[144].mxu0 %v7349_v61  ;;  %2857 = vmatmul.mubr.bf16.vlgmr.msra.gmra.mrb[160].mxu1 %v7210_v7  ;;  %v7406_v7 = vpop.permute.xlu0 %2199 }
 0x497   :  { %2793 = vmatprep.mubr.bf16.mxu0 %v8526_v33  ;;  %2866 = vmatprep.mubr.bf16.mxu1 %v8526_v33 }
 0x49a   :  { %v7420_v30 = vpop.permute.xlu0 %2211 }
 0x49e   :  { %2794 = vmatmul.mubr.bf16.gmra.mrb[148].mxu0 %v7358_v32  ;;  %2867 = vmatmul.mubr.bf16.gmra.mrb[164].mxu1 %v7225_v40  ;;  %v7409_v40 = vpop.permute.xlu1 %2203  ;;  %v7430_v15 = vpop.permute.xlu0 %2219 }
 0x49f   :  { %2803 = vmatprep.mubr.bf16.mxu0 %v8526_v33  ;;  %2876 = vmatprep.mubr.bf16.mxu1 %v8526_v33 }
 0x4a2   :  { %v7416_v60 = vpop.permute.xlu1 %2207  ;;  %v7439_v53 = vpop.permute.xlu0 %2227 }
 0x4a6   :  { %2804 = vmatmul.mubr.bf16.gmra.mrb[152].mxu0 %v7366_v10  ;;  %2877 = vmatmul.mubr.bf16.gmra.mrb[168].mxu1 %v7240_v56  ;;  %v7427_v55 = vpop.permute.xlu1 %2215 }
 0x4a7   :  { %2813 = vmatprep.mubr.bf16.mxu0 %v8526_v33  ;;  %2886 = vmatprep.mubr.bf16.mxu1 %v8526_v33 }
 0x4aa   :  { %v7437_v27 = vpop.permute.xlu1 %2223 }
 0x4ae   :  { %2814 = vmatmul.mubr.bf16.gmra.mrb[156].mxu0 %v7374_v14  ;;  %2887 = vmatmul.mubr.bf16.gmra.mrb[172].mxu1 %v7255_v12 }
 0x4af   :  { %2896 = vmatprep.mubr.bf16.mxu1 %v8526_v33 }
 0x4b6   :  { %2897 = vmatmul.mubr.bf16.gmra.mrb[176].mxu1 %v7268_v34 }
 0x4b7   :  { %2906 = vmatprep.mubr.bf16.mxu1 %v8526_v33 }
 0x4be   :  { %2907 = vmatmul.mubr.bf16.gmra.mrb[180].mxu1 %v7282_v51 }
 0x4bf   :  { %2916 = vmatprep.mubr.bf16.mxu1 %v8526_v33 }
 0x4c6   :  { %2917 = vmatmul.mubr.bf16.gmra.mrb[184].mxu1 %v7295_v21 }
 0x4c7   :  { %2926 = vmatprep.mubr.bf16.mxu1 %v8526_v33 }
 0x4ce   :  { %2927 = vmatmul.mubr.bf16.gmra.mrb[188].mxu1 %v7308_v58 }
 0x4cf   :  { %2936 = vmatprep.mubr.bf16.mxu1 %v8526_v33 }
 0x4d6   :  { %2937 = vmatmul.mubr.bf16.gmra.mrb[192].mxu1 %v7319_v24 }
 0x4d7   :  { %2946 = vmatprep.mubr.bf16.mxu1 %v8526_v33 }
 0x4de   :  { %2947 = vmatmul.mubr.bf16.gmra.mrb[196].mxu1 %v5588_v63 }
 0x4df   :  { %2956 = vmatprep.mubr.bf16.mxu1 %v8526_v33 }
 0x4e6   :  { %2957 = vmatmul.mubr.bf16.gmra.mrb[200].mxu1 %v5589_v6 }
 0x4e7   :  { %2966 = vmatprep.mubr.bf16.mxu1 %v8526_v33 }
 0x4e9   :  { %v2472_v56 = vpop.f32.mrb[96].mxu1 }
 0x4ea   :  { %v2473_v12 = vadd.f32 %v2472_v56, %v7406_v7  ;;  %v2474_v34 = vpop.f32.mrb[97].mxu1 }
 0x4eb   :  { %v2475_v25 = vadd.f32 %v2474_v34, %v7406_v7  ;;  %v2476_v42 = vpop.f32.mrb[98].mxu1 }
 0x4ec   :  { %v3017_v47 = vmax.f32 %v2473_v12, 0.0  ;;  %v2477_v31 = vadd.f32 %v2476_v42, %v7409_v40  ;;  %v2478_v22 = vpop.f32.mrb[99].mxu1  ;;  %v7449_v42 = vpop.permute.xlu1 %2231 }
 0x4ed   :  { %v3018_v44 = vmax.f32 %v2475_v25, 0.0  ;;  %v2479_v52 = vadd.f32 %v2478_v22, %v7409_v40  ;;  %v7447_v25 = vpop.permute.xlu0 %2235 }
 0x4ee   :  { %v3023_v1 = vmax.f32 %v2477_v31, 0.0  ;;  %2967 = vmatmul.mubr.bf16.gmra.mrb[204].mxu1 %v7340_v13 }
 0x4ef   :  { %v3241_v41 = vmax.f32 %v3017_v47, %v3018_v44  ;;  %v3024_v51 = vmax.f32 %v2479_v52, 0.0  ;;  %2976 = vmatprep.mubr.bf16.mxu1 %v8526_v33 }
 0x4f1   :  { %v2482_v45 = vpop.f32.mrb[100].mxu1  ;;  %3242 = vmax.xlane.f32.xlu1 %v3241_v41  ;;  %v3244_v2 = vmax.f32 %v3023_v1, %v3024_v51 }
 0x4f2   :  { %v2483_v20 = vadd.f32 %v2482_v45, %v7416_v60  ;;  %v2484_v9 = vpop.f32.mrb[101].mxu1 }
 0x4f3   :  { %v2485_v23 = vadd.f32 %v2484_v9, %v7416_v60  ;;  %v2486_v36 = vpop.f32.mrb[102].mxu1  ;;  %3245 = vmax.xlane.f32.xlu0 %v3244_v2 }
 0x4f4   :  { %v3029_v38 = vmax.f32 %v2483_v20, 0.0  ;;  %v2487_v46 = vadd.f32 %v2486_v36, %v7420_v30  ;;  %v2488_v48 = vpop.f32.mrb[103].mxu1 }
 0x4f5   :  { %v3030_v4 = vmax.f32 %v2485_v23, 0.0  ;;  %v2489_v62 = vadd.f32 %v2488_v48, %v7420_v30 }
 0x4f6   :  { %v3035_v11 = vmax.f32 %v2487_v46, 0.0  ;;  %2977 = vmatmul.mubr.bf16.gmra.mrb[208].mxu1 %v7349_v61 }
 0x4f7   :  { %v3036_v43 = vmax.f32 %v2489_v62, 0.0  ;;  %v3247_v21 = vmax.f32 %v3029_v38, %v3030_v4  ;;  %2986 = vmatprep.mubr.bf16.mxu1 %v8526_v33 }
 0x4f9   :  { %v3250_v19 = vmax.f32 %v3035_v11, %v3036_v43  ;;  %v2492_v0 = vpop.f32.mrb[104].mxu1  ;;  %3248 = vmax.xlane.f32.xlu0 %v3247_v21 }
 0x4fa   :  { %v2493_v37 = vadd.f32 %v2492_v0, %v7427_v55  ;;  %v2494_v5 = vpop.f32.mrb[105].mxu1 }
 0x4fb   :  { %v2495_v26 = vadd.f32 %v2494_v5, %v7427_v55  ;;  %v2496_v49 = vpop.f32.mrb[106].mxu1  ;;  %3251 = vmax.xlane.f32.xlu1 %v3250_v19 }
 0x4fc   :  { %v3041_v39 = vmax.f32 %v2493_v37, 0.0  ;;  %v2497_v17 = vadd.f32 %v2496_v49, %v7430_v15  ;;  %v2498_v18 = vpop.f32.mrb[107].mxu1  ;;  %v7462_v49 = vpop.permute.xlu1 %2239 }
 0x4fd   :  { %v3042_v50 = vmax.f32 %v2495_v26, 0.0  ;;  %v2499_v8 = vadd.f32 %v2498_v18, %v7430_v15  ;;  %v7460_v26 = vpop.permute.xlu0 %2243 }
 0x4fe   :  { %v3047_v35 = vmax.f32 %v2497_v17, 0.0  ;;  %2987 = vmatmul.mubr.bf16.gmra.mrb[212].mxu1 %v7358_v32 }
 0x4ff   :  { %v3048_v58 = vmax.f32 %v2499_v8, 0.0  ;;  %v3253_v29 = vmax.f32 %v3041_v39, %v3042_v50  ;;  %2996 = vmatprep.mubr.bf16.mxu1 %v8526_v33 }
 0x501   :  { %v3256_v59 = vmax.f32 %v3047_v35, %v3048_v58  ;;  %v2502_v28 = vpop.f32.mrb[108].mxu1  ;;  %3254 = vmax.xlane.f32.xlu0 %v3253_v29 }
 0x502   :  { %v2503_v54 = vadd.f32 %v2502_v28, %v7437_v27  ;;  %v2504_v16 = vpop.f32.mrb[109].mxu1 }
 0x503   :  { %v2505_v57 = vadd.f32 %v2504_v16, %v7437_v27  ;;  %v2506_v24 = vpop.f32.mrb[110].mxu1  ;;  %3257 = vmax.xlane.f32.xlu1 %v3256_v59 }
 0x504   :  { %v3053_v63 = vmax.f32 %v2503_v54, 0.0  ;;  %v2507_v6 = vadd.f32 %v2506_v24, %v7439_v53  ;;  %v2508_v13 = vpop.f32.mrb[111].mxu1 }
 0x505   :  { %v3054_v61 = vmax.f32 %v2505_v57, 0.0  ;;  %v2509_v32 = vadd.f32 %v2508_v13, %v7439_v53 }
 0x506   :  { %v3059_v56 = vmax.f32 %v2507_v6, 0.0  ;;  %2997 = vmatmul.mubr.bf16.gmra.mrb[216].mxu1 %v7366_v10 }
 0x507   :  { %v3060_v12 = vmax.f32 %v2509_v32, 0.0  ;;  %v3259_v34 = vmax.f32 %v3053_v63, %v3054_v61  ;;  %3006 = vmatprep.mubr.bf16.mxu1 %v8526_v33 }
 0x509   :  { %v3262_v47 = vmax.f32 %v3059_v56, %v3060_v12  ;;  %v2512_v31 = vpop.f32.mrb[112].mxu1  ;;  %v2665_v22 = vpop.f32.mrb[96].mxu0  ;;  %3260 = vmax.xlane.f32.xlu0 %v3259_v34 }
 0x50a   :  { %v2513_v44 = vadd.f32 %v2512_v31, %v7449_v42  ;;  %v2666_v52 = vadd.f32 %v2665_v22, %v7406_v7  ;;  %v2514_v1 = vpop.f32.mrb[113].mxu1  ;;  %v2667_v41 = vpop.f32.mrb[97].mxu0 }
 0x50b   :  { %v2515_v10 = vadd.f32 %v2514_v1, %v7449_v42  ;;  %v2668_v51 = vadd.f32 %v2667_v41, %v7406_v7  ;;  %v2516_v45 = vpop.f32.mrb[114].mxu1  ;;  %v2669_v2 = vpop.f32.mrb[98].mxu0  ;;  %3263 = vmax.xlane.f32.xlu1 %v3262_v47 }
 0x50c   :  { %v3065_v20 = vmax.f32 %v2513_v44, 0.0  ;;  %v3019_v9 = vmax.f32 %v2666_v52, 0.0  ;;  %v2517_v23 = vadd.f32 %v2516_v45, %v7447_v25  ;;  %v2670_v36 = vadd.f32 %v2669_v2, %v7409_v40  ;;  %v2518_v38 = vpop.f32.mrb[115].mxu1  ;;  %v2671_v46 = vpop.f32.mrb[99].mxu0 }
 0x50d   :  { %v3066_v48 = vmax.f32 %v2515_v10, 0.0  ;;  %v3020_v4 = vmax.f32 %v2668_v51, 0.0  ;;  %v2519_v62 = vadd.f32 %v2518_v38, %v7447_v25  ;;  %v2672_v11 = vadd.f32 %v2671_v46, %v7409_v40  ;;  %v7472_v52 = vpop.permute.xlu0 %2251  ;;  %v7474_v1 = vpop.permute.xlu1 %2247 }
 0x50e   :  { %v3071_v43 = vmax.f32 %v2517_v23, 0.0  ;;  %v3025_v21 = vmax.f32 %v2670_v36, 0.0  ;;  %3007 = vmatmul.mubr.bf16.gmra.mrb[220].mxu1 %v7374_v14 }
 0x50f   :  { %v3072_v19 = vmax.f32 %v2519_v62, 0.0  ;;  %v3026_v0 = vmax.f32 %v2672_v11, 0.0  ;;  %v3370_v37 = vmax.f32 %v3019_v9, %v3020_v4  ;;  %v3265_v5 = vmax.f32 %v3065_v20, %v3066_v48 }
 0x511   :  { %v3268_v39 = vmax.f32 %v3071_v43, %v3072_v19  ;;  %v3373_v17 = vmax.f32 %v3025_v21, %v3026_v0  ;;  %v2522_v18 = vpop.f32.mrb[116].mxu1  ;;  %v2675_v50 = vpop.f32.mrb[100].mxu0  ;;  %3371 = vmax.xlane.f32.xlu0 %v3370_v37 }
 0x512   :  { %v2523_v8 = vadd.f32 %v2522_v18, %v7462_v49  ;;  %v2676_v35 = vadd.f32 %v2675_v50, %v7416_v60  ;;  %v2524_v58 = vpop.f32.mrb[117].mxu1  ;;  %v2677_v29 = vpop.f32.mrb[101].mxu0 }
 0x513   :  { %v2525_v14 = vadd.f32 %v2524_v58, %v7462_v49  ;;  %v2678_v59 = vadd.f32 %v2677_v29, %v7416_v60  ;;  %v2526_v28 = vpop.f32.mrb[118].mxu1  ;;  %v2679_v54 = vpop.f32.mrb[102].mxu0  ;;  %3374 = vmax.xlane.f32.xlu1 %v3373_v17 }
 0x514   :  { %v3077_v16 = vmax.f32 %v2523_v8, 0.0  ;;  %v3031_v3 = vmax.f32 %v2676_v35, 0.0  ;;  %v2527_v57 = vadd.f32 %v2526_v28, %v7460_v26  ;;  %v2680_v24 = vadd.f32 %v2679_v54, %v7420_v30  ;;  %v2528_v63 = vpop.f32.mrb[119].mxu1  ;;  %v2681_v6 = vpop.f32.mrb[103].mxu0 }
 0x515   :  { %v3078_v13 = vmax.f32 %v2525_v14, 0.0  ;;  %v3032_v61 = vmax.f32 %v2678_v59, 0.0  ;;  %v2529_v32 = vadd.f32 %v2528_v63, %v7460_v26  ;;  %v2682_v56 = vadd.f32 %v2681_v6, %v7420_v30  ;;  %3266 = vmax.xlane.f32.xlu0 %v3265_v5  ;;  %v7484_v29 = vpop.permute.xlu0 %2259  ;;  %v7486_v14 = vpop.permute.xlu1 %2255 }
 0x516   :  { %v3083_v12 = vmax.f32 %v2527_v57, 0.0  ;;  %v3037_v34 = vmax.f32 %v2680_v24, 0.0 }
 0x517   :  { %v3271_v47 = vmax.f32 %v3077_v16, %v3078_v13  ;;  %v3084_v31 = vmax.f32 %v2529_v32, 0.0  ;;  %v3038_v22 = vmax.f32 %v2682_v56, 0.0  ;;  %3269 = vmax.xlane.f32.xlu1 %v3268_v39  ;;  %v3376_v44 = vmax.f32 %v3031_v3, %v3032_v61 }
 0x519   :  { %v3274_v41 = vmax.f32 %v3083_v12, %v3084_v31  ;;  %v3379_v10 = vmax.f32 %v3037_v34, %v3038_v22  ;;  %v2532_v51 = vpop.f32.mrb[120].mxu1  ;;  %v2685_v45 = vpop.f32.mrb[104].mxu0  ;;  %3377 = vmax.xlane.f32.xlu0 %v3376_v44 }
 0x51a   :  { %v2533_v2 = vadd.f32 %v2532_v51, %v7474_v1  ;;  %v2686_v20 = vadd.f32 %v2685_v45, %v7427_v55  ;;  %v2534_v9 = vpop.f32.mrb[121].mxu1  ;;  %v2687_v23 = vpop.f32.mrb[105].mxu0 }
 0x51b   :  { %v2535_v36 = vadd.f32 %v2534_v9, %v7474_v1  ;;  %v2688_v38 = vadd.f32 %v2687_v23, %v7427_v55  ;;  %v2536_v46 = vpop.f32.mrb[122].mxu1  ;;  %v2689_v48 = vpop.f32.mrb[106].mxu0  ;;  %3380 = vmax.xlane.f32.xlu1 %v3379_v10 }
 0x51c   :  { %v3089_v4 = vmax.f32 %v2533_v2, 0.0  ;;  %v3043_v62 = vmax.f32 %v2686_v20, 0.0  ;;  %v2537_v11 = vadd.f32 %v2536_v46, %v7472_v52  ;;  %v2690_v43 = vadd.f32 %v2689_v48, %v7430_v15  ;;  %v2538_v21 = vpop.f32.mrb[123].mxu1  ;;  %v2691_v19 = vpop.f32.mrb[107].mxu0 }
 0x51d   :  { %v3090_v0 = vmax.f32 %v2535_v36, 0.0  ;;  %v3044_v37 = vmax.f32 %v2688_v38, 0.0  ;;  %v2539_v5 = vadd.f32 %v2538_v21, %v7472_v52  ;;  %v2692_v39 = vadd.f32 %v2691_v19, %v7430_v15  ;;  %3272 = vmax.xlane.f32.xlu0 %v3271_v47  ;;  %v7496_v38 = vpop.permute.xlu0 %2269  ;;  %v7498_v46 = vpop.permute.xlu1 %2264 }
 0x51e   :  { %v3095_v17 = vmax.f32 %v2537_v11, 0.0  ;;  %v3049_v18 = vmax.f32 %v2690_v43, 0.0 }
 0x51f   :  { %v3277_v50 = vmax.f32 %v3089_v4, %v3090_v0  ;;  %v3382_v8 = vmax.f32 %v3043_v62, %v3044_v37  ;;  %v3096_v35 = vmax.f32 %v2539_v5, 0.0  ;;  %v3050_v58 = vmax.f32 %v2692_v39, 0.0  ;;  %3275 = vmax.xlane.f32.xlu1 %v3274_v41 }
 0x521   :  { %v3280_v59 = vmax.f32 %v3095_v17, %v3096_v35  ;;  %v3385_v28 = vmax.f32 %v3049_v18, %v3050_v58  ;;  %v2542_v54 = vpop.f32.mrb[124].mxu1  ;;  %v2695_v16 = vpop.f32.mrb[108].mxu0  ;;  %3383 = vmax.xlane.f32.xlu0 %v3382_v8 }
 0x522   :  { %v2543_v3 = vadd.f32 %v2542_v54, %v7486_v14  ;;  %v2696_v57 = vadd.f32 %v2695_v16, %v7437_v27  ;;  %v2544_v24 = vpop.f32.mrb[125].mxu1  ;;  %v2697_v63 = vpop.f32.mrb[109].mxu0 }
 0x523   :  { %v2545_v6 = vadd.f32 %v2544_v24, %v7486_v14  ;;  %v2698_v13 = vadd.f32 %v2697_v63, %v7437_v27  ;;  %v2546_v61 = vpop.f32.mrb[126].mxu1  ;;  %v2699_v32 = vpop.f32.mrb[110].mxu0  ;;  %3386 = vmax.xlane.f32.xlu1 %v3385_v28 }
 0x524   :  { %v3101_v56 = vmax.f32 %v2543_v3, 0.0  ;;  %v3055_v12 = vmax.f32 %v2696_v57, 0.0  ;;  %v2547_v34 = vadd.f32 %v2546_v61, %v7484_v29  ;;  %v2700_v47 = vadd.f32 %v2699_v32, %v7439_v53  ;;  %v2548_v31 = vpop.f32.mrb[127].mxu1  ;;  %v2701_v22 = vpop.f32.mrb[111].mxu0 }
 0x525   :  { %v3102_v44 = vmax.f32 %v2545_v6, 0.0  ;;  %v3056_v41 = vmax.f32 %v2698_v13, 0.0  ;;  %v2549_v10 = vadd.f32 %v2548_v31, %v7484_v29  ;;  %v2702_v51 = vadd.f32 %v2701_v22, %v7439_v53  ;;  %3278 = vmax.xlane.f32.xlu0 %v3277_v50  ;;  %v7508_v32 = vpop.permute.xlu0 %2279 }
 0x526   :  { %v3107_v45 = vmax.f32 %v2547_v34, 0.0  ;;  %v3061_v2 = vmax.f32 %v2700_v47, 0.0 }
 0x527   :  { %v3283_v20 = vmax.f32 %v3101_v56, %v3102_v44  ;;  %v3388_v9 = vmax.f32 %v3055_v12, %v3056_v41  ;;  %v3108_v23 = vmax.f32 %v2549_v10, 0.0  ;;  %v3062_v36 = vmax.f32 %v2702_v51, 0.0  ;;  %3281 = vmax.xlane.f32.xlu1 %v3280_v59  ;;  %v7510_v56 = vpop.permute.xlu1 %2274 }
 0x529   :  { %v3286_v48 = vmax.f32 %v3107_v45, %v3108_v23  ;;  %v3391_v4 = vmax.f32 %v3061_v2, %v3062_v36  ;;  %v2552_v62 = vpop.f32.mrb[128].mxu1  ;;  %v2705_v11 = vpop.f32.mrb[112].mxu0  ;;  %3389 = vmax.xlane.f32.xlu0 %v3388_v9 }
 0x52a   :  { %v2553_v43 = vadd.f32 %v2552_v62, %v7498_v46  ;;  %v2706_v21 = vadd.f32 %v2705_v11, %v7449_v42  ;;  %v2554_v19 = vpop.f32.mrb[129].mxu1  ;;  %v2707_v0 = vpop.f32.mrb[113].mxu0 }
 0x52b   :  { %v2555_v37 = vadd.f32 %v2554_v19, %v7498_v46  ;;  %v2708_v5 = vadd.f32 %v2707_v0, %v7449_v42  ;;  %v2556_v39 = vpop.f32.mrb[130].mxu1  ;;  %v2709_v17 = vpop.f32.mrb[114].mxu0  ;;  %3392 = vmax.xlane.f32.xlu1 %v3391_v4 }
 0x52c   :  { %v3113_v18 = vmax.f32 %v2553_v43, 0.0  ;;  %v3067_v50 = vmax.f32 %v2706_v21, 0.0  ;;  %v2557_v8 = vadd.f32 %v2556_v39, %v7496_v38  ;;  %v2710_v35 = vadd.f32 %v2709_v17, %v7447_v25  ;;  %v2558_v58 = vpop.f32.mrb[131].mxu1  ;;  %v2711_v59 = vpop.f32.mrb[115].mxu0 }
 0x52d   :  { %v3114_v28 = vmax.f32 %v2555_v37, 0.0  ;;  %v3068_v54 = vmax.f32 %v2708_v5, 0.0  ;;  %v2559_v16 = vadd.f32 %v2558_v58, %v7496_v38  ;;  %v2712_v3 = vadd.f32 %v2711_v59, %v7447_v25  ;;  %3284 = vmax.xlane.f32.xlu0 %v3283_v20 }
 0x52e   :  { %v3119_v57 = vmax.f32 %v2557_v8, 0.0  ;;  %v3073_v24 = vmax.f32 %v2710_v35, 0.0  ;;  %v7522_v8 = vpop.permute.xlu1 %2284 }
 0x52f   :  { %v3289_v63 = vmax.f32 %v3113_v18, %v3114_v28  ;;  %v3394_v6 = vmax.f32 %v3067_v50, %v3068_v54  ;;  %v3120_v13 = vmax.f32 %v2559_v16, 0.0  ;;  %v3074_v61 = vmax.f32 %v2712_v3, 0.0  ;;  %3287 = vmax.xlane.f32.xlu1 %v3286_v48  ;;  %v7520_v50 = vpop.permute.xlu0 %2289 }
 0x531   :  { %v3292_v12 = vmax.f32 %v3119_v57, %v3120_v13  ;;  %v3397_v34 = vmax.f32 %v3073_v24, %v3074_v61  ;;  %v2562_v47 = vpop.f32.mrb[132].mxu1  ;;  %v2715_v31 = vpop.f32.mrb[116].mxu0  ;;  %3395 = vmax.xlane.f32.xlu0 %v3394_v6 }
 0x532   :  { %v2563_v22 = vadd.f32 %v2562_v47, %v7510_v56  ;;  %v2716_v44 = vadd.f32 %v2715_v31, %v7462_v49  ;;  %v2564_v41 = vpop.f32.mrb[133].mxu1  ;;  %v2717_v10 = vpop.f32.mrb[117].mxu0 }
 0x533   :  { %v2565_v51 = vadd.f32 %v2564_v41, %v7510_v56  ;;  %v2718_v45 = vadd.f32 %v2717_v10, %v7462_v49  ;;  %v2566_v2 = vpop.f32.mrb[134].mxu1  ;;  %v2719_v20 = vpop.f32.mrb[118].mxu0  ;;  %3398 = vmax.xlane.f32.xlu1 %v3397_v34 }
 0x534   :  { %v3125_v9 = vmax.f32 %v2563_v22, 0.0  ;;  %v3079_v23 = vmax.f32 %v2716_v44, 0.0  ;;  %v2567_v36 = vadd.f32 %v2566_v2, %v7508_v32  ;;  %v2720_v48 = vadd.f32 %v2719_v20, %v7460_v26  ;;  %v2568_v4 = vpop.f32.mrb[135].mxu1  ;;  %v2721_v62 = vpop.f32.mrb[119].mxu0 }
 0x535   :  { %v3126_v11 = vmax.f32 %v2565_v51, 0.0  ;;  %v3080_v43 = vmax.f32 %v2718_v45, 0.0  ;;  %v2569_v21 = vadd.f32 %v2568_v4, %v7508_v32  ;;  %v2722_v19 = vadd.f32 %v2721_v62, %v7460_v26  ;;  %3290 = vmax.xlane.f32.xlu0 %v3289_v63  ;;  %v7534_v4 = vpop.permute.xlu1 %2294 }
 0x536   :  { %v3131_v0 = vmax.f32 %v2567_v36, 0.0  ;;  %v3085_v37 = vmax.f32 %v2720_v48, 0.0  ;;  %v7532_v48 = vpop.permute.xlu0 %2299 }
 0x537   :  { %v3295_v5 = vmax.f32 %v3125_v9, %v3126_v11  ;;  %v3400_v39 = vmax.f32 %v3079_v23, %v3080_v43  ;;  %v3132_v17 = vmax.f32 %v2569_v21, 0.0  ;;  %v3086_v18 = vmax.f32 %v2722_v19, 0.0  ;;  %3293 = vmax.xlane.f32.xlu1 %v3292_v12 }
 0x539   :  { %v3298_v35 = vmax.f32 %v3131_v0, %v3132_v17  ;;  %v3403_v58 = vmax.f32 %v3085_v37, %v3086_v18  ;;  %v2572_v59 = vpop.f32.mrb[136].mxu1  ;;  %v2725_v28 = vpop.f32.mrb[120].mxu0  ;;  %3401 = vmax.xlane.f32.xlu0 %v3400_v39 }
 0x53a   :  { %v2573_v54 = vadd.f32 %v2572_v59, %v7522_v8  ;;  %v2726_v16 = vadd.f32 %v2725_v28, %v7474_v1  ;;  %v2574_v3 = vpop.f32.mrb[137].mxu1  ;;  %v2727_v57 = vpop.f32.mrb[121].mxu0 }
 0x53b   :  { %v2575_v24 = vadd.f32 %v2574_v3, %v7522_v8  ;;  %v2728_v63 = vadd.f32 %v2727_v57, %v7474_v1  ;;  %v2576_v6 = vpop.f32.mrb[138].mxu1  ;;  %v2729_v13 = vpop.f32.mrb[122].mxu0  ;;  %3404 = vmax.xlane.f32.xlu1 %v3403_v58 }
 0x53c   :  { %v3137_v61 = vmax.f32 %v2573_v54, 0.0  ;;  %v3091_v12 = vmax.f32 %v2726_v16, 0.0  ;;  %v2577_v34 = vadd.f32 %v2576_v6, %v7520_v50  ;;  %v2730_v47 = vadd.f32 %v2729_v13, %v7472_v52  ;;  %v2578_v31 = vpop.f32.mrb[139].mxu1  ;;  %v2731_v22 = vpop.f32.mrb[123].mxu0 }
 0x53d   :  { %v3138_v44 = vmax.f32 %v2575_v24, 0.0  ;;  %v3092_v41 = vmax.f32 %v2728_v63, 0.0  ;;  %v2579_v10 = vadd.f32 %v2578_v31, %v7520_v50  ;;  %v2732_v51 = vadd.f32 %v2731_v22, %v7472_v52  ;;  %3296 = vmax.xlane.f32.xlu0 %v3295_v5  ;;  %v7544_v22 = vpop.permute.xlu0 %2309 }
 0x53e   :  { %v3143_v45 = vmax.f32 %v2577_v34, 0.0  ;;  %v3097_v2 = vmax.f32 %v2730_v47, 0.0 }
 0x53f   :  { %v3301_v20 = vmax.f32 %v3137_v61, %v3138_v44  ;;  %v3406_v9 = vmax.f32 %v3091_v12, %v3092_v41  ;;  %v3144_v23 = vmax.f32 %v2579_v10, 0.0  ;;  %v3098_v36 = vmax.f32 %v2732_v51, 0.0  ;;  %3299 = vmax.xlane.f32.xlu1 %v3298_v35  ;;  %v7546_v44 = vpop.permute.xlu1 %2304 }
 0x541   :  { %v3304_v62 = vmax.f32 %v3143_v45, %v3144_v23  ;;  %v3409_v11 = vmax.f32 %v3097_v2, %v3098_v36  ;;  %v2582_v43 = vpop.f32.mrb[140].mxu1  ;;  %v2735_v21 = vpop.f32.mrb[124].mxu0  ;;  %3407 = vmax.xlane.f32.xlu0 %v3406_v9 }
 0x542   :  { %v2583_v19 = vadd.f32 %v2582_v43, %v7534_v4  ;;  %v2736_v0 = vadd.f32 %v2735_v21, %v7486_v14  ;;  %v2584_v37 = vpop.f32.mrb[141].mxu1  ;;  %v2737_v5 = vpop.f32.mrb[125].mxu0 }
 0x543   :  { %v2585_v39 = vadd.f32 %v2584_v37, %v7534_v4  ;;  %v2738_v17 = vadd.f32 %v2737_v5, %v7486_v14  ;;  %v2586_v18 = vpop.f32.mrb[142].mxu1  ;;  %v2739_v35 = vpop.f32.mrb[126].mxu0  ;;  %3410 = vmax.xlane.f32.xlu1 %v3409_v11 }
 0x544   :  { %v3149_v58 = vmax.f32 %v2583_v19, 0.0  ;;  %v3103_v59 = vmax.f32 %v2736_v0, 0.0  ;;  %v2587_v28 = vadd.f32 %v2586_v18, %v7532_v48  ;;  %v2740_v54 = vadd.f32 %v2739_v35, %v7484_v29  ;;  %v2588_v16 = vpop.f32.mrb[143].mxu1  ;;  %v2741_v3 = vpop.f32.mrb[127].mxu0 }
 0x545   :  { %v3150_v57 = vmax.f32 %v2585_v39, 0.0  ;;  %v3104_v24 = vmax.f32 %v2738_v17, 0.0  ;;  %v2589_v63 = vadd.f32 %v2588_v16, %v7532_v48  ;;  %v2742_v6 = vadd.f32 %v2741_v3, %v7484_v29  ;;  %3302 = vmax.xlane.f32.xlu0 %v3301_v20 }
 0x546   :  { %v3155_v13 = vmax.f32 %v2587_v28, 0.0  ;;  %v3109_v61 = vmax.f32 %v2740_v54, 0.0 }
 0x547   :  { %v3307_v12 = vmax.f32 %v3149_v58, %v3150_v57  ;;  %v3412_v34 = vmax.f32 %v3103_v59, %v3104_v24  ;;  %v3156_v47 = vmax.f32 %v2589_v63, 0.0  ;;  %v3110_v31 = vmax.f32 %v2742_v6, 0.0  ;;  %3305 = vmax.xlane.f32.xlu1 %v3304_v62  ;;  %v7556_v24 = vpop.permute.xlu0 %2319  ;;  %v7558_v63 = vpop.permute.xlu1 %2314 }
 0x549   :  { %v3310_v41 = vmax.f32 %v3155_v13, %v3156_v47  ;;  %v3415_v10 = vmax.f32 %v3109_v61, %v3110_v31  ;;  %v2592_v51 = vpop.f32.mrb[144].mxu1  ;;  %v2745_v45 = vpop.f32.mrb[128].mxu0  ;;  %3413 = vmax.xlane.f32.xlu0 %v3412_v34 }
 0x54a   :  { %v2593_v2 = vadd.f32 %v2592_v51, %v7546_v44  ;;  %v2746_v20 = vadd.f32 %v2745_v45, %v7498_v46  ;;  %v2594_v9 = vpop.f32.mrb[145].mxu1  ;;  %v2747_v23 = vpop.f32.mrb[129].mxu0 }
 0x54b   :  { %v2595_v36 = vadd.f32 %v2594_v9, %v7546_v44  ;;  %v2748_v11 = vadd.f32 %v2747_v23, %v7498_v46  ;;  %v2596_v62 = vpop.f32.mrb[146].mxu1  ;;  %v2749_v43 = vpop.f32.mrb[130].mxu0  ;;  %3416 = vmax.xlane.f32.xlu1 %v3415_v10 }
 0x54c   :  { %v3161_v21 = vmax.f32 %v2593_v2, 0.0  ;;  %v3115_v19 = vmax.f32 %v2746_v20, 0.0  ;;  %v2597_v0 = vadd.f32 %v2596_v62, %v7544_v22  ;;  %v2750_v37 = vadd.f32 %v2749_v43, %v7496_v38  ;;  %v2598_v5 = vpop.f32.mrb[147].mxu1  ;;  %v2751_v39 = vpop.f32.mrb[131].mxu0 }
 0x54d   :  { %v3162_v17 = vmax.f32 %v2595_v36, 0.0  ;;  %v3116_v18 = vmax.f32 %v2748_v11, 0.0  ;;  %v2599_v35 = vadd.f32 %v2598_v5, %v7544_v22  ;;  %v2752_v58 = vadd.f32 %v2751_v39, %v7496_v38  ;;  %3308 = vmax.xlane.f32.xlu0 %v3307_v12 }
 0x54e   :  { %v3167_v59 = vmax.f32 %v2597_v0, 0.0  ;;  %v3121_v28 = vmax.f32 %v2750_v37, 0.0 }
 0x54f   :  { %v3313_v54 = vmax.f32 %v3161_v21, %v3162_v17  ;;  %v3418_v16 = vmax.f32 %v3115_v19, %v3116_v18  ;;  %v3168_v3 = vmax.f32 %v2599_v35, 0.0  ;;  %v3122_v57 = vmax.f32 %v2752_v58, 0.0  ;;  %3311 = vmax.xlane.f32.xlu1 %v3310_v41  ;;  %v7568_v58 = vpop.permute.xlu0 %2329 }
 0x551   :  { %v3316_v6 = vmax.f32 %v3167_v59, %v3168_v3  ;;  %v3421_v13 = vmax.f32 %v3121_v28, %v3122_v57  ;;  %v2602_v61 = vpop.f32.mrb[148].mxu1  ;;  %v2755_v34 = vpop.f32.mrb[132].mxu0  ;;  %3419 = vmax.xlane.f32.xlu0 %v3418_v16 }
 0x552   :  { %v2603_v47 = vadd.f32 %v2602_v61, %v7558_v63  ;;  %v2756_v12 = vadd.f32 %v2755_v34, %v7510_v56  ;;  %v2604_v31 = vpop.f32.mrb[149].mxu1  ;;  %v2757_v10 = vpop.f32.mrb[133].mxu0 }
 0x553   :  { %v2605_v51 = vadd.f32 %v2604_v31, %v7558_v63  ;;  %v2758_v45 = vadd.f32 %v2757_v10, %v7510_v56  ;;  %v2606_v41 = vpop.f32.mrb[150].mxu1  ;;  %v2759_v2 = vpop.f32.mrb[134].mxu0  ;;  %3422 = vmax.xlane.f32.xlu1 %v3421_v13 }
 0x554   :  { %v3173_v20 = vmax.f32 %v2603_v47, 0.0  ;;  %v3127_v9 = vmax.f32 %v2756_v12, 0.0  ;;  %v2607_v23 = vadd.f32 %v2606_v41, %v7556_v24  ;;  %v2760_v36 = vadd.f32 %v2759_v2, %v7508_v32  ;;  %v2608_v11 = vpop.f32.mrb[151].mxu1  ;;  %v2761_v62 = vpop.f32.mrb[135].mxu0 }
 0x555   :  { %v3174_v43 = vmax.f32 %v2605_v51, 0.0  ;;  %v3128_v21 = vmax.f32 %v2758_v45, 0.0  ;;  %v2609_v19 = vadd.f32 %v2608_v11, %v7556_v24  ;;  %v2762_v0 = vadd.f32 %v2761_v62, %v7508_v32  ;;  %3314 = vmax.xlane.f32.xlu0 %v3313_v54  ;;  %v7570_v59 = vpop.permute.xlu1 %2324 }
 0x556   :  { %v3179_v37 = vmax.f32 %v2607_v23, 0.0  ;;  %v3133_v5 = vmax.f32 %v2760_v36, 0.0 }
 0x557   :  { %v3319_v39 = vmax.f32 %v3173_v20, %v3174_v43  ;;  %v3424_v17 = vmax.f32 %v3127_v9, %v3128_v21  ;;  %v3180_v18 = vmax.f32 %v2609_v19, 0.0  ;;  %v3134_v35 = vmax.f32 %v2762_v0, 0.0  ;;  %3317 = vmax.xlane.f32.xlu1 %v3316_v6 }
 0x559   :  { %v3322_v28 = vmax.f32 %v3179_v37, %v3180_v18  ;;  %v3427_v16 = vmax.f32 %v3133_v5, %v3134_v35  ;;  %v2612_v3 = vpop.f32.mrb[152].mxu1  ;;  %v2765_v57 = vpop.f32.mrb[136].mxu0  ;;  %3425 = vmax.xlane.f32.xlu0 %v3424_v17 }
 0x55a   :  { %v2613_v13 = vadd.f32 %v2612_v3, %v7570_v59  ;;  %v2766_v54 = vadd.f32 %v2765_v57, %v7522_v8  ;;  %v2614_v61 = vpop.f32.mrb[153].mxu1  ;;  %v2767_v34 = vpop.f32.mrb[137].mxu0 }
 0x55b   :  { %v2615_v47 = vadd.f32 %v2614_v61, %v7570_v59  ;;  %v2768_v12 = vadd.f32 %v2767_v34, %v7522_v8  ;;  %v2616_v6 = vpop.f32.mrb[154].mxu1  ;;  %v2769_v31 = vpop.f32.mrb[138].mxu0  ;;  %3428 = vmax.xlane.f32.xlu1 %v3427_v16 }
 0x55c   :  { %v3185_v10 = vmax.f32 %v2613_v13, 0.0  ;;  %v3139_v51 = vmax.f32 %v2766_v54, 0.0  ;;  %v2617_v45 = vadd.f32 %v2616_v6, %v7568_v58  ;;  %v2770_v41 = vadd.f32 %v2769_v31, %v7520_v50  ;;  %v2618_v2 = vpop.f32.mrb[155].mxu1  ;;  %v2771_v20 = vpop.f32.mrb[139].mxu0 }
 0x55d   :  { %v3186_v9 = vmax.f32 %v2615_v47, 0.0  ;;  %v3140_v23 = vmax.f32 %v2768_v12, 0.0  ;;  %v2619_v36 = vadd.f32 %v2618_v2, %v7568_v58  ;;  %v2772_v11 = vadd.f32 %v2771_v20, %v7520_v50  ;;  %3320 = vmax.xlane.f32.xlu0 %v3319_v39  ;;  %v7580_v5 = vpop.permute.xlu0 %2339  ;;  %v7582_v17 = vpop.permute.xlu1 %2334 }
 0x55e   :  { %v3191_v62 = vmax.f32 %v2617_v45, 0.0  ;;  %v3145_v43 = vmax.f32 %v2770_v41, 0.0 }
 0x55f   :  { %v3325_v21 = vmax.f32 %v3185_v10, %v3186_v9  ;;  %v3430_v19 = vmax.f32 %v3139_v51, %v3140_v23  ;;  %v3192_v0 = vmax.f32 %v2619_v36, 0.0  ;;  %v3146_v37 = vmax.f32 %v2772_v11, 0.0  ;;  %3323 = vmax.xlane.f32.xlu1 %v3322_v28 }
 0x561   :  { %v3328_v18 = vmax.f32 %v3191_v62, %v3192_v0  ;;  %v3433_v35 = vmax.f32 %v3145_v43, %v3146_v37  ;;  %v2622_v16 = vpop.f32.mrb[156].mxu1  ;;  %v2775_v3 = vpop.f32.mrb[140].mxu0  ;;  %3431 = vmax.xlane.f32.xlu0 %v3430_v19 }
 0x562   :  { %v2623_v57 = vadd.f32 %v2622_v16, %v7582_v17  ;;  %v2776_v39 = vadd.f32 %v2775_v3, %v7534_v4  ;;  %v2624_v13 = vpop.f32.mrb[157].mxu1  ;;  %v2777_v54 = vpop.f32.mrb[141].mxu0 }
 0x563   :  { %v2625_v61 = vadd.f32 %v2624_v13, %v7582_v17  ;;  %v2778_v34 = vadd.f32 %v2777_v54, %v7534_v4  ;;  %v2626_v28 = vpop.f32.mrb[158].mxu1  ;;  %v2779_v47 = vpop.f32.mrb[142].mxu0  ;;  %3434 = vmax.xlane.f32.xlu1 %v3433_v35 }
 0x564   :  { %v3197_v12 = vmax.f32 %v2623_v57, 0.0  ;;  %v3151_v6 = vmax.f32 %v2776_v39, 0.0  ;;  %v2627_v31 = vadd.f32 %v2626_v28, %v7580_v5  ;;  %v2780_v10 = vadd.f32 %v2779_v47, %v7532_v48  ;;  %v2628_v51 = vpop.f32.mrb[159].mxu1  ;;  %v2781_v45 = vpop.f32.mrb[143].mxu0 }
 0x565   :  { %v3198_v41 = vmax.f32 %v2625_v61, 0.0  ;;  %v3152_v2 = vmax.f32 %v2778_v34, 0.0  ;;  %v2629_v20 = vadd.f32 %v2628_v51, %v7580_v5  ;;  %v2782_v9 = vadd.f32 %v2781_v45, %v7532_v48  ;;  %3326 = vmax.xlane.f32.xlu0 %v3325_v21 }
 0x566   :  { %v3203_v23 = vmax.f32 %v2627_v31, 0.0  ;;  %v3157_v36 = vmax.f32 %v2780_v10, 0.0 }
 0x567   :  { %v3331_v11 = vmax.f32 %v3197_v12, %v3198_v41  ;;  %v3436_v62 = vmax.f32 %v3151_v6, %v3152_v2  ;;  %v3204_v43 = vmax.f32 %v2629_v20, 0.0  ;;  %v3158_v19 = vmax.f32 %v2782_v9, 0.0  ;;  %3329 = vmax.xlane.f32.xlu1 %v3328_v18 }
 0x569   :  { %v3334_v0 = vmax.f32 %v3203_v23, %v3204_v43  ;;  %v3439_v37 = vmax.f32 %v3157_v36, %v3158_v19  ;;  %v2785_v35 = vpop.f32.mrb[144].mxu0  ;;  %v2858_v16 = vpop.f32.mrb[160].mxu1  ;;  %3437 = vmax.xlane.f32.xlu0 %v3436_v62 }
 0x56a   :  { %v2786_v3 = vadd.f32 %v2785_v35, %v7546_v44  ;;  %v2859_v57 = vadd.f32 %v2858_v16, %v7406_v7  ;;  %v2787_v39 = vpop.f32.mrb[145].mxu0  ;;  %v2860_v13 = vpop.f32.mrb[161].mxu1 }
 0x56b   :  { %v2788_v21 = vadd.f32 %v2787_v39, %v7546_v44  ;;  %v2861_v54 = vadd.f32 %v2860_v13, %v7406_v7  ;;  %v2789_v61 = vpop.f32.mrb[146].mxu0  ;;  %v2862_v34 = vpop.f32.mrb[162].mxu1  ;;  %3440 = vmax.xlane.f32.xlu1 %v3439_v37 }
 0x56c   :  { %v3163_v28 = vmax.f32 %v2786_v3, 0.0  ;;  %v3021_v18 = vmax.f32 %v2859_v57, 0.0  ;;  %v2790_v47 = vadd.f32 %v2789_v61, %v7544_v22  ;;  %v2863_v12 = vadd.f32 %v2862_v34, %v7409_v40  ;;  %v2791_v6 = vpop.f32.mrb[147].mxu0  ;;  %v2864_v31 = vpop.f32.mrb[163].mxu1 }
 0x56d   :  { %v3164_v10 = vmax.f32 %v2788_v21, 0.0  ;;  %v3022_v51 = vmax.f32 %v2861_v54, 0.0  ;;  %v2792_v45 = vadd.f32 %v2791_v6, %v7544_v22  ;;  %v2865_v41 = vadd.f32 %v2864_v31, %v7409_v40  ;;  %3332 = vmax.xlane.f32.xlu0 %v3331_v11 }
 0x56e   :  { %v3169_v2 = vmax.f32 %v2790_v47, 0.0  ;;  %v3027_v7 = vmax.f32 %v2863_v12, 0.0 }
 0x56f   :  { %v3442_v20 = vmax.f32 %v3163_v28, %v3164_v10  ;;  %v3499_v9 = vmax.f32 %v3021_v18, %v3022_v51  ;;  %v3170_v23 = vmax.f32 %v2792_v45, 0.0  ;;  %v3028_v36 = vmax.f32 %v2865_v41, 0.0  ;;  %3335 = vmax.xlane.f32.xlu1 %v3334_v0 }
 0x571   :  { %v3445_v62 = vmax.f32 %v3169_v2, %v3170_v23  ;;  %v3502_v43 = vmax.f32 %v3027_v7, %v3028_v36  ;;  %v2795_v19 = vpop.f32.mrb[148].mxu0  ;;  %v2868_v37 = vpop.f32.mrb[164].mxu1  ;;  %3500 = vmax.xlane.f32.xlu0 %v3499_v9 }
 0x572   :  { %v2796_v35 = vadd.f32 %v2795_v19, %v7558_v63  ;;  %v2869_v16 = vadd.f32 %v2868_v37, %v7416_v60  ;;  %v2797_v3 = vpop.f32.mrb[149].mxu0  ;;  %v2870_v57 = vpop.f32.mrb[165].mxu1 }
 0x573   :  { %v2798_v40 = vadd.f32 %v2797_v3, %v7558_v63  ;;  %v2871_v11 = vadd.f32 %v2870_v57, %v7416_v60  ;;  %v2799_v39 = vpop.f32.mrb[150].mxu0  ;;  %v2872_v13 = vpop.f32.mrb[166].mxu1  ;;  %3503 = vmax.xlane.f32.xlu1 %v3502_v43 }
 0x574   :  { %v3175_v21 = vmax.f32 %v2796_v35, 0.0  ;;  %v3033_v0 = vmax.f32 %v2869_v16, 0.0  ;;  %v2800_v54 = vadd.f32 %v2799_v39, %v7556_v24  ;;  %v2873_v61 = vadd.f32 %v2872_v13, %v7420_v30  ;;  %v2801_v34 = vpop.f32.mrb[151].mxu0  ;;  %v2874_v28 = vpop.f32.mrb[167].mxu1 }
 0x575   :  { %v3176_v18 = vmax.f32 %v2798_v40, 0.0  ;;  %v3034_v47 = vmax.f32 %v2871_v11, 0.0  ;;  %v2802_v12 = vadd.f32 %v2801_v34, %v7556_v24  ;;  %v2875_v6 = vadd.f32 %v2874_v28, %v7420_v30  ;;  %3443 = vmax.xlane.f32.xlu0 %v3442_v20 }
 0x576   :  { %v3181_v31 = vmax.f32 %v2800_v54, 0.0  ;;  %v3039_v60 = vmax.f32 %v2873_v61, 0.0 }
 0x577   :  { %v3448_v10 = vmax.f32 %v3175_v21, %v3176_v18  ;;  %v3505_v51 = vmax.f32 %v3033_v0, %v3034_v47  ;;  %v3182_v45 = vmax.f32 %v2802_v12, 0.0  ;;  %v3040_v41 = vmax.f32 %v2875_v6, 0.0  ;;  %3446 = vmax.xlane.f32.xlu1 %v3445_v62 }
 0x579   :  { %v3451_v2 = vmax.f32 %v3181_v31, %v3182_v45  ;;  %v3508_v7 = vmax.f32 %v3039_v60, %v3040_v41  ;;  %v2805_v9 = vpop.f32.mrb[152].mxu0  ;;  %v2878_v23 = vpop.f32.mrb[168].mxu1  ;;  %3506 = vmax.xlane.f32.xlu0 %v3505_v51 }
 0x57a   :  { %v2806_v36 = vadd.f32 %v2805_v9, %v7570_v59  ;;  %v2879_v43 = vadd.f32 %v2878_v23, %v7427_v55  ;;  %v2807_v19 = vpop.f32.mrb[153].mxu0  ;;  %v2880_v37 = vpop.f32.mrb[169].mxu1 }
 0x57b   :  { %v2808_v30 = vadd.f32 %v2807_v19, %v7570_v59  ;;  %v2881_v20 = vadd.f32 %v2880_v37, %v7427_v55  ;;  %v2809_v35 = vpop.f32.mrb[154].mxu0  ;;  %v2882_v16 = vpop.f32.mrb[170].mxu1  ;;  %3509 = vmax.xlane.f32.xlu1 %v3508_v7 }
 0x57c   :  { %v3187_v62 = vmax.f32 %v2806_v36, 0.0  ;;  %v3045_v3 = vmax.f32 %v2879_v43, 0.0  ;;  %v2810_v57 = vadd.f32 %v2809_v35, %v7568_v58  ;;  %v2883_v40 = vadd.f32 %v2882_v16, %v7430_v15  ;;  %v2811_v11 = vpop.f32.mrb[155].mxu0  ;;  %v2884_v39 = vpop.f32.mrb[171].mxu1 }
 0x57d   :  { %v3188_v13 = vmax.f32 %v2808_v30, 0.0  ;;  %v3046_v21 = vmax.f32 %v2881_v20, 0.0  ;;  %v2812_v0 = vadd.f32 %v2811_v11, %v7568_v58  ;;  %v2885_v54 = vadd.f32 %v2884_v39, %v7430_v15  ;;  %3449 = vmax.xlane.f32.xlu0 %v3448_v10 }
 0x57e   :  { %v3193_v55 = vmax.f32 %v2810_v57, 0.0  ;;  %v3051_v61 = vmax.f32 %v2883_v40, 0.0  ;;  %v3243_v34 = vpop.xlane.xlu1 %3242 }
 0x57f   :  { %v3454_v28 = vmax.f32 %v3187_v62, %v3188_v13  ;;  %v3511_v18 = vmax.f32 %v3045_v3, %v3046_v21  ;;  %v3194_v47 = vmax.f32 %v2812_v0, 0.0  ;;  %v3052_v12 = vmax.f32 %v2885_v54, 0.0  ;;  %3338 = vst.msk [vmem:[#allocation2] sm:$0xff] %vm3337_vm1, %v3243_v34  ;;  %3452 = vmax.xlane.f32.xlu1 %v3451_v2 }
 0x580   :  { %v3246_v6 = vpop.xlane.xlu0 %3245 }
 0x581   :  { %v3457_v31 = vmax.f32 %v3193_v55, %v3194_v47  ;;  %v3514_v60 = vmax.f32 %v3051_v61, %v3052_v12  ;;  %3339 = vst.msk [vmem:[#allocation2 + $0x8] sm:$0xff] %vm3337_vm1, %v3246_v6  ;;  %v2815_v51 = vpop.f32.mrb[156].mxu0  ;;  %v2888_v45 = vpop.f32.mrb[172].mxu1  ;;  %3512 = vmax.xlane.f32.xlu0 %v3511_v18 }
 0x582   :  { %v2816_v15 = vadd.f32 %v2815_v51, %v7582_v17  ;;  %v2889_v10 = vadd.f32 %v2888_v45, %v7437_v27  ;;  %v2817_v41 = vpop.f32.mrb[157].mxu0  ;;  %v2890_v7 = vpop.f32.mrb[173].mxu1 }
 0x583   :  { %v2818_v9 = vadd.f32 %v2817_v41, %v7582_v17  ;;  %v2891_v23 = vadd.f32 %v2890_v7, %v7437_v27  ;;  %v2819_v36 = vpop.f32.mrb[158].mxu0  ;;  %v2892_v2 = vpop.f32.mrb[174].mxu1  ;;  %3515 = vmax.xlane.f32.xlu1 %v3514_v60 }
 0x584   :  { %v3199_v43 = vmax.f32 %v2816_v15, 0.0  ;;  %v3057_v19 = vmax.f32 %v2889_v10, 0.0  ;;  %v2820_v37 = vadd.f32 %v2819_v36, %v7580_v5  ;;  %v2893_v30 = vadd.f32 %v2892_v2, %v7439_v53  ;;  %v2821_v20 = vpop.f32.mrb[159].mxu0  ;;  %v2894_v35 = vpop.f32.mrb[175].mxu1 }
 0x585   :  { %v3200_v16 = vmax.f32 %v2818_v9, 0.0  ;;  %v3058_v62 = vmax.f32 %v2891_v23, 0.0  ;;  %v2822_v3 = vadd.f32 %v2821_v20, %v7580_v5  ;;  %v2895_v57 = vadd.f32 %v2894_v35, %v7439_v53  ;;  %3455 = vmax.xlane.f32.xlu0 %v3454_v28 }
 0x586   :  { %v3205_v40 = vmax.f32 %v2820_v37, 0.0  ;;  %v3063_v27 = vmax.f32 %v2893_v30, 0.0  ;;  %v3249_v11 = vpop.xlane.xlu0 %3248 }
 0x587   :  { %v3460_v39 = vmax.f32 %v3199_v43, %v3200_v16  ;;  %v3517_v13 = vmax.f32 %v3057_v19, %v3058_v62  ;;  %v3206_v21 = vmax.f32 %v2822_v3, 0.0  ;;  %v3064_v0 = vmax.f32 %v2895_v57, 0.0  ;;  %3340 = vst.msk [vmem:[#allocation2 + $0x10] sm:$0xff] %vm3337_vm1, %v3249_v11  ;;  %3458 = vmax.xlane.f32.xlu1 %v3457_v31 }
 0x588   :  { %v3252_v54 = vpop.xlane.xlu1 %3251 }
 0x589   :  { %v3463_v55 = vmax.f32 %v3205_v40, %v3206_v21  ;;  %v3520_v61 = vmax.f32 %v3063_v27, %v3064_v0  ;;  %3341 = vst.msk [vmem:[#allocation2 + $0x18] sm:$0xff] %vm3337_vm1, %v3252_v54  ;;  %v2898_v34 = vpop.f32.mrb[176].mxu1  ;;  %3518 = vmax.xlane.f32.xlu0 %v3517_v13 }
 0x58a   :  { %v2899_v53 = vadd.f32 %v2898_v34, %v7449_v42  ;;  %v2900_v28 = vpop.f32.mrb[177].mxu1 }
 0x58b   :  { %v2901_v18 = vadd.f32 %v2900_v28, %v7449_v42  ;;  %v2902_v47 = vpop.f32.mrb[178].mxu1  ;;  %3521 = vmax.xlane.f32.xlu1 %v3520_v61 }
 0x58c   :  { %v3069_v12 = vmax.f32 %v2899_v53, 0.0  ;;  %v2903_v6 = vadd.f32 %v2902_v47, %v7447_v25  ;;  %v2904_v60 = vpop.f32.mrb[179].mxu1 }
 0x58d   :  { %v3070_v51 = vmax.f32 %v2901_v18, 0.0  ;;  %v2905_v31 = vadd.f32 %v2904_v60, %v7447_v25  ;;  %3461 = vmax.xlane.f32.xlu0 %v3460_v39 }
 0x58e   :  { %v3075_v45 = vmax.f32 %v2903_v6, 0.0  ;;  %v3255_v15 = vpop.xlane.xlu0 %3254 }
 0x58f   :  { %v3523_v10 = vmax.f32 %v3069_v12, %v3070_v51  ;;  %v3076_v41 = vmax.f32 %v2905_v31, 0.0  ;;  %3342 = vst.msk [vmem:[#allocation2 + $0x20] sm:$0xff] %vm3337_vm1, %v3255_v15  ;;  %3464 = vmax.xlane.f32.xlu1 %v3463_v55 }
 0x590   :  { %v3258_v7 = vpop.xlane.xlu1 %3257 }
 0x591   :  { %v3526_v9 = vmax.f32 %v3075_v45, %v3076_v41  ;;  %3343 = vst.msk [vmem:[#allocation2 + $0x28] sm:$0xff] %vm3337_vm1, %v3258_v7  ;;  %v2908_v42 = vpop.f32.mrb[180].mxu1  ;;  %3524 = vmax.xlane.f32.xlu0 %v3523_v10 }
 0x592   :  { %v2909_v23 = vadd.f32 %v2908_v42, %v7462_v49  ;;  %v2910_v36 = vpop.f32.mrb[181].mxu1 }
 0x593   :  { %v2911_v2 = vadd.f32 %v2910_v36, %v7462_v49  ;;  %v2912_v25 = vpop.f32.mrb[182].mxu1  ;;  %3527 = vmax.xlane.f32.xlu1 %v3526_v9 }
 0x594   :  { %v3081_v43 = vmax.f32 %v2909_v23, 0.0  ;;  %v2913_v19 = vadd.f32 %v2912_v25, %v7460_v26  ;;  %v2914_v37 = vpop.f32.mrb[183].mxu1 }
 0x595   :  { %v3082_v30 = vmax.f32 %v2911_v2, 0.0  ;;  %v2915_v20 = vadd.f32 %v2914_v37, %v7460_v26 }
 0x596   :  { %v3087_v35 = vmax.f32 %v2913_v19, 0.0  ;;  %v3261_v16 = vpop.xlane.xlu0 %3260 }
 0x597   :  { %v3529_v62 = vmax.f32 %v3081_v43, %v3082_v30  ;;  %v3088_v3 = vmax.f32 %v2915_v20, 0.0  ;;  %3344 = vst.msk [vmem:[#allocation2 + $0x30] sm:$0xff] %vm3337_vm1, %v3261_v16 }
 0x598   :  { %v3264_v57 = vpop.xlane.xlu1 %3263 }
 0x599   :  { %v3532_v40 = vmax.f32 %v3087_v35, %v3088_v3  ;;  %3345 = vst.msk [vmem:[#allocation2 + $0x38] sm:$0xff] %vm3337_vm1, %v3264_v57  ;;  %v2918_v49 = vpop.f32.mrb[184].mxu1  ;;  %3530 = vmax.xlane.f32.xlu0 %v3529_v62 }
 0x59a   :  { %v2919_v27 = vadd.f32 %v2918_v49, %v7474_v1  ;;  %v2920_v11 = vpop.f32.mrb[185].mxu1 }
 0x59b   :  { %v2921_v39 = vadd.f32 %v2920_v11, %v7474_v1  ;;  %v2922_v13 = vpop.f32.mrb[186].mxu1  ;;  %3533 = vmax.xlane.f32.xlu1 %v3532_v40 }
 0x59c   :  { %v3093_v26 = vmax.f32 %v2919_v27, 0.0  ;;  %v2923_v21 = vadd.f32 %v2922_v13, %v7472_v52  ;;  %v2924_v0 = vpop.f32.mrb[187].mxu1 }
 0x59d   :  { %v3094_v54 = vmax.f32 %v2921_v39, 0.0  ;;  %v2925_v55 = vadd.f32 %v2924_v0, %v7472_v52 }
 0x59e   :  { %v3099_v61 = vmax.f32 %v2923_v21, 0.0  ;;  %v3372_v34 = vpop.xlane.xlu0 %3371 }
 0x59f   :  { %v3535_v53 = vmax.f32 %v3093_v26, %v3094_v54  ;;  %v3100_v28 = vmax.f32 %v2925_v55, 0.0  ;;  %3467 = vst.msk [vmem:[#allocation2] sm:$0xff] %vm3466_vm2, %v3372_v34 }
 0x5a0   :  { %v3375_v18 = vpop.xlane.xlu1 %3374 }
 0x5a1   :  { %v3538_v47 = vmax.f32 %v3099_v61, %v3100_v28  ;;  %3468 = vst.msk [vmem:[#allocation2 + $0x8] sm:$0xff] %vm3466_vm2, %v3375_v18  ;;  %v2928_v1 = vpop.f32.mrb[188].mxu1  ;;  %3536 = vmax.xlane.f32.xlu0 %v3535_v53 }
 0x5a2   :  { %v2929_v12 = vadd.f32 %v2928_v1, %v7486_v14  ;;  %v2930_v6 = vpop.f32.mrb[189].mxu1  ;;  %v3267_v60 = vpop.xlane.xlu0 %3266 }
 0x5a3   :  { %v2931_v51 = vadd.f32 %v2930_v6, %v7486_v14  ;;  %3346 = vst.msk [vmem:[#allocation2 + $0x40] sm:$0xff] %vm3337_vm1, %v3267_v60  ;;  %v2932_v52 = vpop.f32.mrb[190].mxu1  ;;  %3539 = vmax.xlane.f32.xlu1 %v3538_v47 }
 0x5a4   :  { %v3105_v31 = vmax.f32 %v2929_v12, 0.0  ;;  %v2933_v45 = vadd.f32 %v2932_v52, %v7484_v29  ;;  %v2934_v15 = vpop.f32.mrb[191].mxu1  ;;  %v3270_v10 = vpop.xlane.xlu1 %3269 }
 0x5a5   :  { %v3106_v41 = vmax.f32 %v2931_v51, 0.0  ;;  %v2935_v7 = vadd.f32 %v2934_v15, %v7484_v29  ;;  %3347 = vst.msk [vmem:[#allocation2 + $0x48] sm:$0xff] %vm3337_vm1, %v3270_v10 }
 0x5a6   :  { %v3111_v9 = vmax.f32 %v2933_v45, 0.0  ;;  %v3378_v42 = vpop.xlane.xlu0 %3377 }
 0x5a7   :  { %v3541_v23 = vmax.f32 %v3105_v31, %v3106_v41  ;;  %v3112_v36 = vmax.f32 %v2935_v7, 0.0  ;;  %3469 = vst.msk [vmem:[#allocation2 + $0x10] sm:$0xff] %vm3466_vm2, %v3378_v42 }
 0x5a8   :  { %v3381_v14 = vpop.xlane.xlu1 %3380 }
 0x5a9   :  { %v3544_v2 = vmax.f32 %v3111_v9, %v3112_v36  ;;  %3470 = vst.msk [vmem:[#allocation2 + $0x18] sm:$0xff] %vm3466_vm2, %v3381_v14  ;;  %v2938_v25 = vpop.f32.mrb[192].mxu1  ;;  %3542 = vmax.xlane.f32.xlu0 %v3541_v23 }
 0x5aa   :  { %v2939_v43 = vadd.f32 %v2938_v25, %v7498_v46  ;;  %v2940_v19 = vpop.f32.mrb[193].mxu1  ;;  %v3273_v37 = vpop.xlane.xlu0 %3272 }
 0x5ab   :  { %v2941_v29 = vadd.f32 %v2940_v19, %v7498_v46  ;;  %3348 = vst.msk [vmem:[#allocation2 + $0x50] sm:$0xff] %vm3337_vm1, %v3273_v37  ;;  %v2942_v30 = vpop.f32.mrb[194].mxu1  ;;  %3545 = vmax.xlane.f32.xlu1 %v3544_v2 }
 0x5ac   :  { %v3117_v20 = vmax.f32 %v2939_v43, 0.0  ;;  %v2943_v35 = vadd.f32 %v2942_v30, %v7496_v38  ;;  %v2944_v16 = vpop.f32.mrb[195].mxu1  ;;  %v3276_v62 = vpop.xlane.xlu1 %3275 }
 0x5ad   :  { %v3118_v3 = vmax.f32 %v2941_v29, 0.0  ;;  %v2945_v57 = vadd.f32 %v2944_v16, %v7496_v38  ;;  %3349 = vst.msk [vmem:[#allocation2 + $0x58] sm:$0xff] %vm3337_vm1, %v3276_v62 }
 0x5ae   :  { %v3123_v40 = vmax.f32 %v2943_v35, 0.0  ;;  %v3384_v49 = vpop.xlane.xlu0 %3383 }
 0x5af   :  { %v3547_v27 = vmax.f32 %v3117_v20, %v3118_v3  ;;  %v3124_v11 = vmax.f32 %v2945_v57, 0.0  ;;  %3471 = vst.msk [vmem:[#allocation2 + $0x20] sm:$0xff] %vm3466_vm2, %v3384_v49 }
 0x5b0   :  { %v3387_v46 = vpop.xlane.xlu1 %3386 }
 0x5b1   :  { %v3550_v39 = vmax.f32 %v3123_v40, %v3124_v11  ;;  %3472 = vst.msk [vmem:[#allocation2 + $0x28] sm:$0xff] %vm3466_vm2, %v3387_v46  ;;  %v2948_v13 = vpop.f32.mrb[196].mxu1  ;;  %3548 = vmax.xlane.f32.xlu0 %v3547_v27 }
 0x5b2   :  { %v2949_v26 = vadd.f32 %v2948_v13, %v7510_v56  ;;  %v2950_v21 = vpop.f32.mrb[197].mxu1  ;;  %v3279_v0 = vpop.xlane.xlu0 %3278 }
 0x5b3   :  { %v2951_v38 = vadd.f32 %v2950_v21, %v7510_v56  ;;  %3350 = vst.msk [vmem:[#allocation2 + $0x60] sm:$0xff] %vm3337_vm1, %v3279_v0  ;;  %v2952_v54 = vpop.f32.mrb[198].mxu1  ;;  %3551 = vmax.xlane.f32.xlu1 %v3550_v39 }
 0x5b4   :  { %v3129_v55 = vmax.f32 %v2949_v26, 0.0  ;;  %v2953_v61 = vadd.f32 %v2952_v54, %v7508_v32  ;;  %v2954_v34 = vpop.f32.mrb[199].mxu1  ;;  %v3282_v53 = vpop.xlane.xlu1 %3281 }
 0x5b5   :  { %v3130_v28 = vmax.f32 %v2951_v38, 0.0  ;;  %v2955_v18 = vadd.f32 %v2954_v34, %v7508_v32  ;;  %3351 = vst.msk [vmem:[#allocation2 + $0x68] sm:$0xff] %vm3337_vm1, %v3282_v53 }
 0x5b6   :  { %v3135_v47 = vmax.f32 %v2953_v61, 0.0  ;;  %v3390_v1 = vpop.xlane.xlu0 %3389 }
 0x5b7   :  { %v3553_v12 = vmax.f32 %v3129_v55, %v3130_v28  ;;  %v3136_v6 = vmax.f32 %v2955_v18, 0.0  ;;  %3473 = vst.msk [vmem:[#allocation2 + $0x30] sm:$0xff] %vm3466_vm2, %v3390_v1 }
 0x5b8   :  { %v3393_v56 = vpop.xlane.xlu1 %3392 }
 0x5b9   :  { %v3556_v60 = vmax.f32 %v3135_v47, %v3136_v6  ;;  %3474 = vst.msk [vmem:[#allocation2 + $0x38] sm:$0xff] %vm3466_vm2, %v3393_v56  ;;  %v2958_v51 = vpop.f32.mrb[200].mxu1  ;;  %3554 = vmax.xlane.f32.xlu0 %v3553_v12 }
 0x5ba   :  { %v2959_v52 = vadd.f32 %v2958_v51, %v7522_v8  ;;  %v2960_v31 = vpop.f32.mrb[201].mxu1  ;;  %v3285_v45 = vpop.xlane.xlu0 %3284 }
 0x5bb   :  { %v2961_v32 = vadd.f32 %v2960_v31, %v7522_v8  ;;  %3352 = vst.msk [vmem:[#allocation2 + $0x70] sm:$0xff] %vm3337_vm1, %v3285_v45  ;;  %v2962_v15 = vpop.f32.mrb[202].mxu1  ;;  %3557 = vmax.xlane.f32.xlu1 %v3556_v60 }
 0x5bc   :  { %v3141_v10 = vmax.f32 %v2959_v52, 0.0  ;;  %v2963_v41 = vadd.f32 %v2962_v15, %v7520_v50  ;;  %v2964_v7 = vpop.f32.mrb[203].mxu1  ;;  %v3288_v9 = vpop.xlane.xlu1 %3287 }
 0x5bd   :  { %v3142_v42 = vmax.f32 %v2961_v32, 0.0  ;;  %v2965_v23 = vadd.f32 %v2964_v7, %v7520_v50  ;;  %3353 = vst.msk [vmem:[#allocation2 + $0x78] sm:$0xff] %vm3337_vm1, %v3288_v9 }
 0x5be   :  { %v3147_v36 = vmax.f32 %v2963_v41, 0.0  ;;  %v3396_v14 = vpop.xlane.xlu0 %3395 }
 0x5bf   :  { %v3559_v2 = vmax.f32 %v3141_v10, %v3142_v42  ;;  %v3148_v25 = vmax.f32 %v2965_v23, 0.0  ;;  %3475 = vst.msk [vmem:[#allocation2 + $0x40] sm:$0xff] %vm3466_vm2, %v3396_v14 }
 0x5c0   :  { %v3399_v8 = vpop.xlane.xlu1 %3398 }
 0x5c1   :  { %v3562_v43 = vmax.f32 %v3147_v36, %v3148_v25  ;;  %3476 = vst.msk [vmem:[#allocation2 + $0x48] sm:$0xff] %vm3466_vm2, %v3399_v8  ;;  %v2968_v19 = vpop.f32.mrb[204].mxu1  ;;  %3560 = vmax.xlane.f32.xlu0 %v3559_v2 }
 0x5c2   :  { %v2969_v37 = vadd.f32 %v2968_v19, %v7534_v4  ;;  %v2970_v29 = vpop.f32.mrb[205].mxu1  ;;  %v3291_v30 = vpop.xlane.xlu0 %3290 }
 0x5c3   :  { %v2971_v50 = vadd.f32 %v2970_v29, %v7534_v4  ;;  %3354 = vst.msk [vmem:[#allocation2 + $0x80] sm:$0xff] %vm3337_vm1, %v3291_v30  ;;  %v2972_v20 = vpop.f32.mrb[206].mxu1  ;;  %3563 = vmax.xlane.f32.xlu1 %v3562_v43 }
 0x5c4   :  { %v3153_v35 = vmax.f32 %v2969_v37, 0.0  ;;  %v2973_v16 = vadd.f32 %v2972_v20, %v7532_v48  ;;  %v2974_v62 = vpop.f32.mrb[207].mxu1  ;;  %v3294_v3 = vpop.xlane.xlu1 %3293 }
 0x5c5   :  { %v3154_v57 = vmax.f32 %v2971_v50, 0.0  ;;  %v2975_v40 = vadd.f32 %v2974_v62, %v7532_v48  ;;  %3355 = vst.msk [vmem:[#allocation2 + $0x88] sm:$0xff] %vm3337_vm1, %v3294_v3 }
 0x5c6   :  { %v3159_v49 = vmax.f32 %v2973_v16, 0.0  ;;  %v3402_v27 = vpop.xlane.xlu0 %3401 }
 0x5c7   :  { %v3565_v11 = vmax.f32 %v3153_v35, %v3154_v57  ;;  %v3160_v46 = vmax.f32 %v2975_v40, 0.0  ;;  %3477 = vst.msk [vmem:[#allocation2 + $0x50] sm:$0xff] %vm3466_vm2, %v3402_v27 }
 0x5c8   :  { %v3405_v4 = vpop.xlane.xlu1 %3404 }
 0x5c9   :  { %v3568_v39 = vmax.f32 %v3159_v49, %v3160_v46  ;;  %3478 = vst.msk [vmem:[#allocation2 + $0x58] sm:$0xff] %vm3466_vm2, %v3405_v4  ;;  %v2978_v13 = vpop.f32.mrb[208].mxu1  ;;  %3566 = vmax.xlane.f32.xlu0 %v3565_v11 }
 0x5ca   :  { %v2979_v26 = vadd.f32 %v2978_v13, %v7546_v44  ;;  %v2980_v21 = vpop.f32.mrb[209].mxu1  ;;  %v3297_v0 = vpop.xlane.xlu0 %3296 }
 0x5cb   :  { %v2981_v48 = vadd.f32 %v2980_v21, %v7546_v44  ;;  %3356 = vst.msk [vmem:[#allocation2 + $0x90] sm:$0xff] %vm3337_vm1, %v3297_v0  ;;  %v2982_v38 = vpop.f32.mrb[210].mxu1  ;;  %3569 = vmax.xlane.f32.xlu1 %v3568_v39 }
 0x5cc   :  { %v3165_v54 = vmax.f32 %v2979_v26, 0.0  ;;  %v2983_v55 = vadd.f32 %v2982_v38, %v7544_v22  ;;  %v2984_v61 = vpop.f32.mrb[211].mxu1  ;;  %v3300_v34 = vpop.xlane.xlu1 %3299 }
 0x5cd   :  { %v3166_v53 = vmax.f32 %v2981_v48, 0.0  ;;  %v2985_v28 = vadd.f32 %v2984_v61, %v7544_v22  ;;  %3357 = vst.msk [vmem:[#allocation2 + $0x98] sm:$0xff] %vm3337_vm1, %v3300_v34 }
 0x5ce   :  { %v3171_v18 = vmax.f32 %v2983_v55, 0.0  ;;  %v3408_v47 = vpop.xlane.xlu0 %3407 }
 0x5cf   :  { %v3571_v1 = vmax.f32 %v3165_v54, %v3166_v53  ;;  %v3172_v12 = vmax.f32 %v2985_v28, 0.0  ;;  %3479 = vst.msk [vmem:[#allocation2 + $0x60] sm:$0xff] %vm3466_vm2, %v3408_v47 }
 0x5d0   :  { %v3411_v44 = vpop.xlane.xlu1 %3410 }
 0x5d1   :  { %v3574_v6 = vmax.f32 %v3171_v18, %v3172_v12  ;;  %3480 = vst.msk [vmem:[#allocation2 + $0x68] sm:$0xff] %vm3466_vm2, %v3411_v44  ;;  %v2988_v56 = vpop.f32.mrb[212].mxu1  ;;  %3572 = vmax.xlane.f32.xlu0 %v3571_v1 }
 0x5d2   :  { %v2989_v60 = vadd.f32 %v2988_v56, %v7558_v63  ;;  %v2990_v51 = vpop.f32.mrb[213].mxu1  ;;  %v3303_v52 = vpop.xlane.xlu0 %3302 }
 0x5d3   :  { %v2991_v22 = vadd.f32 %v2990_v51, %v7558_v63  ;;  %3358 = vst.msk [vmem:[#allocation2 + $0xa0] sm:$0xff] %vm3337_vm1, %v3303_v52  ;;  %v2992_v31 = vpop.f32.mrb[214].mxu1  ;;  %3575 = vmax.xlane.f32.xlu1 %v3574_v6 }
 0x5d4   :  { %v3177_v45 = vmax.f32 %v2989_v60, 0.0  ;;  %v2993_v32 = vadd.f32 %v2992_v31, %v7556_v24  ;;  %v2994_v15 = vpop.f32.mrb[215].mxu1  ;;  %v3306_v10 = vpop.xlane.xlu1 %3305 }
 0x5d5   :  { %v3178_v41 = vmax.f32 %v2991_v22, 0.0  ;;  %v2995_v7 = vadd.f32 %v2994_v15, %v7556_v24  ;;  %3359 = vst.msk [vmem:[#allocation2 + $0xa8] sm:$0xff] %vm3337_vm1, %v3306_v10  ;;  %v5597_v22 = vld [vmem:[%s8413_s6 + $0x4] ss:$8 sps:$4 sm:$0xff]  }
 0x5d6   :  { %v3183_v9 = vmax.f32 %v2993_v32, 0.0  ;;  %v3414_v42 = vpop.xlane.xlu0 %3413  ;;  %4380 = vmatprep.mubr.bf16.mxu0 %v5597_v22  ;;  %v5877_v32 = vmov 5  }
 0x5d7   :  { %v3577_v23 = vmax.f32 %v3177_v45, %v3178_v41  ;;  %v3184_v36 = vmax.f32 %v2995_v7, 0.0  ;;  %3481 = vst.msk [vmem:[#allocation2 + $0x70] sm:$0xff] %vm3466_vm2, %v3414_v42  ;;  %5560 = vset.pattern.permute.xlu1 %v5877_v32  ;;  %5559 = vset.pattern.permute.xlu0 %v5877_v32  ;;  %v5747_v7 = vld [vmem:[%s8415_s8 + $0x88] sm:$0xff] }
 0x5d8   :  { %v3417_v63 = vpop.xlane.xlu1 %3416 }
 0x5d9   :  { %v3580_v14 = vmax.f32 %v3183_v9, %v3184_v36  ;;  %3482 = vst.msk [vmem:[#allocation2 + $0x78] sm:$0xff] %vm3466_vm2, %v3417_v63  ;;  %v2998_v2 = vpop.f32.mrb[216].mxu1  ;;  %3578 = vmax.xlane.f32.xlu0 %v3577_v23  ;;  %v5748_v9 = vld [vmem:[%s8415_s8 + $0x80] sm:$0xff] }
 0x5da   :  { %v2999_v25 = vadd.f32 %v2998_v2, %v7570_v59  ;;  %v3000_v8 = vpop.f32.mrb[217].mxu1  ;;  %v3309_v43 = vpop.xlane.xlu0 %3308  ;;  %v5749_v63 = vld [vmem:[%s8415_s8] sm:$0xff] }
 0x5db   :  { %v3001_v24 = vadd.f32 %v3000_v8, %v7570_v59  ;;  %3360 = vst.msk [vmem:[#allocation2 + $0xb0] sm:$0xff] %vm3337_vm1, %v3309_v43  ;;  %v3002_v19 = vpop.f32.mrb[218].mxu1  ;;  %3581 = vmax.xlane.f32.xlu1 %v3580_v14  ;;  %v5750_v14 = vld [vmem:[%s8415_s8 + $0xa8] sm:$0xff] }
 0x5dc   :  { %v3189_v37 = vmax.f32 %v2999_v25, 0.0  ;;  %v3003_v29 = vadd.f32 %v3002_v19, %v7568_v58  ;;  %v3004_v30 = vpop.f32.mrb[219].mxu1  ;;  %v3312_v50 = vpop.xlane.xlu1 %3311 }
 0x5dd   :  { %v3190_v20 = vmax.f32 %v3001_v24, 0.0  ;;  %v3005_v35 = vadd.f32 %v3004_v30, %v7568_v58  ;;  %3361 = vst.msk [vmem:[#allocation2 + $0xb8] sm:$0xff] %vm3337_vm1, %v3312_v50  ;;  %v5751_v24 = vld [vmem:[%s8415_s8 + $0x8] sm:$0xff]  ;;  %v5753_v50 = vld [vmem:[%s8415_s8 + $0x90] sm:$0xff] }
 0x5de   :  { %v3195_v16 = vmax.f32 %v3003_v29, 0.0  ;;  %v3420_v62 = vpop.xlane.xlu0 %3419 }
 0x5df   :  { %v3583_v3 = vmax.f32 %v3189_v37, %v3190_v20  ;;  %v3196_v57 = vmax.f32 %v3005_v35, 0.0  ;;  %3483 = vst.msk [vmem:[#allocation2 + $0x80] sm:$0xff] %vm3466_vm2, %v3420_v62  ;;  %v5752_v37 = vld [vmem:[%s8415_s8 + $0x28] sm:$0xff]  ;;  %v5754_v20 = vld [vmem:[%s8415_s8 + $0xb8] sm:$0xff] }
 0x5e0   :  { %v3423_v59 = vpop.xlane.xlu1 %3422 }
 0x5e1   :  { %v3586_v40 = vmax.f32 %v3195_v16, %v3196_v57  ;;  %3484 = vst.msk [vmem:[#allocation2 + $0x88] sm:$0xff] %vm3466_vm2, %v3423_v59  ;;  %v3008_v49 = vpop.f32.mrb[220].mxu1  ;;  %3584 = vmax.xlane.f32.xlu0 %v3583_v3  ;;  %v5755_v57 = vld [vmem:[%s8415_s8 + $0x98] sm:$0xff] }
 0x5e2   :  { %v3009_v27 = vadd.f32 %v3008_v49, %v7582_v17  ;;  %v3010_v11 = vpop.f32.mrb[221].mxu1  ;;  %v3315_v46 = vpop.xlane.xlu0 %3314 }
 0x5e3   :  { %v3011_v58 = vadd.f32 %v3010_v11, %v7582_v17  ;;  %3362 = vst.msk [vmem:[#allocation2 + $0xc0] sm:$0xff] %vm3337_vm1, %v3315_v46  ;;  %v3012_v4 = vpop.f32.mrb[222].mxu1  ;;  %3587 = vmax.xlane.f32.xlu1 %v3586_v40  ;;  %v5756_v40 = vld [vmem:[%s8415_s8 + $0x38] sm:$0xff]  ;;  %v5757_v11 = vld [vmem:[%s8415_s8 + $0x10] sm:$0xff]  ;;  %v5758_v46 = vld [vmem:[%s8415_s8 + $0xc8] sm:$0xff] }
 0x5e4   :  { %v3201_v39 = vmax.f32 %v3009_v27, 0.0  ;;  %v3013_v13 = vadd.f32 %v3012_v4, %v7580_v5  ;;  %v3014_v26 = vpop.f32.mrb[223].mxu1  ;;  %v3318_v21 = vpop.xlane.xlu1 %3317 }
 0x5e5   :  { %v3202_v0 = vmax.f32 %v3011_v58, 0.0  ;;  %v3015_v48 = vadd.f32 %v3014_v26, %v7580_v5  ;;  %3363 = vst.msk [vmem:[#allocation2 + $0xc8] sm:$0xff] %vm3337_vm1, %v3318_v21  ;;  %v5759_v26 = vld [vmem:[%s8415_s8 + $0x18] sm:$0xff] }
 0x5e6   :  { %v3207_v38 = vmax.f32 %v3013_v13, 0.0  ;;  %v3426_v54 = vpop.xlane.xlu0 %3425 }
 0x5e7   :  { %v3589_v55 = vmax.f32 %v3201_v39, %v3202_v0  ;;  %v3208_v61 = vmax.f32 %v3015_v48, 0.0  ;;  %3485 = vst.msk [vmem:[#allocation2 + $0x90] sm:$0xff] %vm3466_vm2, %v3426_v54  ;;  %v5760_v0 = vld [vmem:[%s8415_s8 + $0x48] sm:$0xff]  ;;  %v5761_v48 = vld [vmem:[%s8415_s8 + $0xa0] sm:$0xff] }
 0x5e8   :  { %v3429_v17 = vpop.xlane.xlu1 %3428 }
 0x5e9   :  { %v3592_v34 = vmax.f32 %v3207_v38, %v3208_v61  ;;  %3486 = vst.msk [vmem:[#allocation2 + $0x98] sm:$0xff] %vm3466_vm2, %v3429_v17  ;;  %3590 = vmax.xlane.f32.xlu0 %v3589_v55  ;;  %v5762_v38 = vld [vmem:[%s8415_s8 + $0xd8] sm:$0xff] }
 0x5ea   :  { %v3321_v53 = vpop.xlane.xlu0 %3320 }
 0x5eb   :  { %3364 = vst.msk [vmem:[#allocation2 + $0xd0] sm:$0xff] %vm3337_vm1, %v3321_v53  ;;  %3593 = vmax.xlane.f32.xlu1 %v3592_v34  ;;  %v5763_v34 = vld [vmem:[%s8415_s8 + $0x20] sm:$0xff] }
 0x5ec   :  { %v3324_v28 = vpop.xlane.xlu1 %3323 }
 0x5ed   :  { %3365 = vst.msk [vmem:[#allocation2 + $0xd8] sm:$0xff] %vm3337_vm1, %v3324_v28  ;;  %v5764_v28 = vld [vmem:[%s8415_s8 + $0x58] sm:$0xff] }
 0x5ee   :  { %v3432_v5 = vpop.xlane.xlu0 %3431 }
 0x5ef   :  { %3487 = vst.msk [vmem:[#allocation2 + $0xa0] sm:$0xff] %vm3466_vm2, %v3432_v5  ;;  %v5765_v5 = vld [vmem:[%s8415_s8 + $0xb0] sm:$0xff] }
 0x5f0   :  { %v3435_v18 = vpop.xlane.xlu1 %3434 }
 0x5f1   :  { %3488 = vst.msk [vmem:[#allocation2 + $0xa8] sm:$0xff] %vm3466_vm2, %v3435_v18  ;;  %v5766_v18 = vld [vmem:[%s8415_s8 + $0xe8] sm:$0xff] }
 0x5f2   :  { %v3327_v47 = vpop.xlane.xlu0 %3326 }
 0x5f3   :  { %3366 = vst.msk [vmem:[#allocation2 + $0xe0] sm:$0xff] %vm3337_vm1, %v3327_v47 }
 0x5f4   :  { %v3330_v1 = vpop.xlane.xlu1 %3329 }
 0x5f5   :  { %3367 = vst.msk [vmem:[#allocation2 + $0xe8] sm:$0xff] %vm3337_vm1, %v3330_v1 }
 0x5f6   :  { %v3438_v12 = vpop.xlane.xlu0 %3437 }
 0x5f7   :  { %3489 = vst.msk [vmem:[#allocation2 + $0xb0] sm:$0xff] %vm3466_vm2, %v3438_v12 }
 0x5f8   :  { %v3441_v44 = vpop.xlane.xlu1 %3440 }
 0x5f9   :  { %3490 = vst.msk [vmem:[#allocation2 + $0xb8] sm:$0xff] %vm3466_vm2, %v3441_v44 }
 0x5fa   :  { %v3333_v6 = vpop.xlane.xlu0 %3332 }
 0x5fb   :  { %3368 = vst.msk [vmem:[#allocation2 + $0xf0] sm:$0xff] %vm3337_vm1, %v3333_v6  ;;  %v5767_v6 = vld [vmem:[%s8415_s8 + $0x30] sm:$0xff] }
 0x5fc   :  { %v3336_v56 = vpop.xlane.xlu1 %3335  ;;  %3809 = vperm.xlu1 %5560, %v5747_v7   ;;  %v5773_v7 = vld [vmem:[%s8415_s8 + $0xd0] sm:$0xff] }
 0x5fd   :  { %3369 = vst.msk [vmem:[#allocation2 + $0xf8] sm:$0xff] %vm3337_vm1, %v3336_v56 }
 0x5fe   :  { %v3501_v60 = vpop.xlane.xlu0 %3500 }
 0x5ff   :  { %3596 = vst.msk [vmem:[#allocation2] sm:$0xff] %vm3595_vm3, %v3501_v60  ;;  %3805 = vperm.xlu0 %5559, %v5748_v9   ;;  %v5768_v60 = vld [vmem:[%s8415_s8 + $0x68] sm:$0xff] }
 0x600   :  { %v3504_v51 = vpop.xlane.xlu1 %3503  ;;  %3741 = vperm.xlu1 %5560, %v5749_v63   ;;  %v5774_v63 = vld [vmem:[%s8415_s8 + $0x50] sm:$0xff] }
 0x601   :  { %3597 = vst.msk [vmem:[#allocation2 + $0x8] sm:$0xff] %vm3595_vm3, %v3504_v51  ;;  %v5769_v51 = vld [vmem:[%s8415_s8 + $0xc0] sm:$0xff] }
 0x602   :  { %v3444_v52 = vpop.xlane.xlu0 %3443 }
 0x603   :  { %3491 = vst.msk [vmem:[#allocation2 + $0xc0] sm:$0xff] %vm3466_vm2, %v3444_v52  ;;  %3825 = vperm.xlu0 %5559, %v5750_v14   ;;  %v5770_v52 = vld [vmem:[%s8415_s8 + $0xf8] sm:$0xff] }
 0x604   :  { %v3447_v31 = vpop.xlane.xlu1 %3446  ;;  %3745 = vperm.xlu1 %5560, %v5751_v24  }
 0x605   :  { %3492 = vst.msk [vmem:[#allocation2 + $0xc8] sm:$0xff] %vm3466_vm2, %v3447_v31 }
 0x606   :  { %v3507_v45 = vpop.xlane.xlu0 %3506  ;;  %v3628_v10 = vld [vmem:[#allocation2] sm:$0xff] }
 0x607   :  { %3598 = vst.msk [vmem:[#allocation2 + $0x10] sm:$0xff] %vm3595_vm3, %v3507_v45  ;;  %3761 = vperm.xlu0 %5559, %v5752_v37  }
 0x608   :  { %v3510_v15 = vpop.xlane.xlu1 %3509  ;;  %v3629_v41 = vld [vmem:[#allocation2 + $0x8] sm:$0xff]  ;;  %3813 = vperm.xlu1 %5560, %v5753_v50  }
 0x609   :  { %3599 = vst.msk [vmem:[#allocation2 + $0x18] sm:$0xff] %vm3595_vm3, %v3510_v15  ;;  %v3660_v42 = vpack.c.bf16 %v3629_v41, %v3628_v10  ;;  %v5771_v15 = vld [vmem:[%s8415_s8 + $0x40] sm:$0xff]  ;;  %v5772_v41 = vld [vmem:[%s8415_s8 + $0x78] sm:$0xff] }
 0x60a   :  { %v3450_v23 = vpop.xlane.xlu0 %3449 }
 0x60b   :  { %3493 = vst.msk [vmem:[#allocation2 + $0xd0] sm:$0xff] %vm3466_vm2, %v3450_v23  ;;  %4349 = vmatpush1.bf16.msra.mxu0 %v3660_v42  ;;  %3833 = vperm.xlu0 %5559, %v5754_v20  }
 0x60c   :  { %v3453_v36 = vpop.xlane.xlu1 %3452  ;;  %4350 = vmatprep.subr.bf16.mxu0 %v8526_v33  ;;  %3817 = vperm.xlu1 %5560, %v5755_v57   ;;  %v108_v57 = vld [vmem:[%s8415_s8 + $0x180] sm:$0xff] }
 0x60d   :  { %3494 = vst.msk [vmem:[#allocation2 + $0xd8] sm:$0xff] %vm3466_vm2, %v3453_v36 }
 0x60e   :  { %v3513_v2 = vpop.xlane.xlu0 %3512  ;;  %v3630_v8 = vld [vmem:[#allocation2 + $0x10] sm:$0xff] }
 0x60f   :  { %3600 = vst.msk [vmem:[#allocation2 + $0x20] sm:$0xff] %vm3595_vm3, %v3513_v2  ;;  %3769 = vperm.xlu0 %5559, %v5756_v40   ;;  %v5775_v2 = vld [vmem:[%s8415_s8 + $0xe0] sm:$0xff] }
 0x610   :  { %v3516_v25 = vpop.xlane.xlu1 %3515  ;;  %v3631_v43 = vld [vmem:[#allocation2 + $0x18] sm:$0xff]  ;;  %3749 = vperm.xlu1 %5560, %v5757_v11  }
 0x611   :  { %3601 = vst.msk [vmem:[#allocation2 + $0x28] sm:$0xff] %vm3595_vm3, %v3516_v25  ;;  %v3661_v19 = vpack.c.bf16 %v3631_v43, %v3630_v8 }
 0x612   :  { %v3456_v29 = vpop.xlane.xlu0 %3455 }
 0x613   :  { %3495 = vst.msk [vmem:[#allocation2 + $0xe0] sm:$0xff] %vm3466_vm2, %v3456_v29  ;;  %4351 = vmatpush1.bf16.msra.mxu0 %v3661_v19  ;;  %3841 = vperm.xlu0 %5559, %v5758_v46   ;;  %v5776_v19 = vld [vmem:[%s8415_s8 + $0x60] sm:$0xff]  ;;  %v5777_v29 = vld [vmem:[%s8415_s8 + $0xf0] sm:$0xff] }
 0x614   :  { %v3459_v30 = vpop.xlane.xlu1 %3458  ;;  %4352 = vmatprep.subr.bf16.mxu0 %v8526_v33  ;;  %3753 = vperm.xlu1 %5560, %v5759_v26  }
 0x615   :  { %3496 = vst.msk [vmem:[#allocation2 + $0xe8] sm:$0xff] %vm3466_vm2, %v3459_v30 }
 0x616   :  { %v3519_v35 = vpop.xlane.xlu0 %3518  ;;  %v3632_v62 = vld [vmem:[#allocation2 + $0x20] sm:$0xff] }
 0x617   :  { %3602 = vst.msk [vmem:[#allocation2 + $0x30] sm:$0xff] %vm3595_vm3, %v3519_v35  ;;  %3777 = vperm.xlu0 %5559, %v5760_v0  }
 0x618   :  { %v3522_v16 = vpop.xlane.xlu1 %3521  ;;  %v3633_v3 = vld [vmem:[#allocation2 + $0x28] sm:$0xff]  ;;  %3821 = vperm.xlu1 %5560, %v5761_v48   ;;  %v94_v48 = vld [vmem:[%s8415_s8 + $0x110] sm:$0xff] }
 0x619   :  { %3603 = vst.msk [vmem:[#allocation2 + $0x38] sm:$0xff] %vm3595_vm3, %v3522_v16  ;;  %v3662_v59 = vpack.c.bf16 %v3633_v3, %v3632_v62  ;;  %v5778_v16 = vld [vmem:[%s8415_s8 + $0x70] sm:$0xff] }
 0x61a   :  { %v3462_v49 = vpop.xlane.xlu0 %3461 }
 0x61b   :  { %3497 = vst.msk [vmem:[#allocation2 + $0xf0] sm:$0xff] %vm3466_vm2, %v3462_v49  ;;  %4353 = vmatpush1.bf16.msra.mxu0 %v3662_v59  ;;  %3849 = vperm.xlu0 %5559, %v5762_v38  }
 0x61c   :  { %v3465_v27 = vpop.xlane.xlu1 %3464  ;;  %4354 = vmatprep.subr.bf16.mxu0 %v8526_v33  ;;  %3757 = vperm.xlu1 %5560, %v5763_v34  }
 0x61d   :  { %3498 = vst.msk [vmem:[#allocation2 + $0xf8] sm:$0xff] %vm3466_vm2, %v3465_v27  ;;  %v92_v27 = vld [vmem:[%s8415_s8 + $0x100] sm:$0xff] }
 0x61e   :  { %v3525_v58 = vpop.xlane.xlu0 %3524  ;;  %v3634_v39 = vld [vmem:[#allocation2 + $0x30] sm:$0xff] }
 0x61f   :  { %3604 = vst.msk [vmem:[#allocation2 + $0x40] sm:$0xff] %vm3595_vm3, %v3525_v58  ;;  %3785 = vperm.xlu0 %5559, %v5764_v28   ;;  %v109_v58 = vld [vmem:[%s8415_s8 + $0x188] sm:$0xff] }
 0x620   :  { %v3528_v4 = vpop.xlane.xlu1 %3527  ;;  %v3635_v13 = vld [vmem:[#allocation2 + $0x38] sm:$0xff]  ;;  %3829 = vperm.xlu1 %5560, %v5765_v5   ;;  %v96_v5 = vld [vmem:[%s8415_s8 + $0x120] sm:$0xff] }
 0x621   :  { %3605 = vst.msk [vmem:[#allocation2 + $0x48] sm:$0xff] %vm3595_vm3, %v3528_v4  ;;  %v3663_v21 = vpack.c.bf16 %v3635_v13, %v3634_v39  ;;  %v110_v4 = vld [vmem:[%s8415_s8 + $0x190] sm:$0xff] }
 0x623   :  { %4355 = vmatpush1.bf16.msra.mxu0 %v3663_v21  ;;  %3857 = vperm.xlu0 %5559, %v5766_v18   ;;  %v93_v21 = vld [vmem:[%s8415_s8 + $0x108] sm:$0xff] }
 0x624   :  { %4356 = vmatprep.subr.bf16.mxu0 %v8526_v33  ;;  %3765 = vperm.xlu1 %5560, %v5767_v6  }
 0x626   :  { %v3531_v54 = vpop.xlane.xlu0 %3530  ;;  %v3636_v61 = vld [vmem:[#allocation2 + $0x40] sm:$0xff] }
 0x627   :  { %3606 = vst.msk [vmem:[#allocation2 + $0x50] sm:$0xff] %vm3595_vm3, %v3531_v54  ;;  %3793 = vperm.xlu0 %5559, %v5768_v60   ;;  %v111_v54 = vld [vmem:[%s8415_s8 + $0x198] sm:$0xff] }
 0x628   :  { %v3534_v55 = vpop.xlane.xlu1 %3533  ;;  %v3637_v17 = vld [vmem:[#allocation2 + $0x48] sm:$0xff]  ;;  %3837 = vperm.xlu1 %5560, %v5769_v51   ;;  %v98_v51 = vld [vmem:[%s8415_s8 + $0x130] sm:$0xff] }
 0x629   :  { %3607 = vst.msk [vmem:[#allocation2 + $0x58] sm:$0xff] %vm3595_vm3, %v3534_v55  ;;  %v3664_v53 = vpack.c.bf16 %v3637_v17, %v3636_v61  ;;  %v112_v55 = vld [vmem:[%s8415_s8 + $0x1a0] sm:$0xff] }
 0x62b   :  { %4357 = vmatpush1.bf16.msra.mxu0 %v3664_v53  ;;  %3865 = vperm.xlu0 %5559, %v5770_v52   ;;  %v95_v53 = vld [vmem:[%s8415_s8 + $0x118] sm:$0xff] }
 0x62c   :  { %4358 = vmatprep.subr.bf16.mxu0 %v8526_v33  ;;  %3773 = vperm.xlu1 %5560, %v5771_v15  }
 0x62e   :  { %v3537_v47 = vpop.xlane.xlu0 %3536  ;;  %v3638_v12 = vld [vmem:[#allocation2 + $0x50] sm:$0xff] }
 0x62f   :  { %3608 = vst.msk [vmem:[#allocation2 + $0x60] sm:$0xff] %vm3595_vm3, %v3537_v47  ;;  %3801 = vperm.xlu0 %5559, %v5772_v41   ;;  %v113_v47 = vld [vmem:[%s8415_s8 + $0x1a8] sm:$0xff] }
 0x630   :  { %v3540_v1 = vpop.xlane.xlu1 %3539  ;;  %v3639_v44 = vld [vmem:[#allocation2 + $0x58] sm:$0xff]  ;;  %3845 = vperm.xlu1 %5560, %v5773_v7   ;;  %v100_v7 = vld [vmem:[%s8415_s8 + $0x140] sm:$0xff] }
 0x631   :  { %3609 = vst.msk [vmem:[#allocation2 + $0x68] sm:$0xff] %vm3595_vm3, %v3540_v1  ;;  %v3665_v56 = vpack.c.bf16 %v3639_v44, %v3638_v12  ;;  %v114_v1 = vld [vmem:[%s8415_s8 + $0x1b0] sm:$0xff] }
 0x633   :  { %4359 = vmatpush1.bf16.msra.mxu0 %v3665_v56  ;;  %3955 = vperm.xlu0 %5559, %v109_v58   ;;  %v97_v56 = vld [vmem:[%s8415_s8 + $0x128] sm:$0xff] }
 0x634   :  { %4360 = vmatprep.subr.bf16.mxu0 %v8526_v33  ;;  %3781 = vperm.xlu1 %5560, %v5774_v63   ;;  %v101_v63 = vld [vmem:[%s8415_s8 + $0x148] sm:$0xff] }
 0x635   :  { %v5615_v58 = vld [vmem:[%s8413_s6 + $0x60] ss:$8 sps:$4 sm:$0xff]  }
 0x636   :  { %v3543_v22 = vpop.xlane.xlu0 %3542  ;;  %v3640_v45 = vld [vmem:[#allocation2 + $0x60] sm:$0xff] }
 0x637   :  { %3610 = vst.msk [vmem:[#allocation2 + $0x70] sm:$0xff] %vm3595_vm3, %v3543_v22  ;;  %3875 = vperm.xlu0 %5559, %v93_v21   ;;  %v115_v22 = vld [vmem:[%s8415_s8 + $0x1b8] sm:$0xff] }
 0x638   :  { %v3546_v31 = vpop.xlane.xlu1 %3545  ;;  %v3641_v32 = vld [vmem:[#allocation2 + $0x68] sm:$0xff]  ;;  %3853 = vperm.xlu1 %5560, %v5775_v2   ;;  %v5622_v21 = vld [vmem:[%s8413_s6 + $0x94] ss:$8 sps:$4 sm:$0xff]  }
 0x639   :  { %3611 = vst.msk [vmem:[#allocation2 + $0x78] sm:$0xff] %vm3595_vm3, %v3546_v31  ;;  %v3666_v10 = vpack.c.bf16 %v3641_v32, %v3640_v45  ;;  %v116_v31 = vld [vmem:[%s8415_s8 + $0x1c0] sm:$0xff] }
 0x63a   :  { %v5595_v2 = vld [vmem:[%s8413_s6] ss:$8 sps:$4 sm:$0xff]  }
 0x63b   :  { %4361 = vmatpush1.bf16.msra.mxu0 %v3666_v10  ;;  %3965 = vperm.xlu0 %5559, %v111_v54   ;;  %v99_v10 = vld [vmem:[%s8415_s8 + $0x138] sm:$0xff] }
 0x63c   :  { %4362 = vmatprep.subr.bf16.mxu0 %v8526_v33  ;;  %3789 = vperm.xlu1 %5560, %v5776_v19   ;;  %v104_v19 = vld [vmem:[%s8415_s8 + $0x160] sm:$0xff]  ;;  %v5628_v54 = vld [vmem:[%s8413_s6 + $0xb4] ss:$8 sps:$4 sm:$0xff]  }
 0x63e   :  { %v3549_v9 = vpop.xlane.xlu0 %3548  ;;  %v3642_v23 = vld [vmem:[#allocation2 + $0x70] sm:$0xff] }
 0x63f   :  { %3612 = vst.msk [vmem:[#allocation2 + $0x80] sm:$0xff] %vm3595_vm3, %v3549_v9  ;;  %3885 = vperm.xlu0 %5559, %v95_v53   ;;  %v117_v9 = vld [vmem:[%s8415_s8 + $0x1c8] sm:$0xff]  ;;  %v5636_v53 = vld [vmem:[%s8413_s6 + $0xd0] ss:$8 sps:$4 sm:$0xff]  }
 0x640   :  { %v3552_v42 = vpop.xlane.xlu1 %3551  ;;  %v3643_v36 = vld [vmem:[#allocation2 + $0x78] sm:$0xff]  ;;  %3861 = vperm.xlu1 %5560, %v5777_v29   ;;  %v5601_v29 = vld [vmem:[%s8413_s6 + $0x24] ss:$8 sps:$4 sm:$0xff]  }
 0x641   :  { %3613 = vst.msk [vmem:[#allocation2 + $0x88] sm:$0xff] %vm3595_vm3, %v3552_v42  ;;  %v3667_v14 = vpack.c.bf16 %v3643_v36, %v3642_v23  ;;  %v118_v42 = vld [vmem:[%s8415_s8 + $0x1d0] sm:$0xff] }
 0x643   :  { %4363 = vmatpush1.bf16.msra.mxu0 %v3667_v14  ;;  %3975 = vperm.xlu0 %5559, %v113_v47   ;;  %v5642_v47 = vld [vmem:[%s8413_s6 + $0xf0] ss:$8 sps:$4 sm:$0xff]  }
 0x644   :  { %4364 = vmatprep.subr.bf16.mxu0 %v8526_v33  ;;  %3797 = vperm.xlu1 %5560, %v5778_v16   ;;  %v5603_v16 = vld [vmem:[%s8413_s6 + $0x20] ss:$8 sps:$4 sm:$0xff]  }
 0x646   :  { %v3555_v25 = vpop.xlane.xlu0 %3554  ;;  %v3644_v43 = vld [vmem:[#allocation2 + $0x80] sm:$0xff] }
 0x647   :  { %3614 = vst.msk [vmem:[#allocation2 + $0x90] sm:$0xff] %vm3595_vm3, %v3555_v25  ;;  %3895 = vperm.xlu0 %5559, %v97_v56   ;;  %v5598_v25 = vld [vmem:[%s8413_s6 + $0x14] ss:$8 sps:$4 sm:$0xff]   ;;  %v5649_v56 = vld [vmem:[%s8413_s6 + $0x124] ss:$8 sps:$4 sm:$0xff]  }
 0x648   :  { %v3558_v8 = vpop.xlane.xlu1 %3557  ;;  %v3645_v24 = vld [vmem:[#allocation2 + $0x88] sm:$0xff]  ;;  %3950 = vperm.xlu1 %5560, %v108_v57   ;;  %v107_v57 = vld [vmem:[%s8415_s8 + $0x178] sm:$0xff] }
 0x649   :  { %3615 = vst.msk [vmem:[#allocation2 + $0x98] sm:$0xff] %vm3595_vm3, %v3558_v8  ;;  %v3668_v37 = vpack.c.bf16 %v3645_v24, %v3644_v43  ;;  %v119_v8 = vld [vmem:[%s8415_s8 + $0x1d8] sm:$0xff]  ;;  %v120_v43 = vld [vmem:[%s8415_s8 + $0x1e0] sm:$0xff] }
 0x64a   :  { %v103_v24 = vld [vmem:[%s8415_s8 + $0x158] sm:$0xff] }
 0x64b   :  { %4365 = vmatpush1.bf16.msra.mxu0 %v3668_v37  ;;  %3985 = vperm.xlu0 %5559, %v115_v22   ;;  %v5600_v37 = vld [vmem:[%s8413_s6 + $0x10] ss:$8 sps:$4 sm:$0xff]   ;;  %v5655_v22 = vld [vmem:[%s8413_s6 + $0x144] ss:$8 sps:$4 sm:$0xff]  }
 0x64c   :  { %4366 = vmatprep.subr.bf16.mxu0 %v8526_v33  ;;  %3870 = vperm.xlu1 %5560, %v92_v27   ;;  %v5610_v27 = vld [vmem:[%s8413_s6 + $0x54] ss:$8 sps:$4 sm:$0xff]  }
 0x64e   :  { %v3561_v30 = vpop.xlane.xlu0 %3560  ;;  %v3646_v20 = vld [vmem:[#allocation2 + $0x90] sm:$0xff] }
 0x64f   :  { %3616 = vst.msk [vmem:[#allocation2 + $0xa0] sm:$0xff] %vm3595_vm3, %v3561_v30  ;;  %3905 = vperm.xlu0 %5559, %v99_v10   ;;  %v121_v30 = vld [vmem:[%s8415_s8 + $0x1e8] sm:$0xff]  ;;  %v5660_v10 = vld [vmem:[%s8413_s6 + $0x150] ss:$8 sps:$4 sm:$0xff]  }
 0x650   :  { %v3564_v50 = vpop.xlane.xlu1 %3563  ;;  %v3647_v35 = vld [vmem:[#allocation2 + $0x98] sm:$0xff]  ;;  %3960 = vperm.xlu1 %5560, %v110_v4  }
 0x651   :  { %3617 = vst.msk [vmem:[#allocation2 + $0xa8] sm:$0xff] %vm3595_vm3, %v3564_v50  ;;  %v3669_v62 = vpack.c.bf16 %v3647_v35, %v3646_v20  ;;  %v122_v50 = vld [vmem:[%s8415_s8 + $0x1f0] sm:$0xff]  ;;  %v105_v20 = vld [vmem:[%s8415_s8 + $0x168] sm:$0xff] }
 0x652   :  { %v106_v35 = vld [vmem:[%s8415_s8 + $0x170] sm:$0xff] }
 0x653   :  { %4367 = vmatpush1.bf16.msra.mxu0 %v3669_v62  ;;  %3995 = vperm.xlu0 %5559, %v117_v9   ;;  %v5604_v62 = vld [vmem:[%s8413_s6 + $0x34] ss:$8 sps:$4 sm:$0xff]   ;;  %v5663_v9 = vld [vmem:[%s8413_s6 + $0x160] ss:$8 sps:$4 sm:$0xff]  }
 0x654   :  { %4368 = vmatprep.subr.bf16.mxu0 %v8526_v33  ;;  %3880 = vperm.xlu1 %5560, %v94_v48   ;;  %v5616_v4 = vld [vmem:[%s8413_s6 + $0x74] ss:$8 sps:$4 sm:$0xff]   ;;  %v5625_v48 = vld [vmem:[%s8413_s6 + $0xa4] ss:$8 sps:$4 sm:$0xff]  }
 0x656   :  { %v3567_v3 = vpop.xlane.xlu0 %3566  ;;  %v3648_v40 = vld [vmem:[#allocation2 + $0xa0] sm:$0xff] }
 0x657   :  { %3618 = vst.msk [vmem:[#allocation2 + $0xb0] sm:$0xff] %vm3595_vm3, %v3567_v3  ;;  %3915 = vperm.xlu0 %5559, %v101_v63   ;;  %v123_v3 = vld [vmem:[%s8415_s8 + $0x1f8] sm:$0xff]  ;;  %v5669_v63 = vld [vmem:[%s8413_s6 + $0x184] ss:$8 sps:$4 sm:$0xff]  }
 0x658   :  { %v3570_v59 = vpop.xlane.xlu1 %3569  ;;  %v3649_v49 = vld [vmem:[#allocation2 + $0xa8] sm:$0xff]  ;;  %3970 = vperm.xlu1 %5560, %v112_v55   ;;  %v5630_v55 = vld [vmem:[%s8413_s6 + $0xb0] ss:$8 sps:$4 sm:$0xff]  }
 0x659   :  { %3619 = vst.msk [vmem:[#allocation2 + $0xb8] sm:$0xff] %vm3595_vm3, %v3570_v59  ;;  %v3670_v11 = vpack.c.bf16 %v3649_v49, %v3648_v40  ;;  %v5606_v59 = vld [vmem:[%s8413_s6 + $0x30] ss:$8 sps:$4 sm:$0xff]   ;;  %v5607_v40 = vld [vmem:[%s8413_s6 + $0x44] ss:$8 sps:$4 sm:$0xff]  }
 0x65a   :  { %v5609_v49 = vld [vmem:[%s8413_s6 + $0x40] ss:$8 sps:$4 sm:$0xff]  }
 0x65b   :  { %4369 = vmatpush1.bf16.msra.mxu0 %v3670_v11  ;;  %4005 = vperm.xlu0 %5559, %v119_v8   ;;  %v5612_v11 = vld [vmem:[%s8413_s6 + $0x50] ss:$8 sps:$4 sm:$0xff]  }
 0x65c   :  { %4370 = vmatprep.subr.bf16.mxu0 %v8526_v33  ;;  %3890 = vperm.xlu1 %5560, %v96_v5   ;;  %v5639_v5 = vld [vmem:[%s8413_s6 + $0xe0] ss:$8 sps:$4 sm:$0xff]  }
 0x65e   :  { %v3573_v46 = vpop.xlane.xlu0 %3572  ;;  %v3650_v13 = vld [vmem:[#allocation2 + $0xb0] sm:$0xff] }
 0x65f   :  { %3620 = vst.msk [vmem:[#allocation2 + $0xc0] sm:$0xff] %vm3595_vm3, %v3573_v46  ;;  %3925 = vperm.xlu0 %5559, %v103_v24   ;;  %v5613_v46 = vld [vmem:[%s8413_s6 + $0x64] ss:$8 sps:$4 sm:$0xff]   ;;  %v5670_v24 = vld [vmem:[%s8413_s6 + $0x190] ss:$8 sps:$4 sm:$0xff]  }
 0x660   :  { %v3576_v39 = vpop.xlane.xlu1 %3575  ;;  %v3651_v26 = vld [vmem:[#allocation2 + $0xb8] sm:$0xff]  ;;  %3980 = vperm.xlu1 %5560, %v114_v1   ;;  %v5643_v1 = vld [vmem:[%s8413_s6 + $0x104] ss:$8 sps:$4 sm:$0xff]  }
 0x661   :  { %3621 = vst.msk [vmem:[#allocation2 + $0xc8] sm:$0xff] %vm3595_vm3, %v3576_v39  ;;  %v3671_v0 = vpack.c.bf16 %v3651_v26, %v3650_v13  ;;  %v5618_v39 = vld [vmem:[%s8413_s6 + $0x70] ss:$8 sps:$4 sm:$0xff]   ;;  %v5619_v13 = vld [vmem:[%s8413_s6 + $0x84] ss:$8 sps:$4 sm:$0xff]  }
 0x662   :  { %v5621_v26 = vld [vmem:[%s8413_s6 + $0x80] ss:$8 sps:$4 sm:$0xff]  }
 0x663   :  { %4371 = vmatpush1.bf16.msra.mxu0 %v3671_v0  ;;  %4015 = vperm.xlu0 %5559, %v121_v30   ;;  %v5624_v0 = vld [vmem:[%s8413_s6 + $0x90] ss:$8 sps:$4 sm:$0xff]   ;;  %v5673_v30 = vld [vmem:[%s8413_s6 + $0x1a0] ss:$8 sps:$4 sm:$0xff]  }
 0x664   :  { %4372 = vmatprep.subr.bf16.mxu0 %v8526_v33  ;;  %3900 = vperm.xlu1 %5560, %v98_v51   ;;  %v5652_v51 = vld [vmem:[%s8413_s6 + $0x134] ss:$8 sps:$4 sm:$0xff]  }
 0x666   :  { %v3579_v38 = vpop.xlane.xlu0 %3578  ;;  %v3652_v17 = vld [vmem:[#allocation2 + $0xc0] sm:$0xff] }
 0x667   :  { %3622 = vst.msk [vmem:[#allocation2 + $0xd0] sm:$0xff] %vm3595_vm3, %v3579_v38  ;;  %3935 = vperm.xlu0 %5559, %v105_v20   ;;  %v5627_v38 = vld [vmem:[%s8413_s6 + $0xa0] ss:$8 sps:$4 sm:$0xff]  }
 0x668   :  { %v3582_v61 = vpop.xlane.xlu1 %3581  ;;  %v3653_v34 = vld [vmem:[#allocation2 + $0xc8] sm:$0xff]  ;;  %3990 = vperm.xlu1 %5560, %v116_v31  }
 0x669   :  { %3623 = vst.msk [vmem:[#allocation2 + $0xd8] sm:$0xff] %vm3595_vm3, %v3582_v61  ;;  %v3672_v28 = vpack.c.bf16 %v3653_v34, %v3652_v17  ;;  %v5631_v61 = vld [vmem:[%s8413_s6 + $0xc4] ss:$8 sps:$4 sm:$0xff]   ;;  %v5633_v17 = vld [vmem:[%s8413_s6 + $0xc0] ss:$8 sps:$4 sm:$0xff]  }
 0x66a   :  { %v5634_v34 = vld [vmem:[%s8413_s6 + $0xd4] ss:$8 sps:$4 sm:$0xff]   ;;  %v5657_v31 = vld [vmem:[%s8413_s6 + $0x140] ss:$8 sps:$4 sm:$0xff]  }
 0x66b   :  { %4373 = vmatpush1.bf16.msra.mxu0 %v3672_v28  ;;  %4025 = vperm.xlu0 %5559, %v123_v3   ;;  %v5637_v28 = vld [vmem:[%s8413_s6 + $0xe4] ss:$8 sps:$4 sm:$0xff]  }
 0x66c   :  { %4374 = vmatprep.subr.bf16.mxu0 %v8526_v33  ;;  %3910 = vperm.xlu1 %5560, %v100_v7  }
 0x66e   :  { %v3585_v18 = vpop.xlane.xlu0 %3584  ;;  %v3654_v44 = vld [vmem:[#allocation2 + $0xd0] sm:$0xff] }
 0x66f   :  { %3624 = vst.msk [vmem:[#allocation2 + $0xe0] sm:$0xff] %vm3595_vm3, %v3585_v18  ;;  %3945 = vperm.xlu0 %5559, %v107_v57   ;;  %v5640_v18 = vld [vmem:[%s8413_s6 + $0xf4] ss:$8 sps:$4 sm:$0xff]  }
 0x670   :  { %v3588_v12 = vpop.xlane.xlu1 %3587  ;;  %v3655_v6 = vld [vmem:[#allocation2 + $0xd8] sm:$0xff]  ;;  %4000 = vperm.xlu1 %5560, %v118_v42  }
 0x671   :  { %3625 = vst.msk [vmem:[#allocation2 + $0xe8] sm:$0xff] %vm3595_vm3, %v3588_v12  ;;  %v3673_v60 = vpack.c.bf16 %v3655_v6, %v3654_v44  ;;  %v5645_v12 = vld [vmem:[%s8413_s6 + $0x100] ss:$8 sps:$4 sm:$0xff]   ;;  %v5646_v44 = vld [vmem:[%s8413_s6 + $0x114] ss:$8 sps:$4 sm:$0xff]  }
 0x672   :  { %v5648_v6 = vld [vmem:[%s8413_s6 + $0x110] ss:$8 sps:$4 sm:$0xff]   ;;  %v5664_v42 = vld [vmem:[%s8413_s6 + $0x174] ss:$8 sps:$4 sm:$0xff]  }
 0x673   :  { %4375 = vmatpush1.bf16.msra.mxu0 %v3673_v60  ;;  %v5651_v60 = vld [vmem:[%s8413_s6 + $0x120] ss:$8 sps:$4 sm:$0xff]  }
 0x674   :  { %4376 = vmatprep.subr.bf16.mxu0 %v8526_v33 }
 0x676   :  { %v3591_v52 = vpop.xlane.xlu0 %3590  ;;  %v3656_v32 = vld [vmem:[#allocation2 + $0xe0] sm:$0xff] }
 0x677   :  { %3626 = vst.msk [vmem:[#allocation2 + $0xf0] sm:$0xff] %vm3595_vm3, %v3591_v52  ;;  %v5654_v52 = vld [vmem:[%s8413_s6 + $0x130] ss:$8 sps:$4 sm:$0xff]  }
 0x678   :  { %v3594_v45 = vpop.xlane.xlu1 %3593  ;;  %v3657_v15 = vld [vmem:[#allocation2 + $0xe8] sm:$0xff] }
 0x679   :  { %3627 = vst.msk [vmem:[#allocation2 + $0xf8] sm:$0xff] %vm3595_vm3, %v3594_v45  ;;  %v3674_v41 = vpack.c.bf16 %v3657_v15, %v3656_v32  ;;  %v5658_v45 = vld [vmem:[%s8413_s6 + $0x154] ss:$8 sps:$4 sm:$0xff]  }
 0x67b   :  { %4377 = vmatpush1.bf16.msra.mxu0 %v3674_v41  ;;  %v5661_v41 = vld [vmem:[%s8413_s6 + $0x164] ss:$8 sps:$4 sm:$0xff]  }
 0x67c   :  { %4378 = vmatprep.subr.bf16.mxu0 %v8526_v33  ;;  %v102_v33 = vld [vmem:[%s8415_s8 + $0x150] sm:$0xff]  ;;  %v8104_v32 = vpop.permute.xlu1 %3809 }
 0x67d   :  { %3920 = vperm.xlu1 %5560, %v102_v33  }
 0x67e   :  { %v3658_v23 = vld [vmem:[#allocation2 + $0xf0] sm:$0xff] }
 0x680   :  { %v3659_v36 = vld [vmem:[#allocation2 + $0xf8] sm:$0xff]  ;;  %v3742_v15 = vpop.permute.xlu1 %3741 }
 0x681   :  { %v3675_v14 = vpack.c.bf16 %v3659_v36, %v3658_v23  ;;  %4010 = vperm.xlu1 %5560, %v120_v43   ;;  %v5666_v36 = vld [vmem:[%s8413_s6 + $0x170] ss:$8 sps:$4 sm:$0xff]   ;;  %v8134_v43 = vpop.permute.xlu0 %3805 }
 0x683   :  { %4379 = vmatpush1.bf16.msra.mxu0 %v3675_v14 }
 0x684   :  { %v3746_v7 = vpop.permute.xlu1 %3745 }
 0x685   :  { %3930 = vperm.xlu1 %5560, %v104_v19   ;;  %v5675_v19 = vld [vmem:[%s8413_s6 + $0x1a4] ss:$8 sps:$4 sm:$0xff]  }
 0x686   :  { %4381 = vmatmul.mubr.bf16.vlgmr.msra.gmra.mrb[160].mxu0 %v5595_v2  ;;  %v5667_v2 = vld [vmem:[%s8413_s6 + $0x180] ss:$8 sps:$4 sm:$0xff]  }
 0x687   :  { %4388 = vmatprep.mubr.bf16.mxu0 %v5598_v25  ;;  %v5672_v25 = vld [vmem:[%s8413_s6 + $0x194] ss:$8 sps:$4 sm:$0xff]  }
 0x688   :  { %v8118_v23 = vpop.permute.xlu1 %3813 }
 0x689   :  { %4020 = vperm.xlu1 %5560, %v122_v50   ;;  %v5678_v50 = vld [vmem:[%s8413_s6 + $0x1b4] ss:$8 sps:$4 sm:$0xff]  }
 0x68c   :  { %v8126_v14 = vpop.permute.xlu1 %3817 }
 0x68d   :  { %3940 = vperm.xlu1 %5560, %v106_v35  }
 0x68e   :  { %4389 = vmatmul.mubr.bf16.gmra.mrb[164].mxu0 %v5600_v37 }
 0x68f   :  { %4396 = vmatprep.mubr.bf16.mxu0 %v5601_v29  ;;  %v8144_v29 = vpop.permute.xlu0 %3825 }
 0x690   :  { %v3750_v33 = vpop.permute.xlu1 %3749 }
 0x693   :  { %v3762_v35 = vpop.permute.xlu0 %3761 }
 0x694   :  { %v3754_v8 = vpop.permute.xlu1 %3753 }
 0x696   :  { %4397 = vmatmul.mubr.bf16.gmra.mrb[168].mxu0 %v5603_v16 }
 0x697   :  { %4404 = vmatprep.mubr.bf16.mxu0 %v5604_v62 }
 0x698   :  { %v8142_v37 = vpop.permute.xlu1 %3821 }
 0x69c   :  { %v3758_v20 = vpop.permute.xlu1 %3757 }
 0x69e   :  { %4405 = vmatmul.mubr.bf16.gmra.mrb[172].mxu0 %v5606_v59  ;;  %v5676_v59 = vld [vmem:[%s8413_s6 + $0x1b0] ss:$8 sps:$4 sm:$0xff]  }
 0x69f   :  { %4412 = vmatprep.mubr.bf16.mxu0 %v5607_v40  ;;  %v8157_v40 = vpop.permute.xlu0 %3833 }
 0x6a0   :  { %v8152_v62 = vpop.permute.xlu1 %3829 }
 0x6a6   :  { %4413 = vmatmul.mubr.bf16.gmra.mrb[176].mxu0 %v5609_v49 }
 0x6a7   :  { %4420 = vmatprep.mubr.bf16.mxu0 %v5610_v27  ;;  %v5681_v27 = vld [vmem:[%s8413_s6 + $0x1c4] ss:$8 sps:$4 sm:$0xff]  }
 0x6ae   :  { %4421 = vmatmul.mubr.bf16.gmra.mrb[180].mxu0 %v5612_v11 }
 0x6af   :  { %4428 = vmatprep.mubr.bf16.mxu0 %v5613_v46 }
 0x6b6   :  { %4429 = vmatmul.mubr.bf16.gmra.mrb[184].mxu0 %v5615_v58 }
 0x6b7   :  { %4436 = vmatprep.mubr.bf16.mxu0 %v5616_v4 }
 0x6be   :  { %4437 = vmatmul.mubr.bf16.gmra.mrb[188].mxu0 %v5618_v39  ;;  %v3766_v39 = vpop.permute.xlu1 %3765 }
 0x6bf   :  { %4444 = vmatprep.mubr.bf16.mxu0 %v5619_v13 }
 0x6c6   :  { %4445 = vmatmul.mubr.bf16.gmra.mrb[192].mxu0 %v5621_v26  ;;  %v3770_v26 = vpop.permute.xlu0 %3769 }
 0x6c7   :  { %4452 = vmatprep.mubr.bf16.mxu0 %v5622_v21 }
 0x6ce   :  { %4453 = vmatmul.mubr.bf16.gmra.mrb[196].mxu0 %v5624_v0 }
 0x6cf   :  { %4460 = vmatprep.mubr.bf16.mxu0 %v5625_v48 }
 0x6d6   :  { %4461 = vmatmul.mubr.bf16.gmra.mrb[200].mxu0 %v5627_v38  ;;  %v5679_v38 = vld [vmem:[%s8413_s6 + $0x1c0] ss:$8 sps:$4 sm:$0xff]  }
 0x6d7   :  { %4468 = vmatprep.mubr.bf16.mxu0 %v5628_v54 }
 0x6de   :  { %4469 = vmatmul.mubr.bf16.gmra.mrb[204].mxu0 %v5630_v55  ;;  %v5684_v55 = vld [vmem:[%s8413_s6 + $0x1d4] ss:$8 sps:$4 sm:$0xff]  }
 0x6df   :  { %4476 = vmatprep.mubr.bf16.mxu0 %v5631_v61 }
 0x6e6   :  { %4477 = vmatmul.mubr.bf16.gmra.mrb[208].mxu0 %v5633_v17 }
 0x6e7   :  { %4484 = vmatprep.mubr.bf16.mxu0 %v5634_v34  ;;  %v8170_v34 = vpop.permute.xlu1 %3837 }
 0x6ee   :  { %4485 = vmatmul.mubr.bf16.gmra.mrb[212].mxu0 %v5636_v53 }
 0x6ef   :  { %4492 = vmatprep.mubr.bf16.mxu0 %v5637_v28 }
 0x6f6   :  { %4493 = vmatmul.mubr.bf16.gmra.mrb[216].mxu0 %v5639_v5  ;;  %v8172_v5 = vpop.permute.xlu0 %3841 }
 0x6f7   :  { %4500 = vmatprep.mubr.bf16.mxu0 %v5640_v18 }
 0x6fe   :  { %4501 = vmatmul.mubr.bf16.gmra.mrb[220].mxu0 %v5642_v47 }
 0x6ff   :  { %4508 = vmatprep.mubr.bf16.mxu0 %v5643_v1 }
 0x706   :  { %4509 = vmatmul.mubr.bf16.gmra.mrb[224].mxu0 %v5645_v12 }
 0x707   :  { %4516 = vmatprep.mubr.bf16.mxu0 %v5646_v44  ;;  %v5682_v44 = vld [vmem:[%s8413_s6 + $0x1d0] ss:$8 sps:$4 sm:$0xff]  }
 0x70e   :  { %4517 = vmatmul.mubr.bf16.gmra.mrb[228].mxu0 %v5648_v6 }
 0x70f   :  { %4524 = vmatprep.mubr.bf16.mxu0 %v5649_v56  ;;  %v5687_v56 = vld [vmem:[%s8413_s6 + $0x1e4] ss:$8 sps:$4 sm:$0xff]  }
 0x716   :  { %4525 = vmatmul.mubr.bf16.gmra.mrb[232].mxu0 %v5651_v60  ;;  %v3774_v60 = vpop.permute.xlu1 %3773 }
 0x717   :  { %4532 = vmatprep.mubr.bf16.mxu0 %v5652_v51 }
 0x71e   :  { %4533 = vmatmul.mubr.bf16.gmra.mrb[236].mxu0 %v5654_v52 }
 0x71f   :  { %4540 = vmatprep.mubr.bf16.mxu0 %v5655_v22  ;;  %v3778_v22 = vpop.permute.xlu0 %3777 }
 0x726   :  { %4541 = vmatmul.mubr.bf16.gmra.mrb[240].mxu0 %v5657_v31 }
 0x727   :  { %4548 = vmatprep.mubr.bf16.mxu0 %v5658_v45 }
 0x72e   :  { %4549 = vmatmul.mubr.bf16.gmra.mrb[244].mxu0 %v5660_v10 }
 0x72f   :  { %4556 = vmatprep.mubr.bf16.mxu0 %v5661_v41  ;;  %v8184_v41 = vpop.permute.xlu1 %3845 }
 0x736   :  { %4557 = vmatmul.mubr.bf16.gmra.mrb[248].mxu0 %v5663_v9 }
 0x737   :  { %4564 = vmatprep.mubr.bf16.mxu0 %v5664_v42  ;;  %v5685_v42 = vld [vmem:[%s8413_s6 + $0x1e0] ss:$8 sps:$4 sm:$0xff]  }
 0x73e   :  { %4565 = vmatmul.mubr.bf16.gmra.mrb[252].mxu0 %v5666_v36  ;;  %v8189_v36 = vpop.permute.xlu0 %3849 }
 0x73f   :  { %4572 = vmatprep.mubr.bf16.mxu0 %v5669_v63 }
 0x746   :  { %4573 = vmatmul.mubr.bf16.gmra.mrb[0].mxu0 %v5667_v2 }
 0x747   :  { %4580 = vmatprep.mubr.bf16.mxu0 %v5672_v25 }
 0x74e   :  { %4581 = vmatmul.mubr.bf16.gmra.mrb[4].mxu0 %v5670_v24 }
 0x74f   :  { %4588 = vmatprep.mubr.bf16.mxu0 %v5675_v19  ;;  %v3782_v19 = vpop.permute.xlu1 %3781 }
 0x756   :  { %4589 = vmatmul.mubr.bf16.gmra.mrb[8].mxu0 %v5673_v30 }
 0x757   :  { %4596 = vmatprep.mubr.bf16.mxu0 %v5678_v50  ;;  %v3786_v50 = vpop.permute.xlu0 %3785 }
 0x759   :  { %v4382_v16 = vpop.f32.mrb[160].mxu0 }
 0x75a   :  { %v4383_v3 = vadd.f32 %v4382_v16, %v3742_v15  ;;  %v4384_v57 = vpop.f32.mrb[161].mxu0 }
 0x75b   :  { %v4385_v49 = vpop.f32.mrb[162].mxu0 }
 0x75c   :  { %v4386_v11 = vadd.f32 %v4385_v49, %v3746_v7  ;;  %v4387_v46 = vpop.f32.mrb[163].mxu0  ;;  %v4637_v58 = vmax.f32 %v4383_v3, 0.0  ;;  %v5688_v3 = vld [vmem:[%s8413_s6 + $0x1f0] ss:$8 sps:$4 sm:$0xff]  }
 0x75e   :  { %v4638_v4 = vmax.f32 %v4386_v11, 0.0  ;;  %4597 = vmatmul.mubr.bf16.gmra.mrb[12].mxu0 %v5676_v59 }
 0x75f   :  { %4604 = vmatprep.mubr.bf16.mxu0 %v5681_v27  ;;  %v8199_v27 = vpop.permute.xlu1 %3853 }
 0x760   :  { %v8162_v13 = vpack.c.bf16 %v4638_v4, %v4637_v58  ;;  %v8201_v58 = vpop.permute.xlu0 %3857 }
 0x761   :  { %v4390_v21 = vpop.f32.mrb[164].mxu0 }
 0x762   :  { %v4391_v0 = vadd.f32 %v4390_v21, %v3750_v33  ;;  %v4392_v48 = vpop.f32.mrb[165].mxu0  ;;  %v5690_v33 = vld [vmem:[%s8413_s6 + $0x1f4] ss:$8 sps:$4 sm:$0xff]  }
 0x763   :  { %v4393_v54 = vpop.f32.mrb[166].mxu0  ;;  %v3790_v48 = vpop.permute.xlu1 %3789 }
 0x764   :  { %v4394_v61 = vadd.f32 %v4393_v54, %v3754_v8  ;;  %v4395_v17 = vpop.f32.mrb[167].mxu0  ;;  %v4639_v53 = vmax.f32 %v4391_v0, 0.0 }
 0x766   :  { %v4640_v28 = vmax.f32 %v4394_v61, 0.0  ;;  %4605 = vmatmul.mubr.bf16.gmra.mrb[16].mxu0 %v5679_v38 }
 0x767   :  { %4612 = vmatprep.mubr.bf16.mxu0 %v5684_v55  ;;  %v3794_v55 = vpop.permute.xlu0 %3793 }
 0x768   :  { %v8174_v18 = vpack.c.bf16 %v4640_v28, %v4639_v53 }
 0x769   :  { %v4398_v47 = vpop.f32.mrb[168].mxu0 }
 0x76a   :  { %v4399_v1 = vadd.f32 %v4398_v47, %v3758_v20  ;;  %v4400_v12 = vpop.f32.mrb[169].mxu0  ;;  %v8207_v47 = vpop.permute.xlu1 %3861 }
 0x76b   :  { %v4401_v6 = vpop.f32.mrb[170].mxu0 }
 0x76c   :  { %v4402_v51 = vadd.f32 %v4401_v6, %v3762_v35  ;;  %v4403_v52 = vpop.f32.mrb[171].mxu0  ;;  %v4641_v31 = vmax.f32 %v4399_v1, 0.0 }
 0x76e   :  { %v4642_v45 = vmax.f32 %v4402_v51, 0.0  ;;  %4613 = vmatmul.mubr.bf16.gmra.mrb[20].mxu0 %v5682_v44  ;;  %v8209_v44 = vpop.permute.xlu0 %3865 }
 0x76f   :  { %4620 = vmatprep.mubr.bf16.mxu0 %v5687_v56 }
 0x770   :  { %v8182_v15 = vpack.c.bf16 %v4642_v45, %v4641_v31 }
 0x771   :  { %v4406_v10 = vpop.f32.mrb[172].mxu0 }
 0x772   :  { %v4407_v7 = vadd.f32 %v4406_v10, %v3766_v39  ;;  %v4408_v9 = vpop.f32.mrb[173].mxu0  ;;  %v3802_v45 = vpop.permute.xlu0 %3801 }
 0x773   :  { %v4409_v63 = vpop.f32.mrb[174].mxu0 }
 0x774   :  { %v4410_v2 = vadd.f32 %v4409_v63, %v3770_v26  ;;  %v4411_v25 = vpop.f32.mrb[175].mxu0  ;;  %v4643_v8 = vmax.f32 %v4407_v7, 0.0 }
 0x776   :  { %v4644_v24 = vmax.f32 %v4410_v2, 0.0  ;;  %4621 = vmatmul.mubr.bf16.gmra.mrb[24].mxu0 %v5685_v42 }
 0x777   :  { %4628 = vmatprep.mubr.bf16.mxu0 %v5690_v33 }
 0x778   :  { %v8194_v30 = vpack.c.bf16 %v4644_v24, %v4643_v8 }
 0x779   :  { %v4414_v20 = vpop.f32.mrb[176].mxu0 }
 0x77a   :  { %v4415_v35 = vadd.f32 %v4414_v20, %v3774_v60  ;;  %v4416_v16 = vpop.f32.mrb[177].mxu0 }
 0x77b   :  { %v4417_v57 = vpop.f32.mrb[178].mxu0 }
 0x77c   :  { %v4418_v59 = vadd.f32 %v4417_v57, %v3778_v22  ;;  %v4419_v49 = vpop.f32.mrb[179].mxu0  ;;  %v4645_v11 = vmax.f32 %v4415_v35, 0.0  ;;  %v3798_v22 = vpop.permute.xlu1 %3797 }
 0x77d   :  { %v5693_v49 = vld [vmem:[#allocation6 + $0x4] ss:$16 sps:$4 sm:$0xff]  }
 0x77e   :  { %v4646_v46 = vmax.f32 %v4418_v59, 0.0  ;;  %4629 = vmatmul.mubr.bf16.gmra.mrb[28].mxu0 %v5688_v3  ;;  %5021 = vmatprep.mubr.bf16.mxu1 %v5693_v49 }
 0x780   :  { %v8203_v4 = vpack.c.bf16 %v4646_v46, %v4645_v11 }
 0x781   :  { %v4422_v39 = vpop.f32.mrb[180].mxu0 }
 0x782   :  { %v4423_v26 = vadd.f32 %v4422_v39, %v3782_v19  ;;  %v4424_v21 = vpop.f32.mrb[181].mxu0 }
 0x783   :  { %v4425_v0 = vpop.f32.mrb[182].mxu0 }
 0x784   :  { %v4426_v38 = vadd.f32 %v4425_v0, %v3786_v50  ;;  %v4427_v54 = vpop.f32.mrb[183].mxu0  ;;  %v4647_v61 = vmax.f32 %v4423_v26, 0.0 }
 0x786   :  { %v4648_v17 = vmax.f32 %v4426_v38, 0.0 }
 0x788   :  { %v8205_v53 = vpack.c.bf16 %v4648_v17, %v4647_v61 }
 0x789   :  { %v4430_v28 = vpop.f32.mrb[184].mxu0 }
 0x78a   :  { %v4431_v1 = vadd.f32 %v4430_v28, %v3790_v48  ;;  %v4432_v12 = vpop.f32.mrb[185].mxu0 }
 0x78b   :  { %v4433_v6 = vpop.f32.mrb[186].mxu0 }
 0x78c   :  { %v4434_v56 = vadd.f32 %v4433_v6, %v3794_v55  ;;  %v4435_v60 = vpop.f32.mrb[187].mxu0  ;;  %v4649_v51 = vmax.f32 %v4431_v1, 0.0 }
 0x78e   :  { %v4650_v52 = vmax.f32 %v4434_v56, 0.0 }
 0x790   :  { %v8211_v31 = vpack.c.bf16 %v4650_v52, %v4649_v51 }
 0x791   :  { %v4438_v10 = vpop.f32.mrb[188].mxu0 }
 0x792   :  { %v4439_v7 = vadd.f32 %v4438_v10, %v3798_v22  ;;  %v4440_v9 = vpop.f32.mrb[189].mxu0  ;;  %v8228_v22 = vpop.permute.xlu0 %3955 }
 0x793   :  { %v4441_v42 = vpop.f32.mrb[190].mxu0 }
 0x794   :  { %v4442_v63 = vadd.f32 %v4441_v42, %v3802_v45  ;;  %v4443_v33 = vpop.f32.mrb[191].mxu0  ;;  %v4651_v2 = vmax.f32 %v4439_v7, 0.0 }
 0x796   :  { %v4652_v25 = vmax.f32 %v4442_v63, 0.0  ;;  %v3876_v33 = vpop.permute.xlu0 %3875 }
 0x798   :  { %v8213_v8 = vpack.c.bf16 %v4652_v25, %v4651_v2 }
 0x799   :  { %v4446_v24 = vpop.f32.mrb[192].mxu0 }
 0x79a   :  { %v4447_v19 = vadd.f32 %v4446_v24, %v8134_v43  ;;  %v4448_v50 = vpop.f32.mrb[193].mxu0 }
 0x79b   :  { %v4449_v20 = vpop.f32.mrb[194].mxu0 }
 0x79c   :  { %v4450_v35 = vadd.f32 %v4449_v20, %v8104_v32  ;;  %v4451_v16 = vpop.f32.mrb[195].mxu0  ;;  %v4653_v3 = vmax.f32 %v4447_v19, 0.0 }
 0x79e   :  { %v4654_v57 = vmax.f32 %v4450_v35, 0.0 }
 0x7a0   :  { %v4709_v59 = vpack.c.bf16 %v4654_v57, %v4653_v3 }
 0x7a1   :  { %v4454_v11 = vpop.f32.mrb[196].mxu0 }
 0x7a2   :  { %v4455_v46 = vadd.f32 %v4454_v11, %v8118_v23  ;;  %v4456_v39 = vpop.f32.mrb[197].mxu0  ;;  %5393 = vmatprep.subr.bf16.mxu1 %v4709_v59 }
 0x7a3   :  { %v4457_v26 = vpop.f32.mrb[198].mxu0  ;;  %5394 = vmatpush3.bf16.msra.mxu1 %v8162_v13 }
 0x7a4   :  { %v4458_v43 = vadd.f32 %v4457_v26, %v8126_v14  ;;  %v4459_v21 = vpop.f32.mrb[199].mxu0  ;;  %v4655_v0 = vmax.f32 %v4455_v46, 0.0 }
 0x7a6   :  { %v4656_v48 = vmax.f32 %v4458_v43, 0.0 }
 0x7a8   :  { %v4710_v32 = vpack.c.bf16 %v4656_v48, %v4655_v0 }
 0x7a9   :  { %v4462_v38 = vpop.f32.mrb[200].mxu0 }
 0x7aa   :  { %v4463_v54 = vadd.f32 %v4462_v38, %v8142_v37  ;;  %v4464_v55 = vpop.f32.mrb[201].mxu0  ;;  %5395 = vmatprep.subr.bf16.mxu1 %v4710_v32 }
 0x7ab   :  { %v4465_v61 = vpop.f32.mrb[202].mxu0  ;;  %5396 = vmatpush3.bf16.msra.mxu1 %v8174_v18  ;;  %v8226_v18 = vpop.permute.xlu1 %3950 }
 0x7ac   :  { %v4466_v23 = vadd.f32 %v4465_v61, %v8144_v29  ;;  %v4467_v17 = vpop.f32.mrb[203].mxu0  ;;  %v4657_v28 = vmax.f32 %v4463_v54, 0.0 }
 0x7ae   :  { %v4658_v1 = vmax.f32 %v4466_v23, 0.0 }
 0x7b0   :  { %v4711_v13 = vpack.c.bf16 %v4658_v1, %v4657_v28 }
 0x7b1   :  { %v4470_v12 = vpop.f32.mrb[204].mxu0 }
 0x7b2   :  { %v4471_v14 = vadd.f32 %v4470_v12, %v8152_v62  ;;  %v4472_v6 = vpop.f32.mrb[205].mxu0  ;;  %5397 = vmatprep.subr.bf16.mxu1 %v4711_v13  ;;  %v5691_v12 = vld [vmem:[#allocation6] ss:$16 sps:$4 sm:$0xff]  }
 0x7b3   :  { %v4473_v56 = vpop.f32.mrb[206].mxu0  ;;  %5398 = vmatpush3.bf16.msra.mxu1 %v8182_v15  ;;  %v5694_v6 = vld [vmem:[#allocation6 + $0x24] ss:$16 sps:$4 sm:$0xff]  }
 0x7b4   :  { %v4474_v37 = vadd.f32 %v4473_v56, %v8157_v40  ;;  %v4475_v60 = vpop.f32.mrb[207].mxu0  ;;  %v4659_v51 = vmax.f32 %v4471_v14, 0.0  ;;  %v3871_v40 = vpop.permute.xlu1 %3870 }
 0x7b6   :  { %v4660_v52 = vmax.f32 %v4474_v37, 0.0 }
 0x7b8   :  { %v4712_v29 = vpack.c.bf16 %v4660_v52, %v4659_v51  ;;  %v8234_v50 = vpop.permute.xlu1 %3960 }
 0x7b9   :  { %v4478_v45 = vpop.f32.mrb[208].mxu0 }
 0x7ba   :  { %v4479_v10 = vadd.f32 %v4478_v45, %v8170_v34  ;;  %v4480_v7 = vpop.f32.mrb[209].mxu0  ;;  %5399 = vmatprep.subr.bf16.mxu1 %v4712_v29 }
 0x7bb   :  { %v4481_v62 = vpop.f32.mrb[210].mxu0  ;;  %5400 = vmatpush3.bf16.msra.mxu1 %v8194_v30  ;;  %v5696_v7 = vld [vmem:[#allocation6 + $0x20] ss:$16 sps:$4 sm:$0xff]  }
 0x7bc   :  { %v4482_v15 = vadd.f32 %v4481_v62, %v8172_v5  ;;  %v4483_v9 = vpop.f32.mrb[211].mxu0  ;;  %v4661_v42 = vmax.f32 %v4479_v10, 0.0  ;;  %v8238_v5 = vpop.permute.xlu0 %3965 }
 0x7bd   :  { %v3881_v57 = vpop.permute.xlu1 %3880  ;;  %v5697_v9 = vld [vmem:[#allocation6 + $0x44] ss:$16 sps:$4 sm:$0xff]  }
 0x7be   :  { %v4662_v63 = vmax.f32 %v4482_v15, 0.0 }
 0x7c0   :  { %v4713_v2 = vpack.c.bf16 %v4662_v63, %v4661_v42  ;;  %v3886_v11 = vpop.permute.xlu0 %3885 }
 0x7c1   :  { %v4486_v25 = vpop.f32.mrb[212].mxu0  ;;  %v8243_v43 = vpop.permute.xlu1 %3970 }
 0x7c2   :  { %v4487_v24 = vadd.f32 %v4486_v25, %v8184_v41  ;;  %v4488_v19 = vpop.f32.mrb[213].mxu0  ;;  %5401 = vmatprep.subr.bf16.mxu1 %v4713_v2 }
 0x7c3   :  { %v4489_v34 = vpop.f32.mrb[214].mxu0  ;;  %5402 = vmatpush3.bf16.msra.mxu1 %v8203_v4 }
 0x7c4   :  { %v4490_v30 = vadd.f32 %v4489_v34, %v8189_v36  ;;  %v4491_v20 = vpop.f32.mrb[215].mxu0  ;;  %v4663_v35 = vmax.f32 %v4487_v24, 0.0  ;;  %v8245_v0 = vpop.permute.xlu0 %3975 }
 0x7c6   :  { %v4664_v16 = vmax.f32 %v4490_v30, 0.0  ;;  %v5699_v30 = vld [vmem:[#allocation6 + $0x40] ss:$16 sps:$4 sm:$0xff]  }
 0x7c8   :  { %v4714_v3 = vpack.c.bf16 %v4664_v16, %v4663_v35  ;;  %v3896_v23 = vpop.permute.xlu0 %3895  ;;  %v5700_v35 = vld [vmem:[#allocation6 + $0x64] ss:$16 sps:$4 sm:$0xff]  }
 0x7c9   :  { %v4494_v59 = vpop.f32.mrb[216].mxu0 }
 0x7ca   :  { %v4495_v49 = vadd.f32 %v4494_v59, %v8199_v27  ;;  %v4496_v41 = vpop.f32.mrb[217].mxu0  ;;  %5403 = vmatprep.subr.bf16.mxu1 %v4714_v3 }
 0x7cb   :  { %v4497_v46 = vpop.f32.mrb[218].mxu0  ;;  %5404 = vmatpush3.bf16.msra.mxu1 %v8205_v53 }
 0x7cc   :  { %v4498_v4 = vadd.f32 %v4497_v46, %v8201_v58  ;;  %v4499_v39 = vpop.f32.mrb[219].mxu0  ;;  %v4665_v36 = vmax.f32 %v4495_v49, 0.0  ;;  %v3891_v58 = vpop.permute.xlu1 %3890 }
 0x7ce   :  { %v4666_v26 = vmax.f32 %v4498_v4, 0.0 }
 0x7d0   :  { %v4715_v21 = vpack.c.bf16 %v4666_v26, %v4665_v36  ;;  %v8250_v14 = vpop.permute.xlu1 %3980  ;;  %v5702_v36 = vld [vmem:[#allocation6 + $0x60] ss:$16 sps:$4 sm:$0xff]  }
 0x7d1   :  { %v4502_v48 = vpop.f32.mrb[220].mxu0 }
 0x7d2   :  { %v4503_v32 = vadd.f32 %v4502_v48, %v8207_v47  ;;  %v4504_v27 = vpop.f32.mrb[221].mxu0  ;;  %5405 = vmatprep.subr.bf16.mxu1 %v4715_v21  ;;  %v5703_v48 = vld [vmem:[#allocation6 + $0x84] ss:$16 sps:$4 sm:$0xff]  }
 0x7d3   :  { %v4505_v38 = vpop.f32.mrb[222].mxu0  ;;  %5406 = vmatpush3.bf16.msra.mxu1 %v8211_v31 }
 0x7d4   :  { %v4506_v53 = vadd.f32 %v4505_v38, %v8209_v44  ;;  %v4507_v54 = vpop.f32.mrb[223].mxu0  ;;  %v4667_v55 = vmax.f32 %v4503_v32, 0.0  ;;  %v8253_v44 = vpop.permute.xlu0 %3985 }
 0x7d5   :  { %v3901_v52 = vpop.permute.xlu1 %3900 }
 0x7d6   :  { %v4668_v61 = vmax.f32 %v4506_v53, 0.0 }
 0x7d8   :  { %v4716_v17 = vpack.c.bf16 %v4668_v61, %v4667_v55  ;;  %v3906_v62 = vpop.permute.xlu0 %3905  ;;  %v5779_v61 = vld [vmem:[%s8415_s8 + $0x8] sm:$0xff] }
 0x7d9   :  { %v4510_v28 = vpop.f32.mrb[224].mxu0 }
 0x7da   :  { %v4511_v1 = vadd.f32 %v4510_v28, %v3871_v40  ;;  %v4512_v13 = vpop.f32.mrb[225].mxu0  ;;  %5407 = vmatprep.subr.bf16.mxu1 %v4716_v17  ;;  %v5780_v28 = vld [vmem:[%s8415_s8] sm:$0xff] }
 0x7db   :  { %v4513_v47 = vpop.f32.mrb[226].mxu0  ;;  %5408 = vmatpush3.bf16.msra.mxu1 %v8213_v8 }
 0x7dc   :  { %v4514_v31 = vadd.f32 %v4513_v47, %v3876_v33  ;;  %v4515_v56 = vpop.f32.mrb[227].mxu0  ;;  %v4669_v37 = vmax.f32 %v4511_v1, 0.0  ;;  %v8257_v33 = vpop.permute.xlu1 %3990 }
 0x7dd   :  { %v8261_v25 = vpop.permute.xlu0 %3995 }
 0x7de   :  { %v4670_v60 = vmax.f32 %v4514_v31, 0.0  ;;  %5022 = vmatmul.mubr.bf16.vlgmr.msra.gmra.mrb[224].mxu1 %v5691_v12  ;;  %v5705_v12 = vld [vmem:[#allocation6 + $0x80] ss:$16 sps:$4 sm:$0xff]   ;;  %v5706_v31 = vld [vmem:[#allocation6 + $0xa4] ss:$16 sps:$4 sm:$0xff]  }
 0x7df   :  { %5029 = vmatprep.mubr.bf16.mxu1 %v5694_v6 }
 0x7e0   :  { %v8255_v51 = vpack.c.bf16 %v4670_v60, %v4669_v37  ;;  %v5781_v60 = vld [vmem:[%s8415_s8 + $0x20] sm:$0xff] }
 0x7e1   :  { %v4518_v29 = vpop.f32.mrb[228].mxu0  ;;  %v3916_v41 = vpop.permute.xlu0 %3915 }
 0x7e2   :  { %v4519_v45 = vadd.f32 %v4518_v29, %v3881_v57  ;;  %v4520_v10 = vpop.f32.mrb[229].mxu0  ;;  %v3911_v57 = vpop.permute.xlu1 %3910 }
 0x7e3   :  { %v4521_v15 = vpop.f32.mrb[230].mxu0 }
 0x7e4   :  { %v4522_v8 = vadd.f32 %v4521_v15, %v3886_v11  ;;  %v4523_v40 = vpop.f32.mrb[231].mxu0  ;;  %v4671_v42 = vmax.f32 %v4519_v45, 0.0 }
 0x7e5   :  { %v8267_v38 = vpop.permute.xlu0 %4005 }
 0x7e6   :  { %v4672_v63 = vmax.f32 %v4522_v8, 0.0  ;;  %5030 = vmatmul.mubr.bf16.gmra.mrb[228].mxu1 %v5696_v7  ;;  %v8265_v26 = vpop.permute.xlu1 %4000  ;;  %v5784_v8 = vld [vmem:[%s8415_s8 + $0x18] sm:$0xff] }
 0x7e7   :  { %5037 = vmatprep.mubr.bf16.mxu1 %v5697_v9 }
 0x7e8   :  { %v8259_v2 = vpack.c.bf16 %v4672_v63, %v4671_v42  ;;  %v5708_v63 = vld [vmem:[#allocation6 + $0xa0] ss:$16 sps:$4 sm:$0xff]  }
 0x7e9   :  { %v4526_v24 = vpop.f32.mrb[232].mxu0  ;;  %v3926_v47 = vpop.permute.xlu0 %3925 }
 0x7ea   :  { %v4527_v19 = vadd.f32 %v4526_v24, %v3891_v58  ;;  %v4528_v34 = vpop.f32.mrb[233].mxu0  ;;  %v5878_v58 = vmov 6  }
 0x7eb   :  { %v4529_v20 = vpop.f32.mrb[234].mxu0  ;;  %5562 = vset.pattern.permute.xlu0 %v5878_v58  ;;  %5561 = vset.pattern.permute.xlu1 %v5878_v58  ;;  %v5789_v58 = vld [vmem:[%s8415_s8 + $0x60] sm:$0xff] }
 0x7ec   :  { %v4530_v16 = vadd.f32 %v4529_v20, %v3896_v23  ;;  %v4531_v3 = vpop.f32.mrb[235].mxu0  ;;  %v4673_v59 = vmax.f32 %v4527_v19, 0.0  ;;  %4770 = vperm.xlu0 %5562, %v5779_v61   ;;  %v3921_v23 = vpop.permute.xlu1 %3920  ;;  %4766 = vperm.xlu1 %5561, %v5780_v28   ;;  %v5709_v19 = vld [vmem:[#allocation6 + $0xc4] ss:$16 sps:$4 sm:$0xff]   ;;  %v5785_v20 = vld [vmem:[%s8415_s8 + $0x40] sm:$0xff] }
 0x7ed   :  { %v8290_v15 = vpop.permute.xlu0 %4015 }
 0x7ee   :  { %v4674_v49 = vmax.f32 %v4530_v16, 0.0  ;;  %5038 = vmatmul.mubr.bf16.gmra.mrb[232].mxu1 %v5699_v30  ;;  %v5786_v16 = vld [vmem:[%s8415_s8 + $0x28] sm:$0xff] }
 0x7ef   :  { %5045 = vmatprep.mubr.bf16.mxu1 %v5700_v35 }
 0x7f0   :  { %v8263_v11 = vpack.c.bf16 %v4674_v49, %v4673_v59  ;;  %4782 = vperm.xlu0 %5562, %v5781_v60   ;;  %v8283_v10 = vpop.permute.xlu1 %4010 }
 0x7f1   :  { %v4534_v46 = vpop.f32.mrb[236].mxu0  ;;  %v3936_v59 = vpop.permute.xlu0 %3935 }
 0x7f2   :  { %v4535_v4 = vadd.f32 %v4534_v46, %v3901_v52  ;;  %v4536_v39 = vpop.f32.mrb[237].mxu0  ;;  %v5782_v52 = vld [vmem:[%s8415_s8 + $0x10] sm:$0xff] }
 0x7f3   :  { %v4537_v21 = vpop.f32.mrb[238].mxu0  ;;  %4774 = vperm.xlu1 %5561, %v5782_v52  }
 0x7f4   :  { %v4538_v32 = vadd.f32 %v4537_v21, %v3906_v62  ;;  %v4539_v27 = vpop.f32.mrb[239].mxu0  ;;  %v4675_v53 = vmax.f32 %v4535_v4, 0.0  ;;  %v5783_v62 = vld [vmem:[%s8415_s8 + $0x30] sm:$0xff]  ;;  %v3931_v35 = vpop.permute.xlu1 %3930  ;;  %v5788_v4 = vld [vmem:[%s8415_s8 + $0x38] sm:$0xff] }
 0x7f5   :  { %4790 = vperm.xlu0 %5562, %v5783_v62   ;;  %v5711_v21 = vld [vmem:[#allocation6 + $0xc0] ss:$16 sps:$4 sm:$0xff]   ;;  %v5712_v27 = vld [vmem:[#allocation6 + $0xe4] ss:$16 sps:$4 sm:$0xff]   ;;  %v8314_v61 = vpop.permute.xlu0 %4025 }
 0x7f6   :  { %v4676_v54 = vmax.f32 %v4538_v32, 0.0  ;;  %5046 = vmatmul.mubr.bf16.gmra.mrb[236].mxu1 %v5702_v36 }
 0x7f7   :  { %5053 = vmatprep.mubr.bf16.mxu1 %v5703_v48  ;;  %4778 = vperm.xlu1 %5561, %v5784_v8  }
 0x7f8   :  { %v8269_v55 = vpack.c.bf16 %v4676_v54, %v4675_v53  ;;  %v8309_v48 = vpop.permute.xlu1 %4020 }
 0x7f9   :  { %v4542_v17 = vpop.f32.mrb[240].mxu0  ;;  %4798 = vperm.xlu0 %5562, %v5785_v20   ;;  %v3946_v60 = vpop.permute.xlu0 %3945 }
 0x7fa   :  { %v4543_v1 = vadd.f32 %v4542_v17, %v3911_v57  ;;  %v4544_v13 = vpop.f32.mrb[241].mxu0 }
 0x7fb   :  { %v4545_v6 = vpop.f32.mrb[242].mxu0  ;;  %4786 = vperm.xlu1 %5561, %v5786_v16   ;;  %v5791_v13 = vld [vmem:[%s8415_s8 + $0x70] sm:$0xff] }
 0x7fc   :  { %v4546_v56 = vadd.f32 %v4545_v6, %v3916_v41  ;;  %v4547_v37 = vpop.f32.mrb[243].mxu0  ;;  %v4677_v29 = vmax.f32 %v4543_v1, 0.0  ;;  %v5787_v41 = vld [vmem:[%s8415_s8 + $0x50] sm:$0xff]  ;;  %v5792_v6 = vld [vmem:[%s8415_s8 + $0x58] sm:$0xff] }
 0x7fd   :  { %4806 = vperm.xlu0 %5562, %v5787_v41   ;;  %v5714_v37 = vld [vmem:[#allocation6 + $0xe0] ss:$16 sps:$4 sm:$0xff]  }
 0x7fe   :  { %v4678_v45 = vmax.f32 %v4546_v56, 0.0  ;;  %5054 = vmatmul.mubr.bf16.gmra.mrb[240].mxu1 %v5705_v12  ;;  %v3941_v12 = vpop.permute.xlu1 %3940 }
 0x7ff   :  { %5061 = vmatprep.mubr.bf16.mxu1 %v5706_v31  ;;  %4794 = vperm.xlu1 %5561, %v5788_v4  }
 0x800   :  { %v8285_v7 = vpack.c.bf16 %v4678_v45, %v4677_v29  ;;  %v5717_v29 = vld [vmem:[#allocation6 + $0xc] ss:$16 sps:$4 sm:$0xff]  }
 0x801   :  { %v4550_v9 = vpop.f32.mrb[244].mxu0  ;;  %4814 = vperm.xlu0 %5562, %v5789_v58  }
 0x802   :  { %v4551_v40 = vadd.f32 %v4550_v9, %v3921_v23  ;;  %v4552_v42 = vpop.f32.mrb[245].mxu0  ;;  %v5790_v23 = vld [vmem:[%s8415_s8 + $0x48] sm:$0xff] }
 0x803   :  { %v4553_v24 = vpop.f32.mrb[246].mxu0  ;;  %4802 = vperm.xlu1 %5561, %v5790_v23   ;;  %v5793_v9 = vld [vmem:[%s8415_s8 + $0x68] sm:$0xff] }
 0x804   :  { %v4554_v34 = vadd.f32 %v4553_v24, %v3926_v47  ;;  %v4555_v30 = vpop.f32.mrb[247].mxu0  ;;  %v4679_v3 = vmax.f32 %v4551_v40, 0.0  ;;  %v5794_v24 = vld [vmem:[%s8415_s8 + $0x78] sm:$0xff]  ;;  %s5879_s8 = smov [#allocation8]  }
 0x805   :  { %4822 = vperm.xlu0 %5562, %v5791_v13   ;;  %s5204_s20 = sshll.u32 %s5879_s8, 4  ;;  %s5205_s20 = int_to_ptr.vmem [resolvable:$true] %s5204_s20 }
 0x806   :  { %v4680_v57 = vmax.f32 %v4554_v34, 0.0  ;;  %5062 = vmatmul.mubr.bf16.gmra.mrb[244].mxu1 %v5708_v63  ;;  %s5839_s21 = scalar_lea.vmem %s5205_s20, 2048  ;;  %p5844_p3 = scmp.lt.s32.totalorder %s5205_s20, %s5205_s20 }
 0x807   :  { %5069 = vmatprep.mubr.bf16.mxu1 %v5709_v19  ;;  %4810 = vperm.xlu1 %5561, %v5792_v6   ;;  %p5840_p2 = scmp.ne.s32.totalorder %s5205_s20, %s5839_s21  ;;  %p5845_p4 = scmp.lt.s32.totalorder %s5839_s21, %s5839_s21 }
 0x808   :  { %v8301_v49 = vpack.c.bf16 %v4680_v57, %v4679_v3 }
 0x809   :  { %v4558_v46 = vpop.f32.mrb[248].mxu0  ;;  %p5846_p5 = por %p5845_p4, %p5844_p3 }
 0x80a   :  { %v4559_v39 = vadd.f32 %v4558_v46, %v3931_v35  ;;  %v4560_v36 = vpop.f32.mrb[249].mxu0 }
 0x80b   :  { %v4561_v32 = vpop.f32.mrb[250].mxu0  ;;  %4818 = vperm.xlu1 %5561, %v5793_v9   ;;  %p5847_p6 = pnand %p5846_p5, %p5840_p2 }
 0x80c   :  { %v4562_v53 = vadd.f32 %v4561_v32, %v3936_v59  ;;  %v4563_v54 = vpop.f32.mrb[251].mxu0  ;;  %v4681_v17 = vmax.f32 %v4559_v39, 0.0 }
 0x80e   :  { %v4682_v28 = vmax.f32 %v4562_v53, 0.0  ;;  %5070 = vmatmul.mubr.bf16.gmra.mrb[248].mxu1 %v5711_v21 }
 0x80f   :  { %5077 = vmatprep.mubr.bf16.mxu1 %v5712_v27  ;;  %4826 = vperm.xlu1 %5561, %v5794_v24  }
 0x810   :  { %v8319_v1 = vpack.c.bf16 %v4682_v28, %v4681_v17 }
 0x811   :  { %v4566_v47 = vpop.f32.mrb[252].mxu0 }
 0x812   :  { %v4567_v31 = vadd.f32 %v4566_v47, %v3941_v12  ;;  %v4568_v56 = vpop.f32.mrb[253].mxu0 }
 0x813   :  { %v4569_v52 = vpop.f32.mrb[254].mxu0 }
 0x814   :  { %v4570_v45 = vadd.f32 %v4569_v52, %v3946_v60  ;;  %v4571_v62 = vpop.f32.mrb[255].mxu0  ;;  %v4683_v8 = vmax.f32 %v4567_v31, 0.0 }
 0x816   :  { %v4684_v40 = vmax.f32 %v4570_v45, 0.0  ;;  %5078 = vmatmul.mubr.bf16.gmra.mrb[252].mxu1 %v5714_v37 }
 0x817   :  { %5118 = vmatprep.mubr.bf16.mxu1 %v5717_v29 }
 0x818   :  { %v8330_v42 = vpack.c.bf16 %v4684_v40, %v4683_v8 }
 0x819   :  { %v4574_v63 = vpop.f32.mrb[0].mxu0 }
 0x81a   :  { %v4575_v19 = vadd.f32 %v4574_v63, %v8226_v18  ;;  %v4576_v34 = vpop.f32.mrb[1].mxu0 }
 0x81b   :  { %v4577_v30 = vpop.f32.mrb[2].mxu0 }
 0x81c   :  { %v4578_v20 = vadd.f32 %v4577_v30, %v8228_v22  ;;  %v4579_v35 = vpop.f32.mrb[3].mxu0  ;;  %v4685_v16 = vmax.f32 %v4575_v19, 0.0 }
 0x81e   :  { %v4686_v3 = vmax.f32 %v4578_v20, 0.0 }
 0x820   :  { %v4725_v57 = vpack.c.bf16 %v4686_v3, %v4685_v16 }
 0x821   :  { %v4582_v59 = vpop.f32.mrb[4].mxu0 }
 0x822   :  { %v4583_v41 = vadd.f32 %v4582_v59, %v8234_v50  ;;  %v4584_v46 = vpop.f32.mrb[5].mxu0  ;;  %5457 = vmatprep.subr.bf16.mxu1 %v4725_v57 }
 0x823   :  { %v4585_v4 = vpop.f32.mrb[6].mxu0  ;;  %5458 = vmatpush3.bf16.msra.mxu1 %v8255_v51 }
 0x824   :  { %v4586_v39 = vadd.f32 %v4585_v4, %v8238_v5  ;;  %v4587_v36 = vpop.f32.mrb[7].mxu0  ;;  %v4687_v18 = vmax.f32 %v4583_v41, 0.0 }
 0x825   :  { %v5718_v36 = vld [vmem:[#allocation6 + $0x28] ss:$16 sps:$4 sm:$0xff]  }
 0x826   :  { %v4688_v21 = vmax.f32 %v4586_v39, 0.0  ;;  %v5720_v39 = vld [vmem:[#allocation6 + $0x2c] ss:$16 sps:$4 sm:$0xff]  }
 0x828   :  { %v4726_v32 = vpack.c.bf16 %v4688_v21, %v4687_v18  ;;  %v5721_v18 = vld [vmem:[#allocation6 + $0x48] ss:$16 sps:$4 sm:$0xff]   ;;  %v5726_v21 = vld [vmem:[#allocation6 + $0x6c] ss:$16 sps:$4 sm:$0xff]  }
 0x829   :  { %v4590_v27 = vpop.f32.mrb[8].mxu0 }
 0x82a   :  { %v4591_v22 = vadd.f32 %v4590_v27, %v8243_v43  ;;  %v4592_v53 = vpop.f32.mrb[9].mxu0  ;;  %5459 = vmatprep.subr.bf16.mxu1 %v4726_v32  ;;  %v5727_v32 = vld [vmem:[#allocation6 + $0x88] ss:$16 sps:$4 sm:$0xff]   ;;  %v5732_v27 = vld [vmem:[#allocation6 + $0xac] ss:$16 sps:$4 sm:$0xff]  }
 0x82b   :  { %v4593_v54 = vpop.f32.mrb[10].mxu0  ;;  %5460 = vmatpush3.bf16.msra.mxu1 %v8259_v2  ;;  %v5733_v53 = vld [vmem:[#allocation6 + $0xc8] ss:$16 sps:$4 sm:$0xff]  }
 0x82c   :  { %v4594_v50 = vadd.f32 %v4593_v54, %v8245_v0  ;;  %v4595_v58 = vpop.f32.mrb[11].mxu0  ;;  %v4689_v23 = vmax.f32 %v4591_v22, 0.0  ;;  %v5735_v22 = vld [vmem:[#allocation6 + $0xcc] ss:$16 sps:$4 sm:$0xff]  }
 0x82d   :  { %v5738_v54 = vld [vmem:[#allocation6 + $0xec] ss:$16 sps:$4 sm:$0xff]  }
 0x82e   :  { %v4690_v17 = vmax.f32 %v4594_v50, 0.0  ;;  %v5736_v50 = vld [vmem:[#allocation6 + $0xe8] ss:$16 sps:$4 sm:$0xff]  }
 0x830   :  { %v4727_v51 = vpack.c.bf16 %v4690_v17, %v4689_v23 }
 0x831   :  { %v4598_v28 = vpop.f32.mrb[12].mxu0 }
 0x832   :  { %v4599_v5 = vadd.f32 %v4598_v28, %v8250_v14  ;;  %v4600_v13 = vpop.f32.mrb[13].mxu0  ;;  %5461 = vmatprep.subr.bf16.mxu1 %v4727_v51 }
 0x833   :  { %v4601_v12 = vpop.f32.mrb[14].mxu0  ;;  %5462 = vmatpush3.bf16.msra.mxu1 %v8263_v11 }
 0x834   :  { %v4602_v43 = vadd.f32 %v4601_v12, %v8253_v44  ;;  %v4603_v47 = vpop.f32.mrb[15].mxu0  ;;  %v4691_v6 = vmax.f32 %v4599_v5, 0.0 }
 0x836   :  { %v4692_v31 = vmax.f32 %v4602_v43, 0.0 }
 0x838   :  { %v4728_v2 = vpack.c.bf16 %v4692_v31, %v4691_v6 }
 0x839   :  { %v4606_v56 = vpop.f32.mrb[16].mxu0 }
 0x83a   :  { %v4607_v0 = vadd.f32 %v4606_v56, %v8257_v33  ;;  %v4608_v37 = vpop.f32.mrb[17].mxu0  ;;  %5463 = vmatprep.subr.bf16.mxu1 %v4728_v2 }
 0x83b   :  { %v4609_v60 = vpop.f32.mrb[18].mxu0  ;;  %5464 = vmatpush3.bf16.msra.mxu1 %v8269_v55 }
 0x83c   :  { %v4610_v14 = vadd.f32 %v4609_v60, %v8261_v25  ;;  %v4611_v52 = vpop.f32.mrb[19].mxu0  ;;  %v4693_v29 = vmax.f32 %v4607_v0, 0.0 }
 0x83e   :  { %v4694_v45 = vmax.f32 %v4610_v14, 0.0 }
 0x840   :  { %v4729_v11 = vpack.c.bf16 %v4694_v45, %v4693_v29 }
 0x841   :  { %v4614_v62 = vpop.f32.mrb[20].mxu0 }
 0x842   :  { %v4615_v44 = vadd.f32 %v4614_v62, %v8265_v26  ;;  %v4616_v9 = vpop.f32.mrb[21].mxu0  ;;  %5465 = vmatprep.subr.bf16.mxu1 %v4729_v11 }
 0x843   :  { %v4617_v8 = vpop.f32.mrb[22].mxu0  ;;  %5466 = vmatpush3.bf16.msra.mxu1 %v8285_v7 }
 0x844   :  { %v4618_v33 = vadd.f32 %v4617_v8, %v8267_v38  ;;  %v4619_v40 = vpop.f32.mrb[23].mxu0  ;;  %v4695_v63 = vmax.f32 %v4615_v44, 0.0 }
 0x846   :  { %v4696_v24 = vmax.f32 %v4618_v33, 0.0 }
 0x848   :  { %v4730_v55 = vpack.c.bf16 %v4696_v24, %v4695_v63 }
 0x849   :  { %v4622_v19 = vpop.f32.mrb[24].mxu0 }
 0x84a   :  { %v4623_v25 = vadd.f32 %v4622_v19, %v8283_v10  ;;  %v4624_v34 = vpop.f32.mrb[25].mxu0  ;;  %5467 = vmatprep.subr.bf16.mxu1 %v4730_v55 }
 0x84b   :  { %v4625_v30 = vpop.f32.mrb[26].mxu0  ;;  %5468 = vmatpush3.bf16.msra.mxu1 %v8301_v49 }
 0x84c   :  { %v4626_v26 = vadd.f32 %v4625_v30, %v8290_v15  ;;  %v4627_v20 = vpop.f32.mrb[27].mxu0  ;;  %v4697_v35 = vmax.f32 %v4623_v25, 0.0  ;;  %v5715_v15 = vld [vmem:[#allocation6 + $0x8] ss:$16 sps:$4 sm:$0xff]  }
 0x84e   :  { %v4698_v16 = vmax.f32 %v4626_v26, 0.0 }
 0x850   :  { %v4731_v7 = vpack.c.bf16 %v4698_v16, %v4697_v35 }
 0x851   :  { %v4630_v3 = vpop.f32.mrb[28].mxu0 }
 0x852   :  { %v4631_v38 = vadd.f32 %v4630_v3, %v8309_v48  ;;  %v4632_v57 = vpop.f32.mrb[29].mxu0  ;;  %5469 = vmatprep.subr.bf16.mxu1 %v4731_v7  ;;  %v5723_v48 = vld [vmem:[#allocation6 + $0x4c] ss:$16 sps:$4 sm:$0xff]  }
 0x853   :  { %v4633_v59 = vpop.f32.mrb[30].mxu0  ;;  %5470 = vmatpush3.bf16.msra.mxu1 %v8319_v1  ;;  %v5729_v1 = vld [vmem:[#allocation6 + $0x8c] ss:$16 sps:$4 sm:$0xff]  }
 0x854   :  { %v4634_v10 = vadd.f32 %v4633_v59, %v8314_v61  ;;  %v4635_v41 = vpop.f32.mrb[31].mxu0  ;;  %v4699_v46 = vmax.f32 %v4631_v38, 0.0  ;;  %v5724_v61 = vld [vmem:[#allocation6 + $0x68] ss:$16 sps:$4 sm:$0xff]  }
 0x856   :  { %v4700_v4 = vmax.f32 %v4634_v10, 0.0 }
 0x858   :  { %v4732_v49 = vpack.c.bf16 %v4700_v4, %v4699_v46 }
 0x85a   :  { %5471 = vmatprep.subr.bf16.mxu1 %v4732_v49 }
 0x85b   :  { %5472 = vmatpush3.bf16.msra.mxu1 %v8330_v42  ;;  %v5730_v42 = vld [vmem:[#allocation6 + $0xa8] ss:$16 sps:$4 sm:$0xff]  }
 0x85e   :  { %5119 = vmatmul.mubr.bf16.vlgmr.msra.gmra.mrb[0].mxu1 %v5715_v15 }
 0x85f   :  { %5126 = vmatprep.mubr.bf16.mxu1 %v5720_v39 }
 0x866   :  { %5127 = vmatmul.mubr.bf16.gmra.mrb[4].mxu1 %v5718_v36 }
 0x867   :  { %5134 = vmatprep.mubr.bf16.mxu1 %v5723_v48 }
 0x86b   :  { %v4767_v49 = vpop.permute.xlu1 %4766  ;;  %v4771_v39 = vpop.permute.xlu0 %4770 }
 0x86e   :  { %5135 = vmatmul.mubr.bf16.gmra.mrb[8].mxu1 %v5721_v18 }
 0x86f   :  { %5142 = vmatprep.mubr.bf16.mxu1 %v5726_v21 }
 0x876   :  { %5143 = vmatmul.mubr.bf16.gmra.mrb[12].mxu1 %v5724_v61  ;;  %v4775_v61 = vpop.permute.xlu1 %4774 }
 0x877   :  { %5150 = vmatprep.mubr.bf16.mxu1 %v5729_v1 }
 0x87e   :  { %5151 = vmatmul.mubr.bf16.gmra.mrb[16].mxu1 %v5727_v32 }
 0x87f   :  { %5158 = vmatprep.mubr.bf16.mxu1 %v5732_v27 }
 0x886   :  { %5159 = vmatmul.mubr.bf16.gmra.mrb[20].mxu1 %v5730_v42 }
 0x887   :  { %5166 = vmatprep.mubr.bf16.mxu1 %v5735_v22 }
 0x88e   :  { %5167 = vmatmul.mubr.bf16.gmra.mrb[24].mxu1 %v5733_v53 }
 0x88f   :  { %5174 = vmatprep.mubr.bf16.mxu1 %v5738_v54  ;;  %v4779_v54 = vpop.permute.xlu1 %4778 }
 0x896   :  { %5175 = vmatmul.mubr.bf16.gmra.mrb[28].mxu1 %v5736_v50 }
 0x8b1   :  { %v5409_v58 = vpop.f32.mrb[224].mxu1 }
 0x8b2   :  { %v5410_v23 = vpop.f32.mrb[225].mxu1 }
 0x8b3   :  { %v5411_v17 = vadd.f32 %v5410_v23, %v5409_v58  ;;  %v5412_v51 = vpop.f32.mrb[226].mxu1 }
 0x8b4   :  { %v5413_v28 = vpop.f32.mrb[227].mxu1 }
 0x8b5   :  { %v5414_v5 = vadd.f32 %v5413_v28, %v5412_v51  ;;  %v5024_v48 = vadd.f32 %v5411_v17, %v4767_v49 }
 0x8b7   :  { %v5027_v32 = vadd.f32 %v5414_v5, %v4771_v39 }
 0x8b9   :  { %v5415_v13 = vpop.f32.mrb[228].mxu1 }
 0x8ba   :  { %v5416_v12 = vpop.f32.mrb[229].mxu1 }
 0x8bb   :  { %v5417_v43 = vadd.f32 %v5416_v12, %v5415_v13  ;;  %v5418_v47 = vpop.f32.mrb[230].mxu1 }
 0x8bc   :  { %v5419_v6 = vpop.f32.mrb[231].mxu1 }
 0x8bd   :  { %v5420_v31 = vadd.f32 %v5419_v6, %v5418_v47  ;;  %v5032_v58 = vadd.f32 %v5417_v43, %v4775_v61  ;;  %v4783_v6 = vpop.permute.xlu0 %4782 }
 0x8bf   :  { %v5035_v13 = vadd.f32 %v5420_v31, %v4779_v54 }
 0x8c1   :  { %v5421_v2 = vpop.f32.mrb[232].mxu1 }
 0x8c2   :  { %v5422_v56 = vpop.f32.mrb[233].mxu1 }
 0x8c3   :  { %v8359_v0 = vadd.f32 %v5422_v56, %v5421_v2  ;;  %v5424_v37 = vpop.f32.mrb[234].mxu1  ;;  %v4787_v2 = vpop.permute.xlu1 %4786 }
 0x8c4   :  { %v5425_v60 = vpop.f32.mrb[235].mxu1 }
 0x8c5   :  { %v8361_v14 = vadd.f32 %v5425_v60, %v5424_v37  ;;  %v5040_v37 = vadd.f32 %v8359_v0, %v4783_v6 }
 0x8c7   :  { %v5043_v43 = vadd.f32 %v8361_v14, %v4787_v2 }
 0x8c9   :  { %v5427_v52 = vpop.f32.mrb[236].mxu1 }
 0x8ca   :  { %v5428_v29 = vpop.f32.mrb[237].mxu1 }
 0x8cb   :  { %v8363_v45 = vadd.f32 %v5428_v29, %v5427_v52  ;;  %v5430_v11 = vpop.f32.mrb[238].mxu1 }
 0x8cc   :  { %v5431_v62 = vpop.f32.mrb[239].mxu1 }
 0x8cd   :  { %v8365_v44 = vadd.f32 %v5431_v62, %v5430_v11 }
 0x8d1   :  { %v5433_v9 = vpop.f32.mrb[240].mxu1 }
 0x8d2   :  { %v5434_v8 = vpop.f32.mrb[241].mxu1 }
 0x8d3   :  { %v8367_v33 = vadd.f32 %v5434_v8, %v5433_v9  ;;  %v5436_v40 = vpop.f32.mrb[242].mxu1  ;;  %v4791_v9 = vpop.permute.xlu0 %4790 }
 0x8d4   :  { %v5437_v63 = vpop.f32.mrb[243].mxu1 }
 0x8d5   :  { %v8369_v24 = vadd.f32 %v5437_v63, %v5436_v40  ;;  %v4795_v40 = vpop.permute.xlu1 %4794 }
 0x8d6   :  { %v5051_v0 = vadd.f32 %v8365_v44, %v4795_v40 }
 0x8d9   :  { %v5439_v55 = vpop.f32.mrb[244].mxu1 }
 0x8da   :  { %v5440_v19 = vpop.f32.mrb[245].mxu1 }
 0x8db   :  { %v8371_v25 = vadd.f32 %v5440_v19, %v5439_v55  ;;  %v5442_v34 = vpop.f32.mrb[246].mxu1  ;;  %v5048_v55 = vadd.f32 %v8363_v45, %v4791_v9 }
 0x8dc   :  { %v5443_v30 = vpop.f32.mrb[247].mxu1 }
 0x8dd   :  { %v8373_v26 = vadd.f32 %v5443_v30, %v5442_v34 }
 0x8e1   :  { %v5445_v20 = vpop.f32.mrb[248].mxu1 }
 0x8e2   :  { %v5446_v35 = vpop.f32.mrb[249].mxu1 }
 0x8e3   :  { %v8375_v16 = vadd.f32 %v5446_v35, %v5445_v20  ;;  %v5448_v7 = vpop.f32.mrb[250].mxu1 }
 0x8e4   :  { %v5449_v3 = vpop.f32.mrb[251].mxu1 }
 0x8e5   :  { %v8377_v38 = vadd.f32 %v5449_v3, %v5448_v7  ;;  %v4799_v7 = vpop.permute.xlu0 %4798 }
 0x8e9   :  { %v5451_v57 = vpop.f32.mrb[252].mxu1 }
 0x8ea   :  { %v5452_v59 = vpop.f32.mrb[253].mxu1 }
 0x8eb   :  { %v8379_v10 = vadd.f32 %v5452_v59, %v5451_v57  ;;  %v5454_v41 = vpop.f32.mrb[254].mxu1  ;;  %v4803_v57 = vpop.permute.xlu1 %4802 }
 0x8ec   :  { %v5455_v46 = vpop.f32.mrb[255].mxu1  ;;  %v5059_v45 = vadd.f32 %v8369_v24, %v4803_v57 }
 0x8ed   :  { %v8381_v4 = vadd.f32 %v5455_v46, %v5454_v41  ;;  %v5056_v41 = vadd.f32 %v8367_v33, %v4799_v7 }
 0x931   :  { %v5473_v15 = vpop.f32.mrb[0].mxu1 }
 0x932   :  { %v5474_v36 = vpop.f32.mrb[1].mxu1 }
 0x933   :  { %v5475_v18 = vadd.f32 %v5474_v36, %v5473_v15  ;;  %v5476_v21 = vpop.f32.mrb[2].mxu1 }
 0x934   :  { %v5477_v1 = vpop.f32.mrb[3].mxu1 }
 0x935   :  { %v5121_v27 = vadd.f32 %v5475_v18, %v5024_v48  ;;  %v5478_v42 = vadd.f32 %v5477_v1, %v5476_v21  ;;  %v4807_v48 = vpop.permute.xlu0 %4806  ;;  %v4811_v21 = vpop.permute.xlu1 %4810 }
 0x936   :  { %v5064_v1 = vadd.f32 %v8371_v25, %v4807_v48  ;;  %v5067_v33 = vadd.f32 %v8373_v26, %v4811_v21 }
 0x937   :  { %5183 = vst [vmem:[#allocation8] sm:$0xff] %v5121_v27  ;;  %v5124_v22 = vadd.f32 %v5478_v42, %v5027_v32 }
 0x939   :  { %5184 = vst [vmem:[#allocation8 + $0x8] sm:$0xff] %v5124_v22  ;;  %v5479_v53 = vpop.f32.mrb[4].mxu1  ;;  %v4815_v54 = vpop.permute.xlu0 %4814 }
 0x93a   :  { %v5480_v50 = vpop.f32.mrb[5].mxu1 }
 0x93b   :  { %v5481_v23 = vadd.f32 %v5480_v50, %v5479_v53  ;;  %v5482_v51 = vpop.f32.mrb[6].mxu1 }
 0x93c   :  { %v5483_v28 = vpop.f32.mrb[7].mxu1 }
 0x93d   :  { %v5129_v12 = vadd.f32 %v5481_v23, %v5032_v58  ;;  %v5484_v17 = vadd.f32 %v5483_v28, %v5482_v51  ;;  %v4819_v58 = vpop.permute.xlu1 %4818  ;;  %v5072_v51 = vadd.f32 %v8375_v16, %v4815_v54  ;;  %v4823_v6 = vpop.permute.xlu0 %4822 }
 0x93e   :  { %v5075_v25 = vadd.f32 %v8377_v38, %v4819_v58 }
 0x93f   :  { %5185 = vst [vmem:[#allocation8 + $0x10] sm:$0xff] %v5129_v12  ;;  %v5132_v47 = vadd.f32 %v5484_v17, %v5035_v13 }
 0x941   :  { %5186 = vst [vmem:[#allocation8 + $0x18] sm:$0xff] %v5132_v47  ;;  %v5485_v5 = vpop.f32.mrb[8].mxu1  ;;  %v4827_v2 = vpop.permute.xlu1 %4826 }
 0x942   :  { %v5486_v56 = vpop.f32.mrb[9].mxu1  ;;  %v5083_v16 = vadd.f32 %v8381_v4, %v4827_v2 }
 0x943   :  { %v5487_v60 = vadd.f32 %v5486_v56, %v5485_v5  ;;  %v5488_v52 = vpop.f32.mrb[10].mxu1 }
 0x944   :  { %v5489_v29 = vpop.f32.mrb[11].mxu1 }
 0x945   :  { %v5137_v11 = vadd.f32 %v5487_v60, %v5040_v37  ;;  %v5490_v62 = vadd.f32 %v5489_v29, %v5488_v52  ;;  %v5080_v37 = vadd.f32 %v8379_v10, %v4823_v6 }
 0x947   :  { %5187 = vst [vmem:[#allocation8 + $0x20] sm:$0xff] %v5137_v11  ;;  %v5140_v31 = vadd.f32 %v5490_v62, %v5043_v43 }
 0x949   :  { %5188 = vst [vmem:[#allocation8 + $0x28] sm:$0xff] %v5140_v31  ;;  %v5491_v8 = vpop.f32.mrb[12].mxu1 }
 0x94a   :  { %v5492_v63 = vpop.f32.mrb[13].mxu1 }
 0x94b   :  { %v5493_v19 = vadd.f32 %v5492_v63, %v5491_v8  ;;  %v5494_v34 = vpop.f32.mrb[14].mxu1 }
 0x94c   :  { %v5495_v30 = vpop.f32.mrb[15].mxu1 }
 0x94d   :  { %v5145_v20 = vadd.f32 %v5493_v19, %v5048_v55  ;;  %v5496_v35 = vadd.f32 %v5495_v30, %v5494_v34 }
 0x94f   :  { %5189 = vst [vmem:[#allocation8 + $0x30] sm:$0xff] %v5145_v20  ;;  %v5148_v14 = vadd.f32 %v5496_v35, %v5051_v0 }
 0x951   :  { %5190 = vst [vmem:[#allocation8 + $0x38] sm:$0xff] %v5148_v14  ;;  %v5497_v3 = vpop.f32.mrb[16].mxu1 }
 0x952   :  { %v5498_v59 = vpop.f32.mrb[17].mxu1 }
 0x953   :  { %v5499_v46 = vadd.f32 %v5498_v59, %v5497_v3  ;;  %v5500_v49 = vpop.f32.mrb[18].mxu1 }
 0x954   :  { %v5501_v15 = vpop.f32.mrb[19].mxu1 }
 0x955   :  { %v5153_v39 = vadd.f32 %v5499_v46, %v5056_v41  ;;  %v5502_v36 = vadd.f32 %v5501_v15, %v5500_v49 }
 0x957   :  { %5191 = vst [vmem:[#allocation8 + $0x40] sm:$0xff] %v5153_v39  ;;  %v5156_v44 = vadd.f32 %v5502_v36, %v5059_v45 }
 0x959   :  { %5192 = vst [vmem:[#allocation8 + $0x48] sm:$0xff] %v5156_v44  ;;  %v5503_v18 = vpop.f32.mrb[20].mxu1 }
 0x95a   :  { %v5504_v61 = vpop.f32.mrb[21].mxu1 }
 0x95b   :  { %v5505_v32 = vadd.f32 %v5504_v61, %v5503_v18  ;;  %v5506_v27 = vpop.f32.mrb[22].mxu1 }
 0x95c   :  { %v5507_v42 = vpop.f32.mrb[23].mxu1 }
 0x95d   :  { %v5161_v22 = vadd.f32 %v5505_v32, %v5064_v1  ;;  %v5508_v53 = vadd.f32 %v5507_v42, %v5506_v27 }
 0x95f   :  { %5193 = vst [vmem:[#allocation8 + $0x50] sm:$0xff] %v5161_v22  ;;  %v5164_v24 = vadd.f32 %v5508_v53, %v5067_v33 }
 0x961   :  { %5194 = vst [vmem:[#allocation8 + $0x58] sm:$0xff] %v5164_v24  ;;  %v5509_v50 = vpop.f32.mrb[24].mxu1 }
 0x962   :  { %v5510_v23 = vpop.f32.mrb[25].mxu1 }
 0x963   :  { %v5511_v28 = vadd.f32 %v5510_v23, %v5509_v50  ;;  %v5512_v13 = vpop.f32.mrb[26].mxu1 }
 0x964   :  { %v5513_v12 = vpop.f32.mrb[27].mxu1 }
 0x965   :  { %v5169_v17 = vadd.f32 %v5511_v28, %v5072_v51  ;;  %v5514_v47 = vadd.f32 %v5513_v12, %v5512_v13 }
 0x967   :  { %5195 = vst [vmem:[#allocation8 + $0x60] sm:$0xff] %v5169_v17  ;;  %v5172_v26 = vadd.f32 %v5514_v47, %v5075_v25 }
 0x969   :  { %5196 = vst [vmem:[#allocation8 + $0x68] sm:$0xff] %v5172_v26  ;;  %v5515_v5 = vpop.f32.mrb[28].mxu1 }
 0x96a   :  { %v5516_v56 = vpop.f32.mrb[29].mxu1 }
 0x96b   :  { %v5517_v60 = vadd.f32 %v5516_v56, %v5515_v5  ;;  %v5518_v52 = vpop.f32.mrb[30].mxu1 }
 0x96c   :  { %v5519_v29 = vpop.f32.mrb[31].mxu1 }
 0x96d   :  { %v5177_v43 = vadd.f32 %v5517_v60, %v5080_v37  ;;  %v5520_v38 = vadd.f32 %v5519_v29, %v5518_v52 }
 0x96f   :  { %5197 = vst [vmem:[#allocation8 + $0x70] sm:$0xff] %v5177_v43  ;;  %v5180_v11 = vadd.f32 %v5520_v38, %v5083_v16 }
 0x971   :  { %5198 = vst [vmem:[#allocation8 + $0x78] sm:$0xff] %v5180_v11 }
 0x972   :  { %5850 = shalt.err (!%p5847_p6)
}
 0x973   :  { %s5851_s24 = scalar_lea.hbm %s8416_s9, 2048 }
 0x974   :  { %p5852_p7 = scmp.ne.s32.totalorder %s8416_s9, %s5851_s24  ;;  %p5855_p8 = scmp.lt.u32.totalorder %s5851_s24, %s8416_s9 }
 0x976   :  { %p5857_p9 = pnand %p5855_p8, %p5852_p7 }
 0x978   :  { %5860 = shalt.err (!%p5857_p9)
}
 0x979   :  { %s5880_s28 = smov 128   ;;  %s5881_s29 = smov 8  }
 0x97a   :  { %5210 = dma.vmem_to_hbm [thread:$0]  %s5205_s20, 2048, %s8416_s9, [#allocation5], %s5880_s28, %s5880_s28, %s5881_s29  }
 0x97b   :  { %5865 = dma.done.wait [#allocation5], 2048  }
 0x97c   :  { %5866 = vsyncadd [#allocation5], 4294965248 }
 0x97d   :  { %5214 = vsyncpa [#allocation4], 1 }
 0x97e   :  { %5215 = vsyncpa [#allocation7], 1 }
 0x97f   :  { %5216 = vsyncpa [#allocation5], 1 }

</bundles_post_ra>
